<compile_context>
chip_gen: v7x
topology: tpu7x:2x2x1
jax: 0.10.0
libtpu: 0.0.40
codegen_flags: <defaults>
</compile_context>

<pallas_src>
import functools

import jax
import jax.numpy as jnp
from jax import lax
from jax.experimental import pallas as pl
from jax.experimental.pallas import tpu as pltpu


def _conv3x3_shifted(xp, out_rows, W, w_r):
    """3x3 'SAME'(W) / H-pre-padded conv as one (M,3C)x(3C,3P) matmul + row-shift adds.

    xp:   ((out_rows + 2) * W, C) f32; rows already include one halo row above/below
          the out_rows output rows (halo rows are real data or exact zeros).
    w_r:  (3*C, 3*P) bf16 laid out rows=(dw, c), cols=(dh, p).
    returns (out_rows * W, P) f32.
    """
    m_in, _ = xp.shape
    m_out = out_rows * W
    P = w_r.shape[1] // 3

    col = lax.broadcasted_iota(jnp.int32, (m_in, 1), 0) % W
    zero = jnp.zeros((), xp.dtype)
    # tap reading column w-1 (zero at w == 0); wrap-around rows are masked away
    x_m = jnp.where(col == 0, zero, pltpu.roll(xp, 1, axis=0))
    # tap reading column w+1 (zero at w == W-1)
    x_p = jnp.where(col == W - 1, zero, pltpu.roll(xp, m_in - 1, axis=0))

    # cast per-tap to bf16 (early cast -> half the concat/patch traffic)
    patches = jnp.concatenate(
        [x_m.astype(w_r.dtype), xp.astype(w_r.dtype), x_p.astype(w_r.dtype)],
        axis=-1)                                                      # (m_in, 3C) bf16

    z = jnp.dot(patches, w_r, preferred_element_type=jnp.float32)    # (m_in, 3P) f32

    # y[o, w, p] = sum_dh z[(o+dh)*W + w, dh*P + p]
    # row shifts of 0 / W / 2W are sublane-aligned (W % 8 == 0); column groups are
    # lane-aligned multiples of P.
    return (z[0:m_out, 0:P]
            + z[W:W + m_out, P:2 * P]
            + z[2 * W:2 * W + m_out, 2 * P:3 * P])


def _basic_block_kernel(x_ref, x_hbm, w1_ref, s1_ref, b1_ref,
                        w2_ref, s2_ref, b2_ref, out_ref,
                        pad_ref, t1_ref, sem):
    n = pl.program_id(0)
    ht = pl.program_id(1)
    n_h_tiles = pl.num_programs(1)

    _, TH, W, Cin = x_ref.shape
    P = out_ref.shape[3]
    img_h = n_h_tiles * TH
    row0 = n * img_h + ht * TH        # first row of this tile in the (N*H, W, C) HBM view

    # ---- assemble a (TH+4)-row halo window of x into pad_ref (f32) via DMA ----
    # top halo: rows row0-2, row0-1 (zero when first tile of the image)
    @pl.when(ht > 0)
    def _():
        pltpu.make_async_copy(x_hbm.at[pl.ds(row0 - 2, 2)],
                              pad_ref.at[pl.ds(0, 2)], sem.at[0]).start()

    # bottom halo: rows row0+TH, row0+TH+1 (zero when last tile of the image)
    @pl.when(ht < n_h_tiles - 1)
    def _():
        pltpu.make_async_copy(x_hbm.at[pl.ds(row0 + TH, 2)],
                              pad_ref.at[pl.ds(TH + 2, 2)], sem.at[1]).start()

    # center TH rows: local VMEM->VMEM DMA from the auto-pipelined x block
    # (removes the vld/vst slot traffic of a vreg copy).
    pltpu.make_async_copy(x_ref.at[0], pad_ref.at[pl.ds(2, TH)], sem.at[2]).start()

    # zero only the 2-row halo border at image edges (never the whole buffer)
    @pl.when(ht == 0)
    def _():
        pad_ref[0:2, :, :] = jnp.zeros((2, W, Cin), jnp.float32)

    @pl.when(ht == n_h_tiles - 1)
    def _():
        pad_ref[TH + 2:TH + 4, :, :] = jnp.zeros((2, W, Cin), jnp.float32)

    @pl.when(ht > 0)
    def _():
        pltpu.make_async_copy(x_hbm.at[pl.ds(row0 - 2, 2)],
                              pad_ref.at[pl.ds(0, 2)], sem.at[0]).wait()

    @pl.when(ht < n_h_tiles - 1)
    def _():
        pltpu.make_async_copy(x_hbm.at[pl.ds(row0 + TH, 2)],
                              pad_ref.at[pl.ds(TH + 2, 2)], sem.at[1]).wait()

    pltpu.make_async_copy(x_ref.at[0], pad_ref.at[pl.ds(2, TH)], sem.at[2]).wait()

    # ---- conv1 + BN1 + ReLU over TH+2 output rows (one extra row each side for conv2) ----
    xp = pad_ref[...].reshape((TH + 4) * W, Cin)
    y1 = _conv3x3_shifted(xp, TH + 2, W, w1_ref[...])                 # (M1, P) f32
    t1_ref[...] = jnp.maximum(y1 * s1_ref[...] + b1_ref[...], 0.0).astype(t1_ref.dtype)

    # conv2's zero padding in H: t1 rows outside the image must be exactly zero
    # (BN bias + ReLU of an all-zero conv row is NOT zero, so overwrite explicitly).
    @pl.when(ht == 0)
    def _():
        t1_ref[0:W, :] = jnp.zeros((W, P), t1_ref.dtype)

    @pl.when(ht == n_h_tiles - 1)
    def _():
        t1_ref[(TH + 1) * W:(TH + 2) * W, :] = jnp.zeros((W, P), t1_ref.dtype)

    # ---- conv2 + BN2 + identity + ReLU ----
    # bf16 t1 scratch (half footprint / store traffic); up-cast to f32 only for the
    # roll/mask tap construction (values are identical, rolls stay on the proven f32 path).
    t1f = t1_ref[...].astype(jnp.float32)
    y2 = _conv3x3_shifted(t1f, TH, W, w2_ref[...])                    # (TH*W, P) f32
    y2 = y2 * s2_ref[...] + b2_ref[...]
    identity = pad_ref[2:TH + 2, :, :].reshape(TH * W, Cin)           # exact f32 x
    out_ref[...] = jnp.maximum(y2 + identity, 0.0).reshape(1, TH, W, P)


def _fold_bn(gamma, beta, mean, var, eps=1e-5):
    scale = gamma * lax.rsqrt(var + eps)
    bias = beta - mean * scale
    return (scale.reshape(1, -1).astype(jnp.float32),
            bias.reshape(1, -1).astype(jnp.float32))


def _vmem_limit_bytes():
    """Generation-aware VMEM limit: ~56 MiB on v7x (64 MiB/TC), ~100 MiB on v5e/v6e (128 MiB)."""
    try:
        cap = int(pltpu.get_tpu_info().vmem_capacity_bytes)
    except Exception:
        cap = 64 * 1024 * 1024            # conservative default (v7x per-core VMEM)
    return min(cap - (8 << 20), 100 << 20)


def _per_step_bytes(th, W, Cin, P):
    """Rough live-bytes estimate per grid step: pipeline buffers, scratch, and the large
    matmul transients (patch/Z materialization), so the picked tile leaves headroom."""
    m1 = (th + 4) * W                      # conv1 rows (incl. halo)
    m2 = (th + 2) * W                      # conv2 rows / t1 rows
    return (
        2 * th * W * Cin * 4               # x input block (double-buffered, f32)
        + 2 * th * W * P * 4               # out block (double-buffered, f32)
        + m1 * Cin * 4                     # pad scratch (f32)
        + m2 * P * 2                       # t1 scratch (bf16)
        + m1 * (2 * Cin * 4 + 3 * Cin * 2 + 3 * P * 4)   # conv1 temps: rolls f32, patches bf16, Z f32
        + m2 * (3 * P * 4 + 3 * P * 2 + 3 * P * 4)       # conv2 temps: t1f+rolls f32, patches bf16, Z f32
    )


def _pick_tile_h(H, W, Cin, P, budget_bytes):
    """Largest H-tile (divisor of H) whose estimated live bytes fit the budget.
    If nothing fits, fall back to the smallest divisor >= 2 (explicit, may still be tight)."""
    divs = [d for d in range(2, H + 1) if H % d == 0]
    assert divs, "H must be >= 2"
    best = divs[0]
    for th in divs:
        if _per_step_bytes(th, W, Cin, P) <= budget_bytes:
            best = th
    return best


def basic_block_pallas_nhwc(x_nhwc, w1_hwio, bn1, w2_hwio, bn2, *, tile_h=None, eps=1e-5):
    """BasicBlock forward on NHWC activations (preferred: no boundary transposes).
    x_nhwc: (N, H, W, C) f32; conv weights HWIO; bn* = (gamma, beta, mean, var)."""
    N, H, W, Cin = x_nhwc.shape
    kh, kw, cin_w, P = w1_hwio.shape
    assert (kh, kw) == (3, 3) and cin_w == Cin
    assert w2_hwio.shape == (3, 3, P, P)
    # expansion=1, downsample=None, stride=1  =>  identity add requires Cin == planes
    assert Cin == P, "downsample / stride>1 branch not implemented (module defaults)"
    assert W % 8 == 0, "W must be a multiple of 8 (sublane tiling)"  # TODO(synk): general W
    assert H >= 2

    s1, b1 = _fold_bn(*bn1, eps=eps)
    s2, b2 = _fold_bn(*bn2, eps=eps)
    # shift-and-add layout: rows = (dw, c), cols = (dh, p)  ->  RHS width 3P fills the MXU
    w1r = jnp.transpose(w1_hwio, (1, 2, 0, 3)).reshape(3 * Cin, 3 * P).astype(jnp.bfloat16)
    w2r = jnp.transpose(w2_hwio, (1, 2, 0, 3)).reshape(3 * P, 3 * P).astype(jnp.bfloat16)

    x = x_nhwc.astype(jnp.float32)

    vmem_limit = _vmem_limit_bytes()
    # Resident weights counted double-buffered (constant-index blocks).
    # TODO(synk): single-buffer them via pipeline_mode=pl.Buffered(1) once that path is stable.
    weight_bytes = 2 * 2 * (9 * Cin * P + 9 * P * P)
    budget = max(vmem_limit // 2 - weight_bytes, 1 << 20)
    TH = tile_h if tile_h is not None else _pick_tile_h(H, W, Cin, P, budget)
    assert TH >= 2 and H % TH == 0
    n_h_tiles = H // TH

    return pl.pallas_call(
        _basic_block_kernel,
        out_shape=jax.ShapeDtypeStruct((N, H, W, P), jnp.float32),
        grid_spec=pltpu.PrefetchScalarGridSpec(
            num_scalar_prefetch=0,
            grid=(N, n_h_tiles),
            in_specs=[
                pl.BlockSpec((1, TH, W, Cin), lambda n, h: (n, h, 0, 0)),  # x (pipelined)
                pl.BlockSpec(memory_space=pl.ANY),                         # x (HBM, halo DMA)
                pl.BlockSpec((3 * Cin, 3 * P), lambda n, h: (0, 0)),       # w1 (resident)
                pl.BlockSpec((1, P), lambda n, h: (0, 0)),                 # s1
                pl.BlockSpec((1, P), lambda n, h: (0, 0)),                 # b1
                pl.BlockSpec((3 * P, 3 * P), lambda n, h: (0, 0)),         # w2 (resident)
                pl.BlockSpec((1, P), lambda n, h: (0, 0)),                 # s2
                pl.BlockSpec((1, P), lambda n, h: (0, 0)),                 # b2
            ],
            out_specs=pl.BlockSpec((1, TH, W, P), lambda n, h: (n, h, 0, 0)),
            scratch_shapes=[
                pltpu.VMEM((TH + 4, W, Cin), jnp.float32),        # padded x window
                pltpu.VMEM(((TH + 2) * W, P), jnp.bfloat16),      # t1 (conv1 out, +1 row halo)
                pltpu.SemaphoreType.DMA((3,)),                    # top / bottom halo, center copy
            ],
        ),
        compiler_params=pltpu.CompilerParams(
            dimension_semantics=("parallel", "parallel"),
            vmem_limit_bytes=vmem_limit,
        ),
    )(x, x.reshape(N * H, W, Cin), w1r, s1, b1, w2r, s2, b2)


def basic_block_pallas(x_nchw, w1_hwio, bn1, w2_hwio, bn2, *, tile_h=None, eps=1e-5):
    """NCHW wrapper matching the PyTorch module's layout contract.
    TODO(synk): callers holding NHWC activations should call basic_block_pallas_nhwc
    directly and skip these two boundary transposes (full extra HBM passes)."""
    x = jnp.transpose(x_nchw, (0, 2, 3, 1))
    y = basic_block_pallas_nhwc(x, w1_hwio, bn1, w2_hwio, bn2, tile_h=tile_h, eps=eps)
    return jnp.transpose(y, (0, 3, 1, 2))


def _ref_forward_nhwc(x, w1, s1, b1, w2, s2, b2):
    """Pure-JAX reference with the same numerics contract (bf16 MXU inputs, f32 accum)."""
    dn = ('NHWC', 'HWIO', 'NHWC')
    y = lax.conv_general_dilated(x.astype(jnp.bfloat16), w1.astype(jnp.bfloat16),
                                 (1, 1), 'SAME', dimension_numbers=dn,
                                 preferred_element_type=jnp.float32)
    y = jnp.maximum(y * s1 + b1, 0.0)
    y = lax.conv_general_dilated(y.astype(jnp.bfloat16), w2.astype(jnp.bfloat16),
                                 (1, 1), 'SAME', dimension_numbers=dn,
                                 preferred_element_type=jnp.float32)
    y = y * s2 + b2 + x
    return jnp.maximum(y, 0.0)


if __name__ == "__main__":
    key = jax.random.PRNGKey(0)
    N, H, W = 2, 16, 16
    planes = 128            # lane-dense channel count (multiple of 128)
    inplanes = planes       # BasicBlock default (downsample=None) needs Cin == planes

    ks = jax.random.split(key, 8)
    x_nchw = jax.random.normal(ks[0], (N, inplanes, H, W), jnp.float32)
    w1 = 0.2 * jax.random.normal(ks[1], (3, 3, inplanes, planes), jnp.float32)  # HWIO
    w2 = 0.2 * jax.random.normal(ks[2], (3, 3, planes, planes), jnp.float32)    # HWIO

    def bn_params(k, c):
        k1, k2, k3, k4 = jax.random.split(k, 4)
        gamma = 1.0 + 0.1 * jax.random.normal(k1, (c,), jnp.float32)
        beta = 0.1 * jax.random.normal(k2, (c,), jnp.float32)
        mean = 0.1 * jax.random.normal(k3, (c,), jnp.float32)
        var = jax.random.uniform(k4, (c,), jnp.float32, minval=0.5, maxval=1.5)
        return gamma, beta, mean, var

    bn1 = bn_params(ks[3], planes)
    bn2 = bn_params(ks[4], planes)

    # pure-JAX reference (same bf16-input / f32-accum contract)
    s1, b1 = _fold_bn(*bn1)
    s2, b2 = _fold_bn(*bn2)
    x_nhwc = jnp.transpose(x_nchw, (0, 2, 3, 1))
    ref = jnp.transpose(_ref_forward_nhwc(x_nhwc, w1, s1, b1, w2, s2, b2), (0, 3, 1, 2))
    scale = float(jnp.max(jnp.abs(ref)))

    # Run with the auto-picked tile (whole image -> no cross-tile halos) and with a
    # deliberately small tile_h=4 so the cross-tile halo DMA path is exercised too.
    for th in (None, 4):
        run = jax.jit(functools.partial(basic_block_pallas, tile_h=th))
        out = jax.block_until_ready(run(x_nchw, w1, bn1, w2, bn2))
        assert out.shape == ref.shape == (N, planes, H, W)
        err = float(jnp.max(jnp.abs(out - ref)))
        # Tolerance covers bf16 double-rounding and the per-dh f32 partial-sum order of the
        # shift-and-add formulation; any tiling/halo/weight-mapping bug is orders larger.
        assert err <= 5e-3 * scale + 1e-2, (th, err, scale)

    print("KERNEL_OK")
</pallas_src>

<mosaic_0001>
module attributes {stable_mosaic.version = 11 : i64} {
  func.func @_basic_block_kernel(%arg0: i32, %arg1: i32, %arg2: memref<1x16x16x128xf32, #tpu.memory_space<vmem>>, %arg3: memref<32x16x128xf32, #tpu.memory_space<any>>, %arg4: memref<384x384xbf16, #tpu.memory_space<vmem>>, %arg5: memref<1x128xf32, #tpu.memory_space<vmem>>, %arg6: memref<1x128xf32, #tpu.memory_space<vmem>>, %arg7: memref<384x384xbf16, #tpu.memory_space<vmem>>, %arg8: memref<1x128xf32, #tpu.memory_space<vmem>>, %arg9: memref<1x128xf32, #tpu.memory_space<vmem>>, %arg10: memref<1x16x16x128xf32, #tpu.memory_space<vmem>>, %arg11: memref<20x16x128xf32, #tpu.memory_space<vmem>>, %arg12: memref<288x128xbf16, #tpu.memory_space<vmem>>, %arg13: memref<3x!tpu.dma_semaphore, #tpu.memory_space<semaphore_mem>>) attributes {dimension_semantics = [#tpu.dimension_semantics<parallel>, #tpu.dimension_semantics<parallel>], iteration_bounds = array<i64: 2, 1>, scalar_prefetch = 0 : i64, scratch_operands = 3 : i64, tpu.core_type = #tpu.core_type<tc>, window_params = [{transform_indices = @transform_0, window_bounds = array<i64: 1, 16, 16, 128>}, {}, {pipeline_mode = #tpu.pipeline_mode<synchronous>, transform_indices = @transform_2, window_bounds = array<i64: 384, 384>}, {pipeline_mode = #tpu.pipeline_mode<synchronous>, transform_indices = @transform_3, window_bounds = array<i64: 1, 128>}, {pipeline_mode = #tpu.pipeline_mode<synchronous>, transform_indices = @transform_4, window_bounds = array<i64: 1, 128>}, {pipeline_mode = #tpu.pipeline_mode<synchronous>, transform_indices = @transform_5, window_bounds = array<i64: 384, 384>}, {pipeline_mode = #tpu.pipeline_mode<synchronous>, transform_indices = @transform_6, window_bounds = array<i64: 1, 128>}, {pipeline_mode = #tpu.pipeline_mode<synchronous>, transform_indices = @transform_7, window_bounds = array<i64: 1, 128>}, {transform_indices = @transform_8, window_bounds = array<i64: 1, 16, 16, 128>}]} {
    %c16_i32 = arith.constant 16 : i32
    %0 = arith.muli %arg0, %c16_i32 : i32
    %c16_i32_0 = arith.constant 16 : i32
    %1 = arith.muli %arg1, %c16_i32_0 : i32
    %2 = arith.addi %0, %1 : i32
    %c0_i32 = arith.constant 0 : i32
    %3 = arith.cmpi sgt, %arg1, %c0_i32 : i32
    %4 = arith.extui %3 : i1 to i32
    %c0_i32_1 = arith.constant 0 : i32
    %5 = arith.cmpi ne, %4, %c0_i32_1 : i32
    scf.if %5 {
      %c2_i32_78 = arith.constant 2 : i32
      %148 = arith.subi %2, %c2_i32_78 : i32
      %c0_i32_79 = arith.constant 0 : i32
      %c0_i32_80 = arith.constant 0 : i32
      %c0_i32_81 = arith.constant 0 : i32
      %149 = tpu.memref_slice %arg3[%148, %c0_i32_80, %c0_i32_81] : memref<32x16x128xf32, #tpu.memory_space<any>> -> memref<2x16x128xf32, #tpu.memory_space<any>>
      %c0_i32_82 = arith.constant 0 : i32
      %c0_i32_83 = arith.constant 0 : i32
      %c0_i32_84 = arith.constant 0 : i32
      %150 = tpu.memref_slice %arg11[%c0_i32_82, %c0_i32_83, %c0_i32_84] : memref<20x16x128xf32, #tpu.memory_space<vmem>> -> memref<2x16x128xf32, #tpu.memory_space<vmem>>
      %151 = tpu.memref_slice %arg13[%c0_i32_79] : memref<3x!tpu.dma_semaphore, #tpu.memory_space<semaphore_mem>> -> memref<1x!tpu.dma_semaphore, #tpu.memory_space<semaphore_mem>>
      %152 = tpu.memref_squeeze %151 : memref<1x!tpu.dma_semaphore, #tpu.memory_space<semaphore_mem>> -> memref<!tpu.dma_semaphore, #tpu.memory_space<semaphore_mem>>
      tpu.enqueue_dma source(%149 : memref<2x16x128xf32, #tpu.memory_space<any>>) target(%150 : memref<2x16x128xf32, #tpu.memory_space<vmem>>) target_semaphore(%152 : memref<!tpu.dma_semaphore, #tpu.memory_space<semaphore_mem>>)
    } else {
    }
    %c0_i32_2 = arith.constant 0 : i32
    %6 = arith.cmpi slt, %arg1, %c0_i32_2 : i32
    %7 = arith.extui %6 : i1 to i32
    %c0_i32_3 = arith.constant 0 : i32
    %8 = arith.cmpi ne, %7, %c0_i32_3 : i32
    scf.if %8 {
      %c16_i32_78 = arith.constant 16 : i32
      %148 = arith.addi %2, %c16_i32_78 : i32
      %c1_i32_79 = arith.constant 1 : i32
      %c0_i32_80 = arith.constant 0 : i32
      %c0_i32_81 = arith.constant 0 : i32
      %149 = tpu.memref_slice %arg3[%148, %c0_i32_80, %c0_i32_81] : memref<32x16x128xf32, #tpu.memory_space<any>> -> memref<2x16x128xf32, #tpu.memory_space<any>>
      %c18_i32 = arith.constant 18 : i32
      %c0_i32_82 = arith.constant 0 : i32
      %c0_i32_83 = arith.constant 0 : i32
      %150 = tpu.memref_slice %arg11[%c18_i32, %c0_i32_82, %c0_i32_83] : memref<20x16x128xf32, #tpu.memory_space<vmem>> -> memref<2x16x128xf32, #tpu.memory_space<vmem>>
      %151 = tpu.memref_slice %arg13[%c1_i32_79] : memref<3x!tpu.dma_semaphore, #tpu.memory_space<semaphore_mem>> -> memref<1x!tpu.dma_semaphore, #tpu.memory_space<semaphore_mem>>
      %152 = tpu.memref_squeeze %151 : memref<1x!tpu.dma_semaphore, #tpu.memory_space<semaphore_mem>> -> memref<!tpu.dma_semaphore, #tpu.memory_space<semaphore_mem>>
      tpu.enqueue_dma source(%149 : memref<2x16x128xf32, #tpu.memory_space<any>>) target(%150 : memref<2x16x128xf32, #tpu.memory_space<vmem>>) target_semaphore(%152 : memref<!tpu.dma_semaphore, #tpu.memory_space<semaphore_mem>>)
    } else {
    }
    %c0_i32_4 = arith.constant 0 : i32
    %c2_i32 = arith.constant 2 : i32
    %c0_i32_5 = arith.constant 0 : i32
    %c0_i32_6 = arith.constant 0 : i32
    %c0_i32_7 = arith.constant 0 : i32
    %9 = tpu.memref_slice %arg2[%c0_i32_4, %c0_i32_5, %c0_i32_6, %c0_i32_7] : memref<1x16x16x128xf32, #tpu.memory_space<vmem>> -> memref<1x16x16x128xf32, #tpu.memory_space<vmem>>
    %10 = tpu.memref_squeeze %9 : memref<1x16x16x128xf32, #tpu.memory_space<vmem>> -> memref<16x16x128xf32, #tpu.memory_space<vmem>>
    %c2_i32_8 = arith.constant 2 : i32
    %c0_i32_9 = arith.constant 0 : i32
    %c0_i32_10 = arith.constant 0 : i32
    %11 = tpu.memref_slice %arg11[%c2_i32_8, %c0_i32_9, %c0_i32_10] : memref<20x16x128xf32, #tpu.memory_space<vmem>> -> memref<16x16x128xf32, #tpu.memory_space<vmem>>
    %12 = tpu.memref_slice %arg13[%c2_i32] : memref<3x!tpu.dma_semaphore, #tpu.memory_space<semaphore_mem>> -> memref<1x!tpu.dma_semaphore, #tpu.memory_space<semaphore_mem>>
    %13 = tpu.memref_squeeze %12 : memref<1x!tpu.dma_semaphore, #tpu.memory_space<semaphore_mem>> -> memref<!tpu.dma_semaphore, #tpu.memory_space<semaphore_mem>>
    tpu.enqueue_dma source(%10 : memref<16x16x128xf32, #tpu.memory_space<vmem>>) target(%11 : memref<16x16x128xf32, #tpu.memory_space<vmem>>) target_semaphore(%13 : memref<!tpu.dma_semaphore, #tpu.memory_space<semaphore_mem>>)
    %c0_i32_11 = arith.constant 0 : i32
    %14 = arith.cmpi eq, %arg1, %c0_i32_11 : i32
    %15 = arith.extui %14 : i1 to i32
    %c0_i32_12 = arith.constant 0 : i32
    %16 = arith.cmpi ne, %15, %c0_i32_12 : i32
    scf.if %16 {
      %cst_78 = arith.constant 0.000000e+00 : f32
      %148 = vector.broadcast %cst_78 : f32 to vector<2x16x128xf32>
      %c0_79 = arith.constant 0 : index
      %c0_80 = arith.constant 0 : index
      %c0_81 = arith.constant 0 : index
      %149 = vector.load %arg11[%c0_79, %c0_80, %c0_81] : memref<20x16x128xf32, #tpu.memory_space<vmem>>, vector<2x16x128xf32>
      tpu.vector_store %arg11[%c0_79, %c0_80, %c0_81], %148 {strides = array<i32>} : memref<20x16x128xf32, #tpu.memory_space<vmem>>, vector<2x16x128xf32>,
    } else {
    }
    %c0_i32_13 = arith.constant 0 : i32
    %17 = arith.cmpi eq, %arg1, %c0_i32_13 : i32
    %18 = arith.extui %17 : i1 to i32
    %c0_i32_14 = arith.constant 0 : i32
    %19 = arith.cmpi ne, %18, %c0_i32_14 : i32
    scf.if %19 {
      %cst_78 = arith.constant 0.000000e+00 : f32
      %148 = vector.broadcast %cst_78 : f32 to vector<2x16x128xf32>
      %c18 = arith.constant 18 : index
      %c0_79 = arith.constant 0 : index
      %c0_80 = arith.constant 0 : index
      %149 = vector.load %arg11[%c18, %c0_79, %c0_80] : memref<20x16x128xf32, #tpu.memory_space<vmem>>, vector<2x16x128xf32>
      tpu.vector_store %arg11[%c18, %c0_79, %c0_80], %148 {strides = array<i32>} : memref<20x16x128xf32, #tpu.memory_space<vmem>>, vector<2x16x128xf32>,
    } else {
    }
    %c0_i32_15 = arith.constant 0 : i32
    %20 = arith.cmpi sgt, %arg1, %c0_i32_15 : i32
    %21 = arith.extui %20 : i1 to i32
    %c0_i32_16 = arith.constant 0 : i32
    %22 = arith.cmpi ne, %21, %c0_i32_16 : i32
    scf.if %22 {
      %c2_i32_78 = arith.constant 2 : i32
      %148 = arith.subi %2, %c2_i32_78 : i32
      %c0_i32_79 = arith.constant 0 : i32
      %c0_i32_80 = arith.constant 0 : i32
      %c0_i32_81 = arith.constant 0 : i32
      %149 = tpu.memref_slice %arg3[%148, %c0_i32_80, %c0_i32_81] : memref<32x16x128xf32, #tpu.memory_space<any>> -> memref<2x16x128xf32, #tpu.memory_space<any>>
      %c0_i32_82 = arith.constant 0 : i32
      %c0_i32_83 = arith.constant 0 : i32
      %c0_i32_84 = arith.constant 0 : i32
      %150 = tpu.memref_slice %arg11[%c0_i32_82, %c0_i32_83, %c0_i32_84] : memref<20x16x128xf32, #tpu.memory_space<vmem>> -> memref<2x16x128xf32, #tpu.memory_space<vmem>>
      %151 = tpu.memref_slice %arg13[%c0_i32_79] : memref<3x!tpu.dma_semaphore, #tpu.memory_space<semaphore_mem>> -> memref<1x!tpu.dma_semaphore, #tpu.memory_space<semaphore_mem>>
      %152 = tpu.memref_squeeze %151 : memref<1x!tpu.dma_semaphore, #tpu.memory_space<semaphore_mem>> -> memref<!tpu.dma_semaphore, #tpu.memory_space<semaphore_mem>>
      tpu.wait_dma2 semaphore(%152 : memref<!tpu.dma_semaphore, #tpu.memory_space<semaphore_mem>>) src(%149 : memref<2x16x128xf32, #tpu.memory_space<any>>) dst(%150 : memref<2x16x128xf32, #tpu.memory_space<vmem>>)
    } else {
    }
    %c0_i32_17 = arith.constant 0 : i32
    %23 = arith.cmpi slt, %arg1, %c0_i32_17 : i32
    %24 = arith.extui %23 : i1 to i32
    %c0_i32_18 = arith.constant 0 : i32
    %25 = arith.cmpi ne, %24, %c0_i32_18 : i32
    scf.if %25 {
      %c16_i32_78 = arith.constant 16 : i32
      %148 = arith.addi %2, %c16_i32_78 : i32
      %c1_i32_79 = arith.constant 1 : i32
      %c0_i32_80 = arith.constant 0 : i32
      %c0_i32_81 = arith.constant 0 : i32
      %149 = tpu.memref_slice %arg3[%148, %c0_i32_80, %c0_i32_81] : memref<32x16x128xf32, #tpu.memory_space<any>> -> memref<2x16x128xf32, #tpu.memory_space<any>>
      %c18_i32 = arith.constant 18 : i32
      %c0_i32_82 = arith.constant 0 : i32
      %c0_i32_83 = arith.constant 0 : i32
      %150 = tpu.memref_slice %arg11[%c18_i32, %c0_i32_82, %c0_i32_83] : memref<20x16x128xf32, #tpu.memory_space<vmem>> -> memref<2x16x128xf32, #tpu.memory_space<vmem>>
      %151 = tpu.memref_slice %arg13[%c1_i32_79] : memref<3x!tpu.dma_semaphore, #tpu.memory_space<semaphore_mem>> -> memref<1x!tpu.dma_semaphore, #tpu.memory_space<semaphore_mem>>
      %152 = tpu.memref_squeeze %151 : memref<1x!tpu.dma_semaphore, #tpu.memory_space<semaphore_mem>> -> memref<!tpu.dma_semaphore, #tpu.memory_space<semaphore_mem>>
      tpu.wait_dma2 semaphore(%152 : memref<!tpu.dma_semaphore, #tpu.memory_space<semaphore_mem>>) src(%149 : memref<2x16x128xf32, #tpu.memory_space<any>>) dst(%150 : memref<2x16x128xf32, #tpu.memory_space<vmem>>)
    } else {
    }
    %c0_i32_19 = arith.constant 0 : i32
    %c2_i32_20 = arith.constant 2 : i32
    %c0_i32_21 = arith.constant 0 : i32
    %c0_i32_22 = arith.constant 0 : i32
    %c0_i32_23 = arith.constant 0 : i32
    %26 = tpu.memref_slice %arg2[%c0_i32_19, %c0_i32_21, %c0_i32_22, %c0_i32_23] : memref<1x16x16x128xf32, #tpu.memory_space<vmem>> -> memref<1x16x16x128xf32, #tpu.memory_space<vmem>>
    %27 = tpu.memref_squeeze %26 : memref<1x16x16x128xf32, #tpu.memory_space<vmem>> -> memref<16x16x128xf32, #tpu.memory_space<vmem>>
    %c2_i32_24 = arith.constant 2 : i32
    %c0_i32_25 = arith.constant 0 : i32
    %c0_i32_26 = arith.constant 0 : i32
    %28 = tpu.memref_slice %arg11[%c2_i32_24, %c0_i32_25, %c0_i32_26] : memref<20x16x128xf32, #tpu.memory_space<vmem>> -> memref<16x16x128xf32, #tpu.memory_space<vmem>>
    %29 = tpu.memref_slice %arg13[%c2_i32_20] : memref<3x!tpu.dma_semaphore, #tpu.memory_space<semaphore_mem>> -> memref<1x!tpu.dma_semaphore, #tpu.memory_space<semaphore_mem>>
    %30 = tpu.memref_squeeze %29 : memref<1x!tpu.dma_semaphore, #tpu.memory_space<semaphore_mem>> -> memref<!tpu.dma_semaphore, #tpu.memory_space<semaphore_mem>>
    tpu.wait_dma2 semaphore(%30 : memref<!tpu.dma_semaphore, #tpu.memory_space<semaphore_mem>>) src(%27 : memref<16x16x128xf32, #tpu.memory_space<vmem>>) dst(%28 : memref<16x16x128xf32, #tpu.memory_space<vmem>>)
    %c0 = arith.constant 0 : index
    %c0_27 = arith.constant 0 : index
    %c0_28 = arith.constant 0 : index
    %31 = vector.load %arg11[%c0, %c0_27, %c0_28] : memref<20x16x128xf32, #tpu.memory_space<vmem>>, vector<20x16x128xf32>
    %32 = vector.shape_cast %31 : vector<20x16x128xf32> to vector<320x128xf32>
    %c0_29 = arith.constant 0 : index
    %c0_30 = arith.constant 0 : index
    %33 = vector.load %arg4[%c0_29, %c0_30] : memref<384x384xbf16, #tpu.memory_space<vmem>>, vector<384x384xbf16>
    %34 = tpu.iota {dimensions = array<i32: 0>} : vector<320x1xi32>
    %c16_i32_31 = arith.constant 16 : i32
    %c0_i32_32 = arith.constant 0 : i32
    %35 = arith.cmpi eq, %c16_i32_31, %c0_i32_32 : i32
    %c1_i32 = arith.constant 1 : i32
    %36 = arith.select %35, %c1_i32, %c16_i32_31 : i32
    %37 = vector.broadcast %36 : i32 to vector<320x1xi32>
    %38 = arith.remsi %34, %37 : vector<320x1xi32>
    %c0_i32_33 = arith.constant 0 : i32
    %39 = vector.broadcast %c0_i32_33 : i32 to vector<320x1xi32>
    %40 = arith.cmpi ne, %38, %39 : vector<320x1xi32>
    %c0_i32_34 = arith.constant 0 : i32
    %41 = vector.broadcast %c0_i32_34 : i32 to vector<320x1xi32>
    %42 = arith.cmpi slt, %38, %41 : vector<320x1xi32>
    %c0_i32_35 = arith.constant 0 : i32
    %43 = arith.cmpi slt, %36, %c0_i32_35 : i32
    %44 = vector.broadcast %43 : i1 to vector<320x1xi1>
    %45 = vector.broadcast %44 : vector<320x1xi1> to vector<320x1xi1>
    %46 = arith.xori %42, %45 : vector<320x1xi1>
    %47 = arith.andi %46, %40 : vector<320x1xi1>
    %48 = vector.broadcast %36 : i32 to vector<320x1xi32>
    %49 = arith.addi %38, %48 : vector<320x1xi32>
    %50 = arith.select %47, %49, %38 : vector<320x1xi1>, vector<320x1xi32>
    %c0_i32_36 = arith.constant 0 : i32
    %51 = vector.broadcast %c0_i32_36 : i32 to vector<320x1xi32>
    %52 = arith.cmpi eq, %50, %51 : vector<320x1xi32>
    %c1_i32_37 = arith.constant 1 : i32
    %53 = tpu.dynamic_rotate %32 by %c1_i32_37 dim 0 : vector<320x128xf32>, i32 -> vector<320x128xf32>
    %cst = arith.constant 0.000000e+00 : f32
    %54 = vector.shape_cast %52 : vector<320x1xi1> to vector<320x1xi1>
    %55 = vector.broadcast %54 : vector<320x1xi1> to vector<320x128xi1>
    %56 = vector.broadcast %cst : f32 to vector<320x128xf32>
    %57 = arith.select %55, %56, %53 : vector<320x128xi1>, vector<320x128xf32>
    %c15_i32 = arith.constant 15 : i32
    %58 = vector.broadcast %c15_i32 : i32 to vector<320x1xi32>
    %59 = arith.cmpi eq, %50, %58 : vector<320x1xi32>
    %c319_i32 = arith.constant 319 : i32
    %60 = tpu.dynamic_rotate %32 by %c319_i32 dim 0 : vector<320x128xf32>, i32 -> vector<320x128xf32>
    %cst_38 = arith.constant 0.000000e+00 : f32
    %61 = vector.shape_cast %59 : vector<320x1xi1> to vector<320x1xi1>
    %62 = vector.broadcast %61 : vector<320x1xi1> to vector<320x128xi1>
    %63 = vector.broadcast %cst_38 : f32 to vector<320x128xf32>
    %64 = arith.select %62, %63, %60 : vector<320x128xi1>, vector<320x128xf32>
    %65 = arith.truncf %57 : vector<320x128xf32> to vector<320x128xbf16>
    %66 = arith.truncf %32 : vector<320x128xf32> to vector<320x128xbf16>
    %67 = arith.truncf %64 : vector<320x128xf32> to vector<320x128xbf16>
    %68 = tpu.concatenate %65, %66, %67 in 1 : vector<320x128xbf16>, vector<320x128xbf16>, vector<320x128xbf16> -> vector<320x384xbf16>
    %cst_39 = arith.constant dense<0.000000e+00> : vector<320x384xf32>
    %69 = tpu.matmul %68, %33, %cst_39 {dimension_numbers = #tpu.dot_dimension_numbers<[1], [0], [0], [1], [0, 0, 1, 1], [], []>} : vector<320x384xbf16>, vector<384x384xbf16>, vector<320x384xf32> -> vector<320x384xf32>
    %70 = vector.extract_strided_slice %69 {offsets = [0, 0], sizes = [288, 128], strides = [1, 1]} : vector<320x384xf32> to vector<288x128xf32>
    %71 = vector.extract_strided_slice %69 {offsets = [16, 128], sizes = [288, 128], strides = [1, 1]} : vector<320x384xf32> to vector<288x128xf32>
    %72 = arith.addf %70, %71 : vector<288x128xf32>
    %73 = vector.extract_strided_slice %69 {offsets = [32, 256], sizes = [288, 128], strides = [1, 1]} : vector<320x384xf32> to vector<288x128xf32>
    %74 = arith.addf %72, %73 : vector<288x128xf32>
    %c0_40 = arith.constant 0 : index
    %c0_41 = arith.constant 0 : index
    %75 = vector.load %arg5[%c0_40, %c0_41] : memref<1x128xf32, #tpu.memory_space<vmem>>, vector<1x128xf32>
    %76 = vector.broadcast %75 : vector<1x128xf32> to vector<288x128xf32>
    %77 = arith.mulf %74, %76 : vector<288x128xf32>
    %c0_42 = arith.constant 0 : index
    %c0_43 = arith.constant 0 : index
    %78 = vector.load %arg6[%c0_42, %c0_43] : memref<1x128xf32, #tpu.memory_space<vmem>>, vector<1x128xf32>
    %79 = vector.broadcast %78 : vector<1x128xf32> to vector<288x128xf32>
    %80 = arith.addf %77, %79 : vector<288x128xf32>
    %cst_44 = arith.constant 0.000000e+00 : f32
    %81 = vector.broadcast %cst_44 : f32 to vector<288x128xf32>
    %82 = arith.maximumf %80, %81 : vector<288x128xf32>
    %83 = arith.truncf %82 : vector<288x128xf32> to vector<288x128xbf16>
    %c0_45 = arith.constant 0 : index
    %c0_46 = arith.constant 0 : index
    %84 = vector.load %arg12[%c0_45, %c0_46] : memref<288x128xbf16, #tpu.memory_space<vmem>>, vector<288x128xbf16>
    tpu.vector_store %arg12[%c0_45, %c0_46], %83 {strides = array<i32>} : memref<288x128xbf16, #tpu.memory_space<vmem>>, vector<288x128xbf16>,
    %c0_i32_47 = arith.constant 0 : i32
    %85 = arith.cmpi eq, %arg1, %c0_i32_47 : i32
    %86 = arith.extui %85 : i1 to i32
    %c0_i32_48 = arith.constant 0 : i32
    %87 = arith.cmpi ne, %86, %c0_i32_48 : i32
    scf.if %87 {
      %cst_78 = arith.constant 0.000000e+00 : bf16
      %148 = vector.broadcast %cst_78 : bf16 to vector<16x128xbf16>
      %c0_79 = arith.constant 0 : index
      %c0_80 = arith.constant 0 : index
      %149 = vector.load %arg12[%c0_79, %c0_80] : memref<288x128xbf16, #tpu.memory_space<vmem>>, vector<16x128xbf16>
      tpu.vector_store %arg12[%c0_79, %c0_80], %148 {strides = array<i32>} : memref<288x128xbf16, #tpu.memory_space<vmem>>, vector<16x128xbf16>,
    } else {
    }
    %c0_i32_49 = arith.constant 0 : i32
    %88 = arith.cmpi eq, %arg1, %c0_i32_49 : i32
    %89 = arith.extui %88 : i1 to i32
    %c0_i32_50 = arith.constant 0 : i32
    %90 = arith.cmpi ne, %89, %c0_i32_50 : i32
    scf.if %90 {
      %cst_78 = arith.constant 0.000000e+00 : bf16
      %148 = vector.broadcast %cst_78 : bf16 to vector<16x128xbf16>
      %c272 = arith.constant 272 : index
      %c0_79 = arith.constant 0 : index
      %149 = vector.load %arg12[%c272, %c0_79] : memref<288x128xbf16, #tpu.memory_space<vmem>>, vector<16x128xbf16>
      tpu.vector_store %arg12[%c272, %c0_79], %148 {strides = array<i32>} : memref<288x128xbf16, #tpu.memory_space<vmem>>, vector<16x128xbf16>,
    } else {
    }
    %c0_51 = arith.constant 0 : index
    %c0_52 = arith.constant 0 : index
    %91 = vector.load %arg12[%c0_51, %c0_52] : memref<288x128xbf16, #tpu.memory_space<vmem>>, vector<288x128xbf16>
    %92 = arith.extf %91 : vector<288x128xbf16> to vector<288x128xf32>
    %c0_53 = arith.constant 0 : index
    %c0_54 = arith.constant 0 : index
    %93 = vector.load %arg7[%c0_53, %c0_54] : memref<384x384xbf16, #tpu.memory_space<vmem>>, vector<384x384xbf16>
    %94 = tpu.iota {dimensions = array<i32: 0>} : vector<288x1xi32>
    %c16_i32_55 = arith.constant 16 : i32
    %c0_i32_56 = arith.constant 0 : i32
    %95 = arith.cmpi eq, %c16_i32_55, %c0_i32_56 : i32
    %c1_i32_57 = arith.constant 1 : i32
    %96 = arith.select %95, %c1_i32_57, %c16_i32_55 : i32
    %97 = vector.broadcast %96 : i32 to vector<288x1xi32>
    %98 = arith.remsi %94, %97 : vector<288x1xi32>
    %c0_i32_58 = arith.constant 0 : i32
    %99 = vector.broadcast %c0_i32_58 : i32 to vector<288x1xi32>
    %100 = arith.cmpi ne, %98, %99 : vector<288x1xi32>
    %c0_i32_59 = arith.constant 0 : i32
    %101 = vector.broadcast %c0_i32_59 : i32 to vector<288x1xi32>
    %102 = arith.cmpi slt, %98, %101 : vector<288x1xi32>
    %c0_i32_60 = arith.constant 0 : i32
    %103 = arith.cmpi slt, %96, %c0_i32_60 : i32
    %104 = vector.broadcast %103 : i1 to vector<288x1xi1>
    %105 = vector.broadcast %104 : vector<288x1xi1> to vector<288x1xi1>
    %106 = arith.xori %102, %105 : vector<288x1xi1>
    %107 = arith.andi %106, %100 : vector<288x1xi1>
    %108 = vector.broadcast %96 : i32 to vector<288x1xi32>
    %109 = arith.addi %98, %108 : vector<288x1xi32>
    %110 = arith.select %107, %109, %98 : vector<288x1xi1>, vector<288x1xi32>
    %c0_i32_61 = arith.constant 0 : i32
    %111 = vector.broadcast %c0_i32_61 : i32 to vector<288x1xi32>
    %112 = arith.cmpi eq, %110, %111 : vector<288x1xi32>
    %c1_i32_62 = arith.constant 1 : i32
    %113 = tpu.dynamic_rotate %92 by %c1_i32_62 dim 0 : vector<288x128xf32>, i32 -> vector<288x128xf32>
    %cst_63 = arith.constant 0.000000e+00 : f32
    %114 = vector.shape_cast %112 : vector<288x1xi1> to vector<288x1xi1>
    %115 = vector.broadcast %114 : vector<288x1xi1> to vector<288x128xi1>
    %116 = vector.broadcast %cst_63 : f32 to vector<288x128xf32>
    %117 = arith.select %115, %116, %113 : vector<288x128xi1>, vector<288x128xf32>
    %c15_i32_64 = arith.constant 15 : i32
    %118 = vector.broadcast %c15_i32_64 : i32 to vector<288x1xi32>
    %119 = arith.cmpi eq, %110, %118 : vector<288x1xi32>
    %c287_i32 = arith.constant 287 : i32
    %120 = tpu.dynamic_rotate %92 by %c287_i32 dim 0 : vector<288x128xf32>, i32 -> vector<288x128xf32>
    %cst_65 = arith.constant 0.000000e+00 : f32
    %121 = vector.shape_cast %119 : vector<288x1xi1> to vector<288x1xi1>
    %122 = vector.broadcast %121 : vector<288x1xi1> to vector<288x128xi1>
    %123 = vector.broadcast %cst_65 : f32 to vector<288x128xf32>
    %124 = arith.select %122, %123, %120 : vector<288x128xi1>, vector<288x128xf32>
    %125 = arith.truncf %117 : vector<288x128xf32> to vector<288x128xbf16>
    %126 = arith.truncf %92 : vector<288x128xf32> to vector<288x128xbf16>
    %127 = arith.truncf %124 : vector<288x128xf32> to vector<288x128xbf16>
    %128 = tpu.concatenate %125, %126, %127 in 1 : vector<288x128xbf16>, vector<288x128xbf16>, vector<288x128xbf16> -> vector<288x384xbf16>
    %cst_66 = arith.constant dense<0.000000e+00> : vector<288x384xf32>
    %129 = tpu.matmul %128, %93, %cst_66 {dimension_numbers = #tpu.dot_dimension_numbers<[1], [0], [0], [1], [0, 0, 1, 1], [], []>} : vector<288x384xbf16>, vector<384x384xbf16>, vector<288x384xf32> -> vector<288x384xf32>
    %130 = vector.extract_strided_slice %129 {offsets = [0, 0], sizes = [256, 128], strides = [1, 1]} : vector<288x384xf32> to vector<256x128xf32>
    %131 = vector.extract_strided_slice %129 {offsets = [16, 128], sizes = [256, 128], strides = [1, 1]} : vector<288x384xf32> to vector<256x128xf32>
    %132 = arith.addf %130, %131 : vector<256x128xf32>
    %133 = vector.extract_strided_slice %129 {offsets = [32, 256], sizes = [256, 128], strides = [1, 1]} : vector<288x384xf32> to vector<256x128xf32>
    %134 = arith.addf %132, %133 : vector<256x128xf32>
    %c0_67 = arith.constant 0 : index
    %c0_68 = arith.constant 0 : index
    %135 = vector.load %arg8[%c0_67, %c0_68] : memref<1x128xf32, #tpu.memory_space<vmem>>, vector<1x128xf32>
    %136 = vector.broadcast %135 : vector<1x128xf32> to vector<256x128xf32>
    %137 = arith.mulf %134, %136 : vector<256x128xf32>
    %c0_69 = arith.constant 0 : index
    %c0_70 = arith.constant 0 : index
    %138 = vector.load %arg9[%c0_69, %c0_70] : memref<1x128xf32, #tpu.memory_space<vmem>>, vector<1x128xf32>
    %139 = vector.broadcast %138 : vector<1x128xf32> to vector<256x128xf32>
    %140 = arith.addf %137, %139 : vector<256x128xf32>
    %c2 = arith.constant 2 : index
    %c0_71 = arith.constant 0 : index
    %c0_72 = arith.constant 0 : index
    %141 = vector.load %arg11[%c2, %c0_71, %c0_72] : memref<20x16x128xf32, #tpu.memory_space<vmem>>, vector<16x16x128xf32>
    %142 = vector.shape_cast %141 : vector<16x16x128xf32> to vector<256x128xf32>
    %143 = arith.addf %140, %142 : vector<256x128xf32>
    %cst_73 = arith.constant 0.000000e+00 : f32
    %144 = vector.broadcast %cst_73 : f32 to vector<256x128xf32>
    %145 = arith.maximumf %143, %144 : vector<256x128xf32>
    %146 = vector.shape_cast %145 : vector<256x128xf32> to vector<1x16x16x128xf32>
    %c0_74 = arith.constant 0 : index
    %c0_75 = arith.constant 0 : index
    %c0_76 = arith.constant 0 : index
    %c0_77 = arith.constant 0 : index
    %147 = vector.load %arg10[%c0_74, %c0_75, %c0_76, %c0_77] : memref<1x16x16x128xf32, #tpu.memory_space<vmem>>, vector<1x16x16x128xf32>
    tpu.vector_store %arg10[%c0_74, %c0_75, %c0_76, %c0_77], %146 {strides = array<i32>} : memref<1x16x16x128xf32, #tpu.memory_space<vmem>>, vector<1x16x16x128xf32>,
    return
  }
  func.func @transform_0(%arg0: i32, %arg1: i32) -> (i32, i32, i32, i32) {
    %c0_i32 = arith.constant 0 : i32
    %c0_i32_0 = arith.constant 0 : i32
    %c0_i32_1 = arith.constant 0 : i32
    return %arg0, %arg1, %c0_i32, %c0_i32_0 : i32, i32, i32, i32
  }
  func.func @transform_2(%arg0: i32, %arg1: i32) -> (i32, i32) {
    %c0_i32 = arith.constant 0 : i32
    %c0_i32_0 = arith.constant 0 : i32
    %c0_i32_1 = arith.constant 0 : i32
    return %c0_i32, %c0_i32_0 : i32, i32
  }
  func.func @transform_3(%arg0: i32, %arg1: i32) -> (i32, i32) {
    %c0_i32 = arith.constant 0 : i32
    %c0_i32_0 = arith.constant 0 : i32
    %c0_i32_1 = arith.constant 0 : i32
    return %c0_i32, %c0_i32_0 : i32, i32
  }
  func.func @transform_4(%arg0: i32, %arg1: i32) -> (i32, i32) {
    %c0_i32 = arith.constant 0 : i32
    %c0_i32_0 = arith.constant 0 : i32
    %c0_i32_1 = arith.constant 0 : i32
    return %c0_i32, %c0_i32_0 : i32, i32
  }
  func.func @transform_5(%arg0: i32, %arg1: i32) -> (i32, i32) {
    %c0_i32 = arith.constant 0 : i32
    %c0_i32_0 = arith.constant 0 : i32
    %c0_i32_1 = arith.constant 0 : i32
    return %c0_i32, %c0_i32_0 : i32, i32
  }
  func.func @transform_6(%arg0: i32, %arg1: i32) -> (i32, i32) {
    %c0_i32 = arith.constant 0 : i32
    %c0_i32_0 = arith.constant 0 : i32
    %c0_i32_1 = arith.constant 0 : i32
    return %c0_i32, %c0_i32_0 : i32, i32
  }
  func.func @transform_7(%arg0: i32, %arg1: i32) -> (i32, i32) {
    %c0_i32 = arith.constant 0 : i32
    %c0_i32_0 = arith.constant 0 : i32
    %c0_i32_1 = arith.constant 0 : i32
    return %c0_i32, %c0_i32_0 : i32, i32
  }
  func.func @transform_8(%arg0: i32, %arg1: i32) -> (i32, i32, i32, i32) {
    %c0_i32 = arith.constant 0 : i32
    %c0_i32_0 = arith.constant 0 : i32
    %c0_i32_1 = arith.constant 0 : i32
    return %arg0, %arg1, %c0_i32, %c0_i32_0 : i32, i32, i32, i32
  }
}

</mosaic_0001>

<bundles_post_ra>
// kernel: basic_block_pallas.1
= control target key start
LH: loop header
LB: loop body
LE: loop exit
PB: predicated region body
PF: predicated region fallthrough
CT: control target
= control target key end

     0   :  { %13 = vsyncpa [#allocation6], 0  ;;  %s9088_s0 = inlined_call_operand.vmem [shape: f32[2,16,16,128], index: 0, kind: input, shape index: {}, may-alias: {0,1}]   ;;  %s9089_s1 = inlined_call_operand.vmem [shape: f32[32,16,128], index: 1, kind: input, shape index: {}, may-alias: {0,1}]   ;;  %s9090_s2 = inlined_call_operand.vmem [shape: bf16[384,384], index: 2, kind: input, shape index: {}]   ;;  %s9091_s3 = inlined_call_operand.vmem [shape: f32[1,128], index: 3, kind: input, shape index: {}]   ;;  %s9092_s4 = inlined_call_operand.vmem [shape: f32[1,128], index: 4, kind: input, shape index: {}]   ;;  %s9093_s5 = inlined_call_operand.vmem [shape: bf16[384,384], index: 5, kind: input, shape index: {}]   ;;  %s9094_s6 = inlined_call_operand.vmem [shape: f32[1,128], index: 6, kind: input, shape index: {}]   ;;  %s9095_s7 = inlined_call_operand.vmem [shape: f32[1,128], index: 7, kind: input, shape index: {}]   ;;  %s9096_s8 = inlined_call_operand.hbm [shape: f32[2,16,16,128], index: 8, kind: output, shape index: {}]  }
   0x1   :  { %15 = vsyncpa [#allocation6 + $0x1], 0  ;;  %s6687_s26 = smov 0   ;;  %s6689_s27 = smov 0  }
   0x2   :  { %s6691_s28 = smov 0   ;;  %s6693_s29 = smov 0  }
   0x3   :  { %s6695_s30 = smov 0   ;;  %s6697_s9 = smov 0  }
   0x4 LB: > { %s5175_s10 = sadd.s32 4294967295, %s6633_s9   ;;  %s5176_s11 = sadd.s32 4294967294, %s6633_s9   ;;  %s6633_s9 = sphi %s6697_s9, %s21_s9   ;;  %s6629_s30 = sphi %s6695_s30, %s9556_s30   ;;  %s6625_s29 = sphi %s6693_s29, %s9555_s29   ;;  %s6621_s28 = sphi %s6691_s28, %s9554_s28   ;;  %s6617_s27 = sphi %s6689_s27, %s9553_s27   ;;  %s6613_s26 = sphi %s6687_s26, %s9552_s26  }
   0x5   : > { %s33_s12 = sadd.s32 1, %s6629_s30  ;;  %s196_s13 = sadd.s32 1, %s6621_s28 }
   0x6   : > { %p35_p0 = scmp.ge.s32.totalorder %s33_s12, 2  ;;  %p206_p1 = scmp.ne.s32.totalorder %s6621_s28, %s6617_s27 }
   0x7   : > { %p207_p2 = scmp.eq.s32.totalorder %s5175_s10, 1  ;;  %p212_p3 = scmp.ne.s32.totalorder %s6617_s27, %s6613_s26 }
   0x8   : > { %s9558_s12 = smov (%p35_p0, %s33_s12), 0  ;;  %p213_p5 = scmp.eq.s32.totalorder %s5176_s11, 1 }
   0x9   : > { %p6727_p4 = por %p207_p2, %p206_p1  ;;  %s191_s15 = ssub.s32 %s6629_s30, %s9558_s12 }
   0xa   : > { %p5179_p6 = scmp.ge.s32.totalorder %s6633_s9, 1  ;;  %p194_p7 = scmp.eq.s32.totalorder %s191_s15, 0 }
   0xb   : > { %p6734_p8 = por %p213_p5, %p212_p3  ;;  %p263_p9 = scmp.lt.s32.totalorder %s6633_s9, 3 }
   0xc   : > { %s6740_s17 = scalar_select %p194_p7, %s6621_s28, %s196_s13  }
   0xd   : > { %p264_p10 = pnand %p5179_p6, %p263_p9 }
   0xf   : > { %267 = sbr.rel (%p264_p10) target bundleno = 1027 (0x403), region = 48 }
  0x16   : > { %s297_s18 = sand.u32 1, %s6617_s27   ;;  %p301_p11 = scmp.lt.s32.totalorder %s6625_s29, 1 }
  0x17   : > { %s6746_s19 = sshll.u32 %s297_s18, 8 }
  0x18   : > { %s302_s20 = scalar_select %p301_p11, %s6625_s29, 1 }
  0x19   : > { %s6851_s25 = scalar_lea.vmem [#allocation5], %s6746_s19 }
  0x1a   : > { %s5957_s21 = sshll.u32 %s302_s20, 8 }
  0x1b   : > { %s6752_s24 = scalar_lea.vmem %s9088_s0, %s5957_s21 }
  0x1c   : > { %v6755_v0 = vld [vmem:[%s6752_s24] sm:$0xff]  ;;  %v6758_v1 = vld [vmem:[%s6752_s24 + $0x8] sm:$0xff]  ;;  %v6761_v2 = vld [vmem:[%s6752_s24 + $0x10] sm:$0xff] }
  0x1d   : > { %9249 = vst [vmem:[#allocation12_spill] sm:$0xff] %v6755_v0  ;;  %9250 = vst [vmem:[#allocation13_spill] sm:$0xff] %v6758_v1  ;;  %v6764_v3 = vld [vmem:[%s6752_s24 + $0x18] sm:$0xff]  ;;  %v6767_v4 = vld [vmem:[%s6752_s24 + $0x20] sm:$0xff] }
  0x1e   : > { %9251 = vst [vmem:[#allocation14_spill] sm:$0xff] %v6761_v2  ;;  %9252 = vst [vmem:[#allocation15_spill] sm:$0xff] %v6764_v3  ;;  %v6770_v5 = vld [vmem:[%s6752_s24 + $0x28] sm:$0xff]  ;;  %v6773_v6 = vld [vmem:[%s6752_s24 + $0x30] sm:$0xff] }
  0x1f   : > { %9253 = vst [vmem:[#allocation16_spill] sm:$0xff] %v6767_v4  ;;  %9254 = vst [vmem:[#allocation17_spill] sm:$0xff] %v6770_v5  ;;  %v6776_v7 = vld [vmem:[%s6752_s24 + $0x38] sm:$0xff]  ;;  %v6779_v8 = vld [vmem:[%s6752_s24 + $0x40] sm:$0xff] }
  0x20   : > { %9255 = vst [vmem:[#allocation18_spill] sm:$0xff] %v6773_v6  ;;  %9256 = vst [vmem:[#allocation19_spill] sm:$0xff] %v6776_v7  ;;  %v6782_v9 = vld [vmem:[%s6752_s24 + $0x48] sm:$0xff]  ;;  %v6785_v10 = vld [vmem:[%s6752_s24 + $0x50] sm:$0xff] }
  0x21   : > { %9257 = vst [vmem:[#allocation20_spill] sm:$0xff] %v6779_v8  ;;  %9258 = vst [vmem:[#allocation21_spill] sm:$0xff] %v6782_v9  ;;  %v6788_v11 = vld [vmem:[%s6752_s24 + $0x58] sm:$0xff]  ;;  %v6791_v12 = vld [vmem:[%s6752_s24 + $0x60] sm:$0xff] }
  0x22   : > { %9259 = vst [vmem:[#allocation22_spill] sm:$0xff] %v6785_v10  ;;  %9260 = vst [vmem:[#allocation23_spill] sm:$0xff] %v6788_v11  ;;  %v6794_v13 = vld [vmem:[%s6752_s24 + $0x68] sm:$0xff]  ;;  %v6797_v14 = vld [vmem:[%s6752_s24 + $0x70] sm:$0xff] }
  0x23   : > { %9261 = vst [vmem:[#allocation24_spill] sm:$0xff] %v6791_v12  ;;  %9262 = vst [vmem:[#allocation25_spill] sm:$0xff] %v6794_v13  ;;  %v6800_v15 = vld [vmem:[%s6752_s24 + $0x78] sm:$0xff]  ;;  %v6803_v16 = vld [vmem:[%s6752_s24 + $0x80] sm:$0xff] }
  0x24   : > { %9263 = vst [vmem:[#allocation26_spill] sm:$0xff] %v6797_v14  ;;  %9264 = vst [vmem:[#allocation27_spill] sm:$0xff] %v6800_v15  ;;  %v6806_v17 = vld [vmem:[%s6752_s24 + $0x88] sm:$0xff]  ;;  %v6809_v18 = vld [vmem:[%s6752_s24 + $0x90] sm:$0xff] }
  0x25   : > { %9265 = vst [vmem:[#allocation28_spill] sm:$0xff] %v6803_v16  ;;  %9266 = vst [vmem:[#allocation29_spill] sm:$0xff] %v6806_v17  ;;  %v6812_v19 = vld [vmem:[%s6752_s24 + $0x98] sm:$0xff]  ;;  %v6815_v20 = vld [vmem:[%s6752_s24 + $0xa0] sm:$0xff] }
  0x26   : > { %9267 = vst [vmem:[#allocation30_spill] sm:$0xff] %v6809_v18  ;;  %9268 = vst [vmem:[#allocation31_spill] sm:$0xff] %v6812_v19  ;;  %v6818_v21 = vld [vmem:[%s6752_s24 + $0xa8] sm:$0xff]  ;;  %v6821_v22 = vld [vmem:[%s6752_s24 + $0xb0] sm:$0xff] }
  0x27   : > { %9269 = vst [vmem:[#allocation32_spill] sm:$0xff] %v6815_v20  ;;  %9270 = vst [vmem:[#allocation33_spill] sm:$0xff] %v6818_v21  ;;  %v6824_v23 = vld [vmem:[%s6752_s24 + $0xb8] sm:$0xff]  ;;  %v6827_v24 = vld [vmem:[%s6752_s24 + $0xc0] sm:$0xff] }
  0x28   : > { %9271 = vst [vmem:[#allocation34_spill] sm:$0xff] %v6821_v22  ;;  %9272 = vst [vmem:[#allocation35_spill] sm:$0xff] %v6824_v23  ;;  %v6830_v25 = vld [vmem:[%s6752_s24 + $0xc8] sm:$0xff]  ;;  %v6833_v26 = vld [vmem:[%s6752_s24 + $0xd0] sm:$0xff] }
  0x29   : > { %9273 = vst [vmem:[#allocation36_spill] sm:$0xff] %v6827_v24  ;;  %9274 = vst [vmem:[#allocation37_spill] sm:$0xff] %v6830_v25  ;;  %v6836_v27 = vld [vmem:[%s6752_s24 + $0xd8] sm:$0xff]  ;;  %v6839_v28 = vld [vmem:[%s6752_s24 + $0xe0] sm:$0xff] }
  0x2a   : > { %9275 = vst [vmem:[#allocation38_spill] sm:$0xff] %v6833_v26  ;;  %9276 = vst [vmem:[#allocation39_spill] sm:$0xff] %v6836_v27  ;;  %v6842_v29 = vld [vmem:[%s6752_s24 + $0xe8] sm:$0xff]  ;;  %v6845_v30 = vld [vmem:[%s6752_s24 + $0xf0] sm:$0xff] }
  0x2b   : > { %9277 = vst [vmem:[#allocation40_spill] sm:$0xff] %v6839_v28  ;;  %9278 = vst [vmem:[#allocation41_spill] sm:$0xff] %v6842_v29  ;;  %v6848_v31 = vld [vmem:[%s6752_s24 + $0xf8] sm:$0xff] }
  0x2c   : > { %9279 = vst [vmem:[#allocation42_spill] sm:$0xff] %v6845_v30  ;;  %9280 = vst [vmem:[#allocation43_spill] sm:$0xff] %v6848_v31 }
  0x2d   : > { %533 = vsyncadd [#allocation4 + $0x2], 4096 }
  0x2e   : > { %6605 = dma.done.wait [#allocation4 + $0x2], 4096 }
  0x2f   : > { %6606 = vsyncadd [#allocation4 + $0x2], 4294963200  ;;  %v9099_v32 = vmov 0   ;;  %v9106_v33 = vmov 0.0|0.0   ;;  %v6359_v34 = vld [vmem:[%s9090_s2 + $0x4] ss:$12 sps:$4 sm:$0xff]  }
  0x30   : > { %2599 = vmatprep.subr.bf16.mxu1 %v9099_v32  ;;  %2631 = vmatprep.mubr.bf16.mxu1 %v9106_v33  ;;  %v6361_v35 = vld [vmem:[%s9090_s2 + $0x8] ss:$12 sps:$4 sm:$0xff]   ;;  %v6362_v36 = vld [vmem:[%s9090_s2] ss:$12 sps:$4 sm:$0xff]   ;;  %v6366_v39 = vld [vmem:[%s9090_s2 + $0x18] ss:$12 sps:$4 sm:$0xff]  }
  0x31   : > { %2181 = vmatprep.mubr.bf16.mxu0 %v9106_v33  ;;  %2149 = vmatprep.subr.bf16.mxu0 %v6359_v34  ;;  %v6363_v37 = vld [vmem:[%s9090_s2 + $0x1c] ss:$12 sps:$4 sm:$0xff]   ;;  %v6365_v38 = vld [vmem:[%s9090_s2 + $0x20] ss:$12 sps:$4 sm:$0xff]   ;;  %v6369_v41 = vld [vmem:[%s9090_s2 + $0x38] ss:$12 sps:$4 sm:$0xff]  }
  0x32   : > { %2600 = vmatpush1.bf16.msra.mxu1 %v6361_v35  ;;  %2150 = vmatpush1.bf16.msra.mxu0 %v6362_v36  ;;  %v6367_v40 = vld [vmem:[%s9090_s2 + $0x34] ss:$12 sps:$4 sm:$0xff]   ;;  %v6370_v42 = vld [vmem:[%s9090_s2 + $0x30] ss:$12 sps:$4 sm:$0xff]   ;;  %v6371_v43 = vld [vmem:[%s9090_s2 + $0x4c] ss:$12 sps:$4 sm:$0xff]  }
  0x33   : > { %2601 = vmatprep.subr.bf16.mxu1 %v9099_v32  ;;  %2151 = vmatprep.subr.bf16.mxu0 %v6363_v37  ;;  %v6373_v44 = vld [vmem:[%s9090_s2 + $0x50] ss:$12 sps:$4 sm:$0xff]   ;;  %v6374_v45 = vld [vmem:[%s9090_s2 + $0x48] ss:$12 sps:$4 sm:$0xff]   ;;  %v6378_v48 = vld [vmem:[%s9090_s2 + $0x60] ss:$12 sps:$4 sm:$0xff]  }
  0x34   : > { %v6375_v46 = vld [vmem:[%s9090_s2 + $0x64] ss:$12 sps:$4 sm:$0xff]   ;;  %v6377_v47 = vld [vmem:[%s9090_s2 + $0x68] ss:$12 sps:$4 sm:$0xff]   ;;  %v6381_v50 = vld [vmem:[%s9090_s2 + $0x80] ss:$12 sps:$4 sm:$0xff]  }
  0x35   : > { %v6379_v49 = vld [vmem:[%s9090_s2 + $0x7c] ss:$12 sps:$4 sm:$0xff]   ;;  %v6382_v51 = vld [vmem:[%s9090_s2 + $0x78] ss:$12 sps:$4 sm:$0xff]   ;;  %v6383_v52 = vld [vmem:[%s9090_s2 + $0x94] ss:$12 sps:$4 sm:$0xff]  }
  0x36   : > { %2602 = vmatpush1.bf16.msra.mxu1 %v6365_v38  ;;  %2152 = vmatpush1.bf16.msra.mxu0 %v6366_v39  ;;  %v6385_v53 = vld [vmem:[%s9090_s2 + $0x98] ss:$12 sps:$4 sm:$0xff]   ;;  %v6386_v54 = vld [vmem:[%s9090_s2 + $0x90] ss:$12 sps:$4 sm:$0xff]   ;;  %v6390_v57 = vld [vmem:[%s9090_s2 + $0xa8] ss:$12 sps:$4 sm:$0xff]   ;;  %v702_v39 = vlaneseq }
  0x37   : > { %2603 = vmatprep.subr.bf16.mxu1 %v9099_v32  ;;  %2153 = vmatprep.subr.bf16.mxu0 %v6367_v40  ;;  %v6387_v55 = vld [vmem:[%s9090_s2 + $0xac] ss:$12 sps:$4 sm:$0xff]   ;;  %v6389_v56 = vld [vmem:[%s9090_s2 + $0xb0] ss:$12 sps:$4 sm:$0xff]   ;;  %v6393_v59 = vld [vmem:[%s9090_s2 + $0xc8] ss:$12 sps:$4 sm:$0xff]  }
  0x38   : > { %v6391_v58 = vld [vmem:[%s9090_s2 + $0xc4] ss:$12 sps:$4 sm:$0xff]   ;;  %v6394_v60 = vld [vmem:[%s9090_s2 + $0xc0] ss:$12 sps:$4 sm:$0xff]   ;;  %v6395_v61 = vld [vmem:[%s9090_s2 + $0xdc] ss:$12 sps:$4 sm:$0xff]  }
  0x39   : > { %v6397_v62 = vld [vmem:[%s9090_s2 + $0xe0] ss:$12 sps:$4 sm:$0xff]   ;;  %v6398_v63 = vld [vmem:[%s9090_s2 + $0xd8] ss:$12 sps:$4 sm:$0xff]   ;;  %v6402_v36 = vld [vmem:[%s9090_s2 + $0xf0] ss:$12 sps:$4 sm:$0xff]  }
  0x3a   : > { %2604 = vmatpush1.bf16.msra.mxu1 %v6369_v41  ;;  %2154 = vmatpush1.bf16.msra.mxu0 %v6370_v42  ;;  %v6399_v34 = vld [vmem:[%s9090_s2 + $0xf4] ss:$12 sps:$4 sm:$0xff]   ;;  %v6401_v35 = vld [vmem:[%s9090_s2 + $0xf8] ss:$12 sps:$4 sm:$0xff]   ;;  %v6405_v38 = vld [vmem:[%s9090_s2 + $0x110] ss:$12 sps:$4 sm:$0xff]  }
  0x3b   : > { %2605 = vmatprep.subr.bf16.mxu1 %v9099_v32  ;;  %2155 = vmatprep.subr.bf16.mxu0 %v6371_v43  ;;  %v6403_v37 = vld [vmem:[%s9090_s2 + $0x10c] ss:$12 sps:$4 sm:$0xff]   ;;  %v6406_v40 = vld [vmem:[%s9090_s2 + $0x108] ss:$12 sps:$4 sm:$0xff]   ;;  %v6407_v41 = vld [vmem:[%s9090_s2 + $0x124] ss:$12 sps:$4 sm:$0xff]  }
  0x3c   : > { %v6409_v42 = vld [vmem:[%s9090_s2 + $0x128] ss:$12 sps:$4 sm:$0xff]   ;;  %v6981_v43 = vshrl.u32 %v702_v39, 7  ;;  %vm9137_vm1 = vmmov 1   ;;  %v6427_v39 = vld [vmem:[%s9090_s2 + $0x198] ss:$12 sps:$4 sm:$0xff]  }
  0x3d   : > { %s5959_s13 = sshll.u32 %s6625_s29, 12  ;;  %s5041_s15 = sshll.u32 %s6851_s25, 4  ;;  %s9036_s15 = int_to_ptr.vmem [resolvable:$true] %s5041_s15 }
  0x3e   : > { %2606 = vmatpush1.bf16.msra.mxu1 %v6373_v44  ;;  %2156 = vmatpush1.bf16.msra.mxu0 %v6374_v45  ;;  %v6410_v44 = vld [vmem:[%s9090_s2 + $0x120] ss:$12 sps:$4 sm:$0xff]   ;;  %v6411_v45 = vld [vmem:[%s9090_s2 + $0x13c] ss:$12 sps:$4 sm:$0xff]   ;;  %vm9116_vm7 = vcmp.lt.s32.totalorder %v6981_v43, 1  ;;  %s9034_s21 = scalar_lea.hbm %s9096_s8, %s5959_s13  ;;  %s9042_s29 = scalar_lea.sflag [#allocation6], %s297_s18 }
  0x3f   : > { %2607 = vmatprep.subr.bf16.mxu1 %v9099_v32  ;;  %2157 = vmatprep.subr.bf16.mxu0 %v6375_v46  ;;  %v6413_v46 = vld [vmem:[%s9090_s2 + $0x140] ss:$12 sps:$4 sm:$0xff]   ;;  %s6553_s22 = scalar_lea.vmem %s9036_s15, 4096  ;;  %s6639_s23 = smov [#allocation5]  }
  0x40   : > { %p6554_p12 = scmp.ne.s32.totalorder %s9036_s15, %s6553_s22  ;;  %s6557_s24 = sshll.u32 %s6639_s23, 4  ;;  %s6558_s24 = int_to_ptr.vmem [resolvable:$false] %s6557_s24 }
  0x41   : > { %s6559_s1 = scalar_lea.vmem %s6558_s24, 8192  ;;  %p6560_p1 = scmp.lt.s32.totalorder %s9036_s15, %s6558_s24 }
  0x42   : > { %2608 = vmatpush1.bf16.msra.mxu1 %v6377_v47  ;;  %2158 = vmatpush1.bf16.msra.mxu0 %v6378_v48  ;;  %v747_v47 = vand.u32 15, %v6981_v43  ;;  %v705_v48 = vadd.s32 16, %v6981_v43  ;;  %p6555_p13 = pnand %p6554_p12, %p6727_p4  ;;  %p6561_p2 = scmp.lt.s32.totalorder %s6559_s1, %s6553_s22 }
  0x43   : > { %2609 = vmatprep.subr.bf16.mxu1 %v9099_v32  ;;  %2159 = vmatprep.subr.bf16.mxu0 %v6379_v49  ;;  %v6414_v49 = vld [vmem:[%s9090_s2 + $0x138] ss:$12 sps:$4 sm:$0xff]  }
  0x44   : > { %vm5960_vm0 = vcmp.ne.s32.totalorder %v747_v47, 0  ;;  %v1268_v47 = vrot.slane %v6758_v1, 7  ;;  %p6556_p0 = pneg %p6555_p13  ;;  %p6562_p3 = por %p6561_p2, %p6560_p1 }
  0x45   : > { %vm7022_vm2 = vmpackc.low %vm9137_vm1, %vm5960_vm0 }
  0x46   : > { %2610 = vmatpush1.bf16.msra.mxu1 %v6381_v50  ;;  %2160 = vmatpush1.bf16.msra.mxu0 %v6382_v51  ;;  %v6415_v50 = vld [vmem:[%s9090_s2 + $0x154] ss:$12 sps:$4 sm:$0xff]   ;;  %v6417_v51 = vld [vmem:[%s9090_s2 + $0x158] ss:$12 sps:$4 sm:$0xff]   ;;  %p6563_p5 = pnand %p6562_p3, %p6556_p0 }
  0x47   : > { %2611 = vmatprep.subr.bf16.mxu1 %v9099_v32  ;;  %2161 = vmatprep.subr.bf16.mxu0 %v6383_v52  ;;  %v6418_v52 = vld [vmem:[%s9090_s2 + $0x150] ss:$12 sps:$4 sm:$0xff]  }
  0x4a   : > { %2612 = vmatpush1.bf16.msra.mxu1 %v6385_v53  ;;  %2162 = vmatpush1.bf16.msra.mxu0 %v6386_v54  ;;  %v6419_v53 = vld [vmem:[%s9090_s2 + $0x16c] ss:$12 sps:$4 sm:$0xff]   ;;  %v761_v54 = vand.u32 15, %v705_v48  ;;  %v9285_v48 = vmov 0 }
  0x4b   : > { %2613 = vmatprep.subr.bf16.mxu1 %v9099_v32  ;;  %2163 = vmatprep.subr.bf16.mxu0 %v6387_v55  ;;  %v6421_v55 = vld [vmem:[%s9090_s2 + $0x170] ss:$12 sps:$4 sm:$0xff]  }
  0x4c   : > { %vm5961_vm3 = vcmp.ne.s32.totalorder %v761_v54, 0  ;;  %v6435_v54 = vld [vmem:[%s9090_s2 + $0x1c8] ss:$12 sps:$4 sm:$0xff]  }
  0x4d   : > { %vm7042_vm4 = vmpackc.low %vm9137_vm1, %vm5961_vm3 }
  0x4e   : > { %2614 = vmatpush1.bf16.msra.mxu1 %v6389_v56  ;;  %2164 = vmatpush1.bf16.msra.mxu0 %v6390_v57  ;;  %v9103_v56 = vmov 0.0  }
  0x4f   : > { %2615 = vmatprep.subr.bf16.mxu1 %v9099_v32  ;;  %2165 = vmatprep.subr.bf16.mxu0 %v6391_v58  ;;  %v7016_v57 = vrot.slane %v9103_v56, 7  ;;  %v6422_v58 = vld [vmem:[%s9090_s2 + $0x168] ss:$12 sps:$4 sm:$0xff]  }
  0x52   : > { %2616 = vmatpush1.bf16.msra.mxu1 %v6393_v59  ;;  %2166 = vmatpush1.bf16.msra.mxu0 %v6394_v60  ;;  %v6425_v60 = vld [vmem:[%s9090_s2 + $0x184] ss:$12 sps:$4 sm:$0xff]  }
  0x53   : > { %2617 = vmatprep.subr.bf16.mxu1 %v9099_v32  ;;  %2167 = vmatprep.subr.bf16.mxu0 %v6395_v61  ;;  %v707_v61 = vadd.s32 32, %v6981_v43 }
  0x56   : > { %2618 = vmatpush1.bf16.msra.mxu1 %v6397_v62  ;;  %2168 = vmatpush1.bf16.msra.mxu0 %v6398_v63  ;;  %v6426_v62 = vld [vmem:[%s9090_s2 + $0x188] ss:$12 sps:$4 sm:$0xff]   ;;  %v7036_v63 = vpack.c.bf16 %v7016_v57, %v7016_v57 }
  0x57   : > { %2619 = vmatprep.subr.bf16.mxu1 %v9099_v32  ;;  %2169 = vmatprep.subr.bf16.mxu0 %v6399_v34  ;;  %v6423_v34 = vld [vmem:[%s9090_s2 + $0x180] ss:$12 sps:$4 sm:$0xff]  }
  0x5a   : > { %2620 = vmatpush1.bf16.msra.mxu1 %v6401_v35  ;;  %2170 = vmatpush1.bf16.msra.mxu0 %v6402_v36  ;;  %v9283_v35 = vmov 0  ;;  %v6429_v36 = vld [vmem:[%s9090_s2 + $0x19c] ss:$12 sps:$4 sm:$0xff]  }
  0x5b   : > { %2621 = vmatprep.subr.bf16.mxu1 %v9099_v32  ;;  %2171 = vmatprep.subr.bf16.mxu0 %v6403_v37  ;;  %v9284_v35 = vsel %vm7042_vm4, 4294967295, %v9283_v35  ;;  %v775_v37 = vand.u32 15, %v707_v61  ;;  %v6439_v61 = vld [vmem:[%s9090_s2 + $0x1e0] ss:$12 sps:$4 sm:$0xff]  }
  0x5d   : > { %vm5962_vm5 = vcmp.ne.s32.totalorder %v775_v37, 0  ;;  %v9287_v37 = vmov 0 }
  0x5e   : > { %2622 = vmatpush1.bf16.msra.mxu1 %v6405_v38  ;;  %2172 = vmatpush1.bf16.msra.mxu0 %v6406_v40  ;;  %v6430_v38 = vld [vmem:[%s9090_s2 + $0x1a0] ss:$12 sps:$4 sm:$0xff]   ;;  %v709_v40 = vadd.s32 48, %v6981_v43  ;;  %vm7078_vm6 = vmpackc.low %vm9137_vm1, %vm5962_vm5 }
  0x5f   : > { %2623 = vmatprep.subr.bf16.mxu1 %v9099_v32  ;;  %2173 = vmatprep.subr.bf16.mxu0 %v6407_v41  ;;  %v6433_v41 = vld [vmem:[%s9090_s2 + $0x1b4] ss:$12 sps:$4 sm:$0xff]   ;;  %v9286_v48 = vsel %vm7078_vm6, 4294967295, %v9285_v48 }
  0x62   : > { %2624 = vmatpush1.bf16.msra.mxu1 %v6409_v42  ;;  %2174 = vmatpush1.bf16.msra.mxu0 %v6410_v44  ;;  %v6434_v42 = vld [vmem:[%s9090_s2 + $0x1b8] ss:$12 sps:$4 sm:$0xff]   ;;  %v1267_v44 = vrot.slane %v6755_v0, 7 }
  0x63   : > { %2625 = vmatprep.subr.bf16.mxu1 %v9099_v32  ;;  %2175 = vmatprep.subr.bf16.mxu0 %v6411_v45  ;;  %v6431_v45 = vld [vmem:[%s9090_s2 + $0x1b0] ss:$12 sps:$4 sm:$0xff]  }
  0x66   : > { %2626 = vmatpush1.bf16.msra.mxu1 %v6413_v46  ;;  %2176 = vmatpush1.bf16.msra.mxu0 %v6414_v49  ;;  %v1727_v46 = vpack.c.bf16 %v6758_v1, %v6755_v0  ;;  %v6437_v49 = vld [vmem:[%s9090_s2 + $0x1cc] ss:$12 sps:$4 sm:$0xff]  }
  0x67   : > { %2627 = vmatprep.subr.bf16.mxu1 %v9099_v32  ;;  %2177 = vmatprep.subr.bf16.mxu0 %v6415_v50  ;;  %v789_v50 = vand.u32 15, %v709_v40  ;;  %v711_v40 = vadd.s32 64, %v6981_v43 }
  0x69   : > { %vm5963_vm8 = vcmp.ne.s32.totalorder %v789_v50, 0  ;;  %v803_v50 = vand.u32 15, %v711_v40  ;;  %v1274_v40 = vrot.slane %v6776_v7, 7 }
  0x6a   : > { %2628 = vmatpush1.bf16.msra.mxu1 %v6417_v51  ;;  %2178 = vmatpush1.bf16.msra.mxu0 %v6418_v52  ;;  %v6438_v51 = vld [vmem:[%s9090_s2 + $0x1d0] ss:$12 sps:$4 sm:$0xff]   ;;  %v1338_v52 = vsel %vm9116_vm7, %v1267_v44, %v1268_v47  ;;  %vm7117_vm9 = vmpackc.low %vm9137_vm1, %vm5963_vm8 }
  0x6b   : > { %2629 = vmatprep.subr.bf16.mxu1 %v9099_v32  ;;  %2179 = vmatprep.subr.bf16.mxu0 %v6419_v53  ;;  %v1339_v53 = vsel %vm9116_vm7, %v7016_v57, %v1267_v44  ;;  %v9288_v37 = vsel %vm7117_vm9, 4294967295, %v9287_v37  ;;  %vm5964_vm10 = vcmp.ne.s32.totalorder %v803_v50, 0  ;;  %v1731_v50 = vpack.c.bf16 %v6782_v9, %v6779_v8 }
  0x6c   : > { %vm7171_vm11 = vmpackc.low %vm9137_vm1, %vm5964_vm10 }
  0x6e   : > { %2630 = vmatpush1.bf16.msra.mxu1 %v6421_v55  ;;  %2180 = vmatpush1.bf16.msra.mxu0 %v6422_v58  ;;  %v6441_v55 = vld [vmem:[%s9090_s2 + $0x1e4] ss:$12 sps:$4 sm:$0xff]   ;;  %v6442_v58 = vld [vmem:[%s9090_s2 + $0x1e8] ss:$12 sps:$4 sm:$0xff]  }
  0x6f   : > { %6054 = vmatprep.subr.bf16.mxu1 %v6426_v62  ;;  %2374 = vmatprep.subr.bf16.mxu0 %v6425_v60  ;;  %v5275_v60 = vpack.c.bf16 %v1338_v52, %v1339_v53  ;;  %v1729_v52 = vpack.c.bf16 %v6770_v5, %v6767_v4  ;;  %v1272_v53 = vrot.slane %v6770_v5, 7 }
  0x71   : > { %5428 = vmatmul.mubr.msk.bf16.vlgmr.msra.gmra.mrb[0].mxu1 %vm7022_vm2, %v7036_v63  ;;  %5268 = vmatmul.mubr.msk.bf16.vlgmr.msra.gmra.mrb[0].mxu0 %vm7022_vm2, %v7036_v63 }
  0x72   : > { %2637 = vmatprep.mubr.bf16.mxu1 %v9106_v33  ;;  %2375 = vmatpush1.bf16.msra.mxu0 %v6423_v34  ;;  %v1269_v34 = vrot.slane %v6761_v2, 7 }
  0x73   : > { %2189 = vmatprep.mubr.bf16.mxu0 %v9106_v33  ;;  %6055 = vmatpush3.bf16.msra.mxu1 %v6426_v62  ;;  %v1728_v62 = vpack.c.bf16 %v6764_v3, %v6761_v2 }
  0x74   : > { %2376 = vmatprep.subr.bf16.mxu0 %v6429_v36  ;;  %6056 = vmatprep.subr.bf16.mxu1 %v6430_v38  ;;  %v1270_v36 = vrot.slane %v6764_v3, 7  ;;  %v1337_v44 = vsel %vm9116_vm7, %v1268_v47, %v1269_v34  ;;  %v6447_v47 = vld [vmem:[%s9090_s2 + $0x210] ss:$12 sps:$4 sm:$0xff]  }
  0x76   : > { %2377 = vmatpush1.bf16.msra.mxu0 %v6427_v39  ;;  %v6446_v39 = vld [vmem:[%s9090_s2 + $0x200] ss:$12 sps:$4 sm:$0xff]  }
  0x77   : > { %6057 = vmatpush3.bf16.msra.mxu1 %v6430_v38  ;;  %2378 = vmatprep.subr.bf16.mxu0 %v6433_v41  ;;  %v6445_v38 = vld [vmem:[%s9090_s2 + $0x1fc] ss:$12 sps:$4 sm:$0xff]   ;;  %v6443_v41 = vld [vmem:[%s9090_s2 + $0x1f8] ss:$12 sps:$4 sm:$0xff]  }
  0x78   : > { %6058 = vmatprep.subr.bf16.mxu1 %v6434_v42 }
  0x79   : > { %5432 = vmatmul.mubr.msk.bf16.gmra.mrb[4].mxu1 %vm7042_vm4, %v7036_v63  ;;  %5272 = vmatmul.mubr.msk.bf16.gmra.mrb[4].mxu0 %vm7042_vm4, %v7036_v63 }
  0x7a   : > { %2643 = vmatprep.mubr.bf16.mxu1 %v1727_v46  ;;  %2199 = vmatprep.mubr.bf16.mxu0 %v1727_v46  ;;  %v6450_v46 = vld [vmem:[%s9090_s2 + $0x218] ss:$12 sps:$4 sm:$0xff]  }
  0x7b   : > { %2379 = vmatpush1.bf16.msra.mxu0 %v6431_v45  ;;  %6059 = vmatpush3.bf16.msra.mxu1 %v6434_v42  ;;  %v1336_v42 = vsel %vm9116_vm7, %v1269_v34, %v1270_v36  ;;  %v6449_v45 = vld [vmem:[%s9090_s2 + $0x214] ss:$12 sps:$4 sm:$0xff]  }
  0x7c   : > { %2380 = vmatprep.subr.bf16.mxu0 %v6437_v49  ;;  %6060 = vmatprep.subr.bf16.mxu1 %v6438_v51  ;;  %v5279_v49 = vpack.c.bf16 %v1336_v42, %v1337_v44 }
  0x7f   : > { %2381 = vmatpush1.bf16.msra.mxu0 %v6435_v54  ;;  %6061 = vmatpush3.bf16.msra.mxu1 %v6438_v51  ;;  %v1271_v51 = vrot.slane %v6767_v4, 7  ;;  %v6453_v54 = vld [vmem:[%s9090_s2 + $0x22c] ss:$12 sps:$4 sm:$0xff]  }
  0x80   : > { %2382 = vmatprep.subr.bf16.mxu0 %v6441_v55  ;;  %6062 = vmatprep.subr.bf16.mxu1 %v6442_v58  ;;  %v6454_v55 = vld [vmem:[%s9090_s2 + $0x230] ss:$12 sps:$4 sm:$0xff]  }
  0x81   : > { %5436 = vmatmul.mubr.msk.bf16.gmra.mrb[8].mxu1 %vm7078_vm6, %v5275_v60  ;;  %5276 = vmatmul.mubr.msk.bf16.gmra.mrb[8].mxu0 %vm7078_vm6, %v5275_v60  ;;  %v1335_v60 = vsel %vm9116_vm7, %v1270_v36, %v1271_v51  ;;  %v1730_v36 = vpack.c.bf16 %v6776_v7, %v6773_v6 }
  0x82   : > { %2651 = vmatprep.mubr.bf16.mxu1 %v1728_v62  ;;  %2209 = vmatprep.mubr.bf16.mxu0 %v1728_v62  ;;  %v6451_v62 = vld [vmem:[%s9090_s2 + $0x228] ss:$12 sps:$4 sm:$0xff]  }
  0x83   : > { %2383 = vmatpush1.bf16.msra.mxu0 %v6439_v61  ;;  %6063 = vmatpush3.bf16.msra.mxu1 %v6442_v58  ;;  %v1334_v58 = vsel %vm9116_vm7, %v1271_v51, %v1272_v53  ;;  %v713_v61 = vadd.s32 80, %v6981_v43  ;;  %v1275_v51 = vrot.slane %v6779_v8, 7 }
  0x84   : > { %2384 = vmatprep.subr.bf16.mxu0 %v6445_v38  ;;  %6064 = vmatprep.subr.bf16.mxu1 %v6446_v39  ;;  %v5283_v34 = vpack.c.bf16 %v1334_v58, %v1335_v60  ;;  %v9289_v38 = vmov 0  ;;  %v9293_v60 = vmov 0 }
  0x85   : > { %v9290_v38 = vsel %vm7171_vm11, 4294967295, %v9289_v38 }
  0x87   : > { %2385 = vmatpush1.bf16.msra.mxu0 %v6443_v41  ;;  %6065 = vmatpush3.bf16.msra.mxu1 %v6446_v39  ;;  %v1273_v39 = vrot.slane %v6773_v6, 7  ;;  %v817_v41 = vand.u32 15, %v713_v61  ;;  %v1732_v61 = vpack.c.bf16 %v6788_v11, %v6785_v10 }
  0x88   : > { %2386 = vmatprep.subr.bf16.mxu0 %v6449_v45  ;;  %6066 = vmatprep.subr.bf16.mxu1 %v6450_v46  ;;  %v715_v45 = vadd.s32 96, %v6981_v43 }
  0x89   : > { %5440 = vmatmul.mubr.msk.bf16.gmra.mrb[12].mxu1 %vm7117_vm9, %v5279_v49  ;;  %5280 = vmatmul.mubr.msk.bf16.gmra.mrb[12].mxu0 %vm7117_vm9, %v5279_v49  ;;  %v1332_v42 = vsel %vm9116_vm7, %v1273_v39, %v1274_v40  ;;  %v1333_v44 = vsel %vm9116_vm7, %v1272_v53, %v1273_v39  ;;  %vm5965_vm12 = vcmp.ne.s32.totalorder %v817_v41, 0  ;;  %v9291_v49 = vmov 0 }
  0x8a   : > { %2659 = vmatprep.mubr.bf16.mxu1 %v1729_v52  ;;  %2219 = vmatprep.mubr.bf16.mxu0 %v1729_v52  ;;  %vm7190_vm13 = vmpackc.low %vm9137_vm1, %vm5965_vm12  ;;  %v831_v52 = vand.u32 15, %v715_v45  ;;  %v719_v41 = vadd.s32 128, %v6981_v43  ;;  %v1733_v45 = vpack.c.bf16 %v6794_v13, %v6791_v12 }
  0x8b   : > { %2387 = vmatpush1.bf16.msra.mxu0 %v6447_v47  ;;  %6067 = vmatpush3.bf16.msra.mxu1 %v6450_v46  ;;  %v5287_v46 = vpack.c.bf16 %v1332_v42, %v1333_v44  ;;  %v9292_v49 = vsel %vm7190_vm13, 4294967295, %v9291_v49  ;;  %v1276_v47 = vrot.slane %v6782_v9, 7  ;;  %v9295_v44 = vmov 0 }
  0x8c   : > { %2388 = vmatprep.subr.bf16.mxu0 %v6453_v54  ;;  %6068 = vmatprep.subr.bf16.mxu1 %v6454_v55  ;;  %v1331_v54 = vsel %vm9116_vm7, %v1274_v40, %v1275_v51  ;;  %vm5966_vm14 = vcmp.ne.s32.totalorder %v831_v52, 0 }
  0x8d   : > { %v1330_v53 = vsel %vm9116_vm7, %v1275_v51, %v1276_v47  ;;  %vm7208_vm15 = vmpackc.low %vm9137_vm1, %vm5966_vm14  ;;  %v859_v51 = vand.u32 15, %v719_v41 }
  0x8e   : > { %v5291_v58 = vpack.c.bf16 %v1330_v53, %v1331_v54  ;;  %v9294_v60 = vsel %vm7208_vm15, 4294967295, %v9293_v60  ;;  %v721_v53 = vadd.s32 144, %v6981_v43 }
  0x8f   : > { %2389 = vmatpush1.bf16.msra.mxu0 %v6451_v62  ;;  %6069 = vmatpush3.bf16.msra.mxu1 %v6454_v55  ;;  %v717_v55 = vadd.s32 112, %v6981_v43  ;;  %v1277_v62 = vrot.slane %v6785_v10, 7  ;;  %vm5968_vm5 = vcmp.ne.s32.totalorder %v859_v51, 0  ;;  %v1284_v51 = vrot.slane %v6806_v17, 7 }
  0x90   : > { %4408 = vmatprep.subr.bf16.mxu0 %v9099_v32  ;;  %vm7244_vm8 = vmpackc.low %vm9137_vm1, %vm5968_vm5 }
  0x91   : > { %5444 = vmatmul.mubr.msk.bf16.gmra.mrb[16].mxu1 %vm7171_vm11, %v5283_v34  ;;  %5284 = vmatmul.mubr.msk.bf16.gmra.mrb[16].mxu0 %vm7171_vm11, %v5283_v34  ;;  %v1278_v34 = vrot.slane %v6788_v11, 7  ;;  %v1329_v40 = vsel %vm9116_vm7, %v1276_v47, %v1277_v62 }
  0x92   : > { %2667 = vmatprep.mubr.bf16.mxu1 %v1730_v36  ;;  %2229 = vmatprep.mubr.bf16.mxu0 %v1730_v36  ;;  %v845_v36 = vand.u32 15, %v717_v55  ;;  %v9297_v55 = vmov 0 }
  0x93   : > { %v1328_v39 = vsel %vm9116_vm7, %v1277_v62, %v1278_v34  ;;  %v9298_v55 = vsel %vm7244_vm8, 4294967295, %v9297_v55  ;;  %v1282_v62 = vrot.slane %v6800_v15, 7 }
  0x94   : > { %vm5967_vm0 = vcmp.ne.s32.totalorder %v845_v36, 0  ;;  %v5295_v42 = vpack.c.bf16 %v1328_v39, %v1329_v40  ;;  %v873_v36 = vand.u32 15, %v721_v53  ;;  %v723_v40 = vadd.s32 160, %v6981_v43 }
  0x95   : > { %vm7226_vm3 = vmpackc.low %vm9137_vm1, %vm5967_vm0  ;;  %v725_v53 = vadd.s32 176, %v6981_v43 }
  0x96   : > { %v9296_v44 = vsel %vm7226_vm3, 4294967295, %v9295_v44  ;;  %vm5969_vm10 = vcmp.ne.s32.totalorder %v873_v36, 0  ;;  %v1285_v36 = vrot.slane %v6809_v18, 7 }
  0x97   : > { %vm7262_vm12 = vmpackc.low %vm9137_vm1, %vm5969_vm10 }
  0x99   : > { %5448 = vmatmul.mubr.msk.bf16.gmra.mrb[20].mxu1 %vm7190_vm13, %v5287_v46  ;;  %5288 = vmatmul.mubr.msk.bf16.gmra.mrb[20].mxu0 %vm7190_vm13, %v5287_v46  ;;  %v1279_v46 = vrot.slane %v6791_v12, 7 }
  0x9a   : > { %2675 = vmatprep.mubr.bf16.mxu1 %v1731_v50  ;;  %2239 = vmatprep.mubr.bf16.mxu0 %v1731_v50  ;;  %v1280_v50 = vrot.slane %v6794_v13, 7 }
  0x9b   : > { %v1327_v52 = vsel %vm9116_vm7, %v1278_v34, %v1279_v46 }
  0x9c   : > { %v1326_v47 = vsel %vm9116_vm7, %v1279_v46, %v1280_v50  ;;  %v1283_v46 = vrot.slane %v6803_v16, 7 }
  0x9d   : > { %v5299_v54 = vpack.c.bf16 %v1326_v47, %v1327_v52  ;;  %v887_v47 = vand.u32 15, %v723_v40  ;;  %v1321_v40 = vsel %vm9116_vm7, %v1284_v51, %v1285_v36 }
  0x9e   : > { %v1323_v52 = vsel %vm9116_vm7, %v1282_v62, %v1283_v46 }
  0x9f   : > { %vm5970_vm14 = vcmp.ne.s32.totalorder %v887_v47, 0  ;;  %v1737_v47 = vpack.c.bf16 %v6818_v21, %v6815_v20 }
  0xa0   : > { %vm7280_vm0 = vmpackc.low %vm9137_vm1, %vm5970_vm14 }
  0xa1   : > { %5452 = vmatmul.mubr.msk.bf16.gmra.mrb[24].mxu1 %vm7208_vm15, %v5291_v58  ;;  %5292 = vmatmul.mubr.msk.bf16.gmra.mrb[24].mxu0 %vm7208_vm15, %v5291_v58  ;;  %v1734_v58 = vpack.c.bf16 %v6800_v15, %v6797_v14 }
  0xa2   : > { %2683 = vmatprep.mubr.bf16.mxu1 %v1732_v61  ;;  %2249 = vmatprep.mubr.bf16.mxu0 %v1732_v61  ;;  %v1281_v61 = vrot.slane %v6797_v14, 7 }
  0xa4   : > { %v1324_v34 = vsel %vm9116_vm7, %v1281_v61, %v1282_v62  ;;  %v1325_v39 = vsel %vm9116_vm7, %v1280_v50, %v1281_v61  ;;  %v1322_v50 = vsel %vm9116_vm7, %v1283_v46, %v1284_v51  ;;  %v1736_v61 = vpack.c.bf16 %v6812_v19, %v6809_v18 }
  0xa5   : > { %v5303_v41 = vpack.c.bf16 %v1324_v34, %v1325_v39  ;;  %v1286_v34 = vrot.slane %v6812_v19, 7  ;;  %v901_v39 = vand.u32 15, %v725_v53  ;;  %v9305_v46 = vmov 0 }
  0xa7   : > { %v1320_v62 = vsel %vm9116_vm7, %v1285_v36, %v1286_v34  ;;  %vm5971_vm5 = vcmp.ne.s32.totalorder %v901_v39, 0  ;;  %v9308_v39 = vmov 0 }
  0xa8   : > { %vm7298_vm10 = vmpackc.low %vm9137_vm1, %vm5971_vm5 }
  0xa9   : > { %5456 = vmatmul.mubr.msk.bf16.gmra.mrb[28].mxu1 %vm7226_vm3, %v5295_v42  ;;  %5296 = vmatmul.mubr.msk.bf16.gmra.mrb[28].mxu0 %vm7226_vm3, %v5295_v42  ;;  %v9299_v42 = vmov 0  ;;  %v9306_v46 = vsel %vm7298_vm10, 4294967295, %v9305_v46 }
  0xaa   : > { %2691 = vmatprep.mubr.bf16.mxu1 %v1733_v45  ;;  %2259 = vmatprep.mubr.bf16.mxu0 %v1733_v45  ;;  %v9300_v42 = vsel %vm7262_vm12, 4294967295, %v9299_v42  ;;  %v1735_v45 = vpack.c.bf16 %v6806_v17, %v6803_v16  ;;  %9307 = vst [vmem:[#allocation46_spill] sm:$0xff] %v9306_v46 }
  0xab   : > { %9301 = vst [vmem:[#allocation44_spill] sm:$0xff] %v9300_v42  ;;  %v6549_v42 = vld [vmem:[%s9093_s5 + $0x218] ss:$12 sps:$4 sm:$0xff]  }
  0xb1   : > { %5460 = vmatmul.mubr.msk.bf16.gmra.mrb[32].mxu1 %vm7244_vm8, %v5299_v54  ;;  %5300 = vmatmul.mubr.msk.bf16.gmra.mrb[32].mxu0 %vm7244_vm8, %v5299_v54  ;;  %v5307_v54 = vpack.c.bf16 %v1322_v50, %v1323_v52  ;;  %v1287_v50 = vrot.slane %v6815_v20, 7  ;;  %v1288_v52 = vrot.slane %v6818_v21, 7 }
  0xb2   : > { %2699 = vmatprep.mubr.bf16.mxu1 %v1734_v58  ;;  %2269 = vmatprep.mubr.bf16.mxu0 %v1734_v58  ;;  %v9302_v58 = vmov 0 }
  0xb3   : > { %v9303_v58 = vsel %vm7280_vm0, 4294967295, %v9302_v58  ;;  %v1318_v51 = vsel %vm9116_vm7, %v1287_v50, %v1288_v52 }
  0xb4   : > { %9304 = vst [vmem:[#allocation45_spill] sm:$0xff] %v9303_v58 }
  0xb9   : > { %5464 = vmatmul.mubr.msk.bf16.gmra.mrb[36].mxu1 %vm7262_vm12, %v5303_v41  ;;  %5304 = vmatmul.mubr.msk.bf16.gmra.mrb[36].mxu0 %vm7262_vm12, %v5303_v41  ;;  %v727_v41 = vadd.s32 192, %v6981_v43 }
  0xba   : > { %2707 = vmatprep.mubr.bf16.mxu1 %v1735_v45  ;;  %2279 = vmatprep.mubr.bf16.mxu0 %v1735_v45  ;;  %v5311_v45 = vpack.c.bf16 %v1320_v62, %v1321_v40  ;;  %v1738_v62 = vpack.c.bf16 %v6824_v23, %v6821_v22  ;;  %v1289_v40 = vrot.slane %v6821_v22, 7 }
  0xbb   : > { %v915_v53 = vand.u32 15, %v727_v41  ;;  %v1290_v41 = vrot.slane %v6824_v23, 7 }
  0xbd   : > { %vm5972_vm14 = vcmp.ne.s32.totalorder %v915_v53, 0 }
  0xbe   : > { %vm7316_vm5 = vmpackc.low %vm9137_vm1, %vm5972_vm14 }
  0xbf   : > { %v9309_v39 = vsel %vm7316_vm5, 4294967295, %v9308_v39 }
  0xc0   : > { %9310 = vst [vmem:[#allocation47_spill] sm:$0xff] %v9309_v39  ;;  %v6547_v39 = vld [vmem:[%s9093_s5 + $0x1e8] ss:$12 sps:$4 sm:$0xff]  }
  0xc1   : > { %5468 = vmatmul.mubr.msk.bf16.gmra.mrb[40].mxu1 %vm7280_vm0, %v5307_v54  ;;  %5308 = vmatmul.mubr.msk.bf16.gmra.mrb[40].mxu0 %vm7280_vm0, %v5307_v54  ;;  %v1319_v54 = vsel %vm9116_vm7, %v1286_v34, %v1287_v50  ;;  %v1316_v34 = vsel %vm9116_vm7, %v1289_v40, %v1290_v41  ;;  %v731_v50 = vadd.s32 224, %v6981_v43 }
  0xc2   : > { %2715 = vmatprep.mubr.bf16.mxu1 %v1736_v61  ;;  %2289 = vmatprep.mubr.bf16.mxu0 %v1736_v61  ;;  %v729_v61 = vadd.s32 208, %v6981_v43  ;;  %v5315_v36 = vpack.c.bf16 %v1318_v51, %v1319_v54  ;;  %v9311_v51 = vmov 0  ;;  %v1739_v54 = vpack.c.bf16 %v6830_v25, %v6827_v24 }
  0xc3   : > { %v943_v32 = vand.u32 15, %v731_v50  ;;  %v1293_v50 = vrot.slane %v6833_v26, 7 }
  0xc9   : > { %5472 = vmatmul.mubr.msk.bf16.gmra.mrb[44].mxu1 %vm7298_vm10, %v5311_v45  ;;  %5312 = vmatmul.mubr.msk.bf16.gmra.mrb[44].mxu0 %vm7298_vm10, %v5311_v45  ;;  %v929_v45 = vand.u32 15, %v729_v61  ;;  %v1291_v61 = vrot.slane %v6827_v24, 7 }
  0xca   : > { %2723 = vmatprep.mubr.bf16.mxu1 %v1737_v47  ;;  %2299 = vmatprep.mubr.bf16.mxu0 %v1737_v47  ;;  %v1317_v47 = vsel %vm9116_vm7, %v1288_v52, %v1289_v40  ;;  %v733_v40 = vadd.s32 240, %v6981_v43 }
  0xcb   : > { %vm5973_vm14 = vcmp.ne.s32.totalorder %v929_v45, 0  ;;  %v5319_v53 = vpack.c.bf16 %v1316_v34, %v1317_v47  ;;  %v9314_v34 = vmov 0  ;;  %v1740_v47 = vpack.c.bf16 %v6836_v27, %v6833_v26 }
  0xcc   : > { %vm7334_vm10 = vmpackc.low %vm9137_vm1, %vm5973_vm14  ;;  %vm5974_vm14 = vcmp.ne.s32.totalorder %v943_v32, 0  ;;  %v957_v56 = vand.u32 15, %v733_v40  ;;  %v1295_v40 = vrot.slane %v6839_v28, 7 }
  0xcd   : > { %v9312_v51 = vsel %vm7334_vm10, 4294967295, %v9311_v51 }
  0xce   : > { %9313 = vst [vmem:[#allocation48_spill] sm:$0xff] %v9312_v51 }
  0xd1   : > { %5476 = vmatmul.mubr.msk.bf16.gmra.mrb[48].mxu1 %vm7316_vm5, %v5315_v36  ;;  %5316 = vmatmul.mubr.msk.bf16.gmra.mrb[48].mxu0 %vm7316_vm5, %v5315_v36  ;;  %v1292_v36 = vrot.slane %v6830_v25, 7  ;;  %vm7352_vm5 = vmpackc.low %vm9137_vm1, %vm5974_vm14  ;;  %vm5975_vm14 = vcmp.ne.s32.totalorder %v957_v56, 0 }
  0xd2   : > { %2731 = vmatprep.mubr.bf16.mxu1 %v1738_v62  ;;  %2309 = vmatprep.mubr.bf16.mxu0 %v1738_v62  ;;  %v1315_v62 = vsel %vm9116_vm7, %v1290_v41, %v1291_v61  ;;  %v9315_v34 = vsel %vm7352_vm5, 4294967295, %v9314_v34 }
  0xd3   : > { %v1314_v52 = vsel %vm9116_vm7, %v1291_v61, %v1292_v36  ;;  %9316 = vst [vmem:[#allocation49_spill] sm:$0xff] %v9315_v34  ;;  %v1313_v41 = vsel %vm9116_vm7, %v1292_v36, %v1293_v50 }
  0xd4   : > { %v5323_v45 = vpack.c.bf16 %v1314_v52, %v1315_v62  ;;  %v9317_v52 = vmov 0  ;;  %v1741_v62 = vpack.c.bf16 %v6842_v29, %v6839_v28 }
  0xd9   : > { %5480 = vmatmul.mubr.msk.bf16.gmra.mrb[52].mxu1 %vm7334_vm10, %v5319_v53  ;;  %5320 = vmatmul.mubr.msk.bf16.gmra.mrb[52].mxu0 %vm7334_vm10, %v5319_v53  ;;  %v1294_v53 = vrot.slane %v6836_v27, 7  ;;  %vm7370_vm10 = vmpackc.low %vm9137_vm1, %vm5975_vm14 }
  0xda   : > { %2739 = vmatprep.mubr.bf16.mxu1 %v1739_v54  ;;  %2319 = vmatprep.mubr.bf16.mxu0 %v1739_v54  ;;  %v735_v54 = vadd.s32 256, %v6981_v43  ;;  %v9318_v52 = vsel %vm7370_vm10, 4294967295, %v9317_v52 }
  0xdb   : > { %v1312_v32 = vsel %vm9116_vm7, %v1293_v50, %v1294_v53  ;;  %9319 = vst [vmem:[#allocation50_spill] sm:$0xff] %v9318_v52  ;;  %v1311_v36 = vsel %vm9116_vm7, %v1294_v53, %v1295_v40 }
  0xdc   : > { %v5327_v61 = vpack.c.bf16 %v1312_v32, %v1313_v41  ;;  %v971_v33 = vand.u32 15, %v735_v54  ;;  %v9320_v32 = vmov 0  ;;  %v1742_v41 = vpack.c.bf16 %v6848_v31, %v6845_v30 }
  0xdd   : > { %v1297_v54 = vrot.slane %v6845_v30, 7 }
  0xde   : > { %vm5976_vm14 = vcmp.ne.s32.totalorder %v971_v33, 0 }
  0xe1   : > { %5484 = vmatmul.mubr.msk.bf16.gmra.mrb[56].mxu1 %vm7352_vm5, %v5323_v45  ;;  %5324 = vmatmul.mubr.msk.bf16.gmra.mrb[56].mxu0 %vm7352_vm5, %v5323_v45  ;;  %v1296_v45 = vrot.slane %v6842_v29, 7  ;;  %vm7388_vm5 = vmpackc.low %vm9137_vm1, %vm5976_vm14 }
  0xe2   : > { %2747 = vmatprep.mubr.bf16.mxu1 %v1740_v47  ;;  %2329 = vmatprep.mubr.bf16.mxu0 %v1740_v47  ;;  %v737_v47 = vadd.s32 272, %v6981_v43  ;;  %v9321_v32 = vsel %vm7388_vm5, 4294967295, %v9320_v32 }
  0xe3   : > { %v1310_v56 = vsel %vm9116_vm7, %v1295_v40, %v1296_v45  ;;  %9322 = vst [vmem:[#allocation51_spill] sm:$0xff] %v9321_v32  ;;  %v1309_v53 = vsel %vm9116_vm7, %v1296_v45, %v1297_v54  ;;  %v741_v45 = vadd.s32 304, %v6981_v43 }
  0xe4   : > { %v5331_v50 = vpack.c.bf16 %v1310_v56, %v1311_v36  ;;  %v985_v52 = vand.u32 15, %v737_v47  ;;  %v9323_v56 = vmov 0  ;;  %v9326_v47 = vmov 0.0|0.0  }
  0xe6   : > { %vm5977_vm14 = vcmp.ne.s32.totalorder %v985_v52, 0 }
  0xe9   : > { %5488 = vmatmul.mubr.msk.bf16.gmra.mrb[60].mxu1 %vm7370_vm10, %v5327_v61  ;;  %5328 = vmatmul.mubr.msk.bf16.gmra.mrb[60].mxu0 %vm7370_vm10, %v5327_v61  ;;  %v1298_v61 = vrot.slane %v6848_v31, 7  ;;  %vm7406_vm10 = vmpackc.low %vm9137_vm1, %vm5977_vm14 }
  0xea   : > { %2755 = vmatprep.mubr.bf16.mxu1 %v1741_v62  ;;  %2339 = vmatprep.mubr.bf16.mxu0 %v1741_v62  ;;  %v739_v62 = vadd.s32 288, %v6981_v43  ;;  %v9324_v56 = vsel %vm7406_vm10, 4294967295, %v9323_v56 }
  0xeb   : > { %v1308_v33 = vsel %vm9116_vm7, %v1297_v54, %v1298_v61  ;;  %9325 = vst [vmem:[#allocation52_spill] sm:$0xff] %v9324_v56  ;;  %v1307_v52 = vsel %vm9116_vm7, %v1298_v61, %v7016_v57  ;;  %v1013_v54 = vand.u32 15, %v741_v45  ;;  %v706_v61 = vadd.s32 24, %v6981_v43 }
  0xec   : > { %v5335_v40 = vpack.c.bf16 %v1308_v33, %v1309_v53  ;;  %v999_v36 = vand.u32 15, %v739_v62  ;;  %v9327_v53 = vmov 0.0   ;;  %v1509_v45 = vrot.slane %v6758_v1, 1 }
  0xed   : > { %v7425_v62 = vrot.slane %v9327_v53, 1  ;;  %vm5979_vm7 = vcmp.ne.s32.totalorder %v1013_v54, 0  ;;  %v9332_v1 = vmov 0  ;;  %v1512_v56 = vrot.slane %v6767_v4, 1 }
  0xee   : > { %vm5342_vm0 = vmpackc.low %vm9137_vm1, %vm5979_vm7 }
  0xf1   : > { %5492 = vmatmul.mubr.msk.bf16.gmra.mrb[64].mxu1 %vm7388_vm5, %v5331_v50  ;;  %5332 = vmatmul.mubr.msk.bf16.gmra.mrb[64].mxu0 %vm7388_vm5, %v5331_v50  ;;  %vm5978_vm5 = vcmp.ne.s32.totalorder %v999_v36, 0  ;;  %v704_v50 = vadd.s32 8, %v6981_v43  ;;  %v1508_v36 = vrot.slane %v6755_v0, 1 }
  0xf2   : > { %2763 = vmatprep.mubr.bf16.mxu1 %v1742_v41  ;;  %2349 = vmatprep.mubr.bf16.mxu0 %v1742_v41  ;;  %v5339_v41 = vpack.c.bf16 %v7016_v57, %v1307_v52  ;;  %vm5338_vm14 = vmpackc.low %vm9137_vm1, %vm5978_vm5  ;;  %v7433_v57 = vpack.c.bf16 %v7425_v62, %v7425_v62  ;;  %v9328_v52 = vmov 0 }
  0xf3   : > { %v754_v33 = vand.u32 15, %v704_v50  ;;  %v1510_v50 = vrot.slane %v6761_v2, 1 }
  0xf9   : > { %5496 = vmatmul.mubr.msk.bf16.gmra.mrb[68].mxu1 %vm7406_vm10, %v5335_v40  ;;  %5336 = vmatmul.mubr.msk.bf16.gmra.mrb[68].mxu0 %vm7406_vm10, %v5335_v40  ;;  %vm5980_vm10 = vcmp.ne.s32.totalorder %v754_v33, 15  ;;  %v708_v40 = vadd.s32 40, %v6981_v43  ;;  %v9331_v33 = vmov 0  }
  0xfa   : > { %2771 = vmatprep.mubr.bf16.mxu1 %v9326_v47  ;;  %2359 = vmatprep.mubr.bf16.mxu0 %v9326_v47  ;;  %vm7437_vm5 = vmpackc.low %vm5980_vm10, %vm9137_vm1 }
  0xfb   : > { %v9329_v52 = vsel %vm7437_vm5, 4294967295, %v9328_v52 }
  0xfc   : > { %9330 = vst [vmem:[#allocation53_spill] sm:$0xff] %v9329_v52 }
 0x101   : > { %5500 = vmatmul.mubr.msk.bf16.gmra.mrb[72].mxu1 %vm5338_vm14, %v5339_v41  ;;  %5340 = vmatmul.mubr.msk.bf16.gmra.mrb[72].mxu0 %vm5338_vm14, %v5339_v41  ;;  %vm9136_vm14 = vcmp.lt.s32.totalorder %v6981_v43, 7  ;;  %v782_v41 = vand.u32 15, %v708_v40  ;;  %v710_v40 = vadd.s32 56, %v6981_v43 }
 0x102   : > { %2779 = vmatprep.mubr.bf16.mxu1 %v9326_v47  ;;  %2367 = vmatprep.mubr.bf16.mxu0 %v9326_v47  ;;  %v768_v47 = vand.u32 15, %v706_v61  ;;  %v1580_v54 = vsel %vm9136_vm14, %v7425_v62, %v1508_v36  ;;  %v1578_v53 = vsel %vm9136_vm14, %v1509_v45, %v1510_v50  ;;  %v1579_v61 = vsel %vm9136_vm14, %v1508_v36, %v1509_v45 }
 0x103   : > { %v5351_v2 = vpack.c.bf16 %v1580_v54, %v7425_v62  ;;  %v5355_v0 = vpack.c.bf16 %v1578_v53, %v1579_v61  ;;  %v9335_v36 = vmov 0  ;;  %v796_v45 = vand.u32 15, %v710_v40 }
 0x104   : > { %vm5981_vm7 = vcmp.ne.s32.totalorder %v768_v47, 15  ;;  %v1511_v47 = vrot.slane %v6764_v3, 1  ;;  %v1514_v54 = vrot.slane %v6773_v6, 1  ;;  %v714_v6 = vadd.s32 88, %v6981_v43 }
 0x105   : > { %vm7461_vm10 = vmpackc.low %vm5981_vm7, %vm9137_vm1  ;;  %vm5983_vm7 = vcmp.ne.s32.totalorder %v796_v45, 15  ;;  %v9338_v3 = vmov 0  ;;  %v1516_v45 = vrot.slane %v6779_v8, 1  ;;  %v1519_v8 = vrot.slane %v6788_v11, 1 }
 0x106   : > { %v9333_v1 = vsel %vm7461_vm10, 4294967295, %v9332_v1  ;;  %v1576_v53 = vsel %vm9136_vm14, %v1511_v47, %v1512_v56  ;;  %v1577_v61 = vsel %vm9136_vm14, %v1510_v50, %v1511_v47  ;;  %v1515_v47 = vrot.slane %v6776_v7, 1 }
 0x107   : > { %9334 = vst [vmem:[#allocation54_spill] sm:$0xff] %v9333_v1  ;;  %v7492_v4 = vpack.c.bf16 %v1576_v53, %v1577_v61  ;;  %v1518_v53 = vrot.slane %v6785_v10, 1  ;;  %v718_v10 = vadd.s32 120, %v6981_v43  ;;  %v1523_v11 = vrot.slane %v6800_v15, 1  ;;  %v6535_v1 = vld [vmem:[%s9093_s5 + $0x1a0] ss:$12 sps:$4 sm:$0xff]  }
 0x109   : > { %5504 = vmatmul.mubr.msk.bf16.gmra.mrb[76].mxu1 %vm5342_vm0, %v7036_v63  ;;  %5344 = vmatmul.mubr.msk.bf16.gmra.mrb[76].mxu0 %vm5342_vm0, %v7036_v63  ;;  %vm5982_vm0 = vcmp.ne.s32.totalorder %v782_v41, 15  ;;  %v712_v63 = vadd.s32 72, %v6981_v43  ;;  %v1513_v41 = vrot.slane %v6770_v5, 1  ;;  %v716_v5 = vadd.s32 104, %v6981_v43 }
 0x10a   : > { %6070 = vmatprep.mubr.msk.bf16.mxu1 %vm7437_vm5, %v7433_v57  ;;  %2406 = vmatprep.mubr.bf16.mxu0 %v9331_v33  ;;  %vm7468_vm12 = vmpackc.low %vm5982_vm0, %vm9137_vm1 }
 0x10b   : > { %v9336_v36 = vsel %vm7468_vm12, 4294967295, %v9335_v36  ;;  %v810_v32 = vand.u32 15, %v712_v63  ;;  %v1574_v40 = vsel %vm9136_vm14, %v1513_v41, %v1514_v54  ;;  %v1575_v63 = vsel %vm9136_vm14, %v1512_v56, %v1513_v41 }
 0x10c   : > { %9337 = vst [vmem:[#allocation55_spill] sm:$0xff] %v9336_v36  ;;  %v7499_v50 = vpack.c.bf16 %v1574_v40, %v1575_v63  ;;  %v9341_v56 = vmov 0  ;;  %v1517_v41 = vrot.slane %v6782_v9, 1  ;;  %v838_v61 = vand.u32 15, %v716_v5  ;;  %v6455_v5 = vld [vmem:[%s9093_s5 + $0x8] ss:$12 sps:$4 sm:$0xff]  }
 0x10d   : > { %vm5984_vm0 = vcmp.ne.s32.totalorder %v810_v32, 15  ;;  %v824_v32 = vand.u32 15, %v714_v6  ;;  %v720_v9 = vadd.s32 136, %v6981_v43 }
 0x10e   : > { %vm7504_vm14 = vmpackc.low %vm5984_vm0, %vm9137_vm1  ;;  %vm5986_vm3 = vcmp.ne.s32.totalorder %v838_v61, 15  ;;  %v852_v61 = vand.u32 15, %v718_v10 }
 0x10f   : > { %v9342_v56 = vsel %vm7504_vm14, 4294967295, %v9341_v56 }
 0x110   : > { %9343 = vst [vmem:[#allocation57_spill] sm:$0xff] %v9342_v56 }
 0x111   : > { %6071 = vmatmul.mubr.msk.bf16.vlgmr.msra.gmra.mrb[80].mxu1 %vm7461_vm10, %v5351_v2  ;;  %5348 = vmatmul.mubr.msk.bf16.vlgmr.msra.gmra.mrb[80].mxu0 %vm7437_vm5, %v7433_v57  ;;  %vm7495_vm5 = vmpackc.low %vm5983_vm7, %vm9137_vm1  ;;  %vm9344_vm7 = vcmp.lt.s32.totalorder %v6981_v43, 7  ;;  %vm5985_vm1 = vcmp.ne.s32.totalorder %v824_v32, 15 }
 0x112   : > { %6074 = vmatprep.mubr.msk.bf16.mxu1 %vm7468_vm12, %v5355_v0  ;;  %2414 = vmatprep.mubr.bf16.mxu0 %v9331_v33  ;;  %v9339_v3 = vsel %vm7495_vm5, 4294967295, %v9338_v3  ;;  %v1572_v40 = vsel %vm9344_vm7, %v1515_v47, %v1516_v45  ;;  %vm9345_vm0 = vmmov %vm9344_vm7  ;;  %vm9348_vm7 = vmmov 1  }
 0x113   : > { %9340 = vst [vmem:[#allocation56_spill] sm:$0xff] %v9339_v3  ;;  %v1573_v6 = vsel %vm9345_vm0, %v1514_v54, %v1515_v47  ;;  %vm9346_vm8 = vmmov %vm9345_vm0  ;;  %4409 = vmatpush1.bf16.msra.mxu0 %v6455_v5  ;;  %v9349_v47 = vmov 0  ;;  %v866_v5 = vand.u32 15, %v720_v9 }
 0x114   : > { %v7532_v54 = vpack.c.bf16 %v1572_v40, %v1573_v6  ;;  %4410 = vmatprep.subr.bf16.mxu0 %v9331_v33  ;;  %v1521_v40 = vrot.slane %v6794_v13, 1  ;;  %v1522_v6 = vrot.slane %v6797_v14, 1  ;;  %v724_v14 = vadd.s32 168, %v6981_v43  ;;  %v6456_v13 = vld [vmem:[%s9093_s5 + $0x20] ss:$12 sps:$4 sm:$0xff]  }
 0x115   : > { %vm5988_vm13 = vcmp.ne.s32.totalorder %v866_v5, 15  ;;  %v1525_v5 = vrot.slane %v6806_v17, 1 }
 0x117   : > { %4411 = vmatpush1.bf16.msra.mxu0 %v6456_v13  ;;  %v894_v13 = vand.u32 15, %v724_v14 }
 0x118   : > { %4412 = vmatprep.subr.bf16.mxu0 %v9331_v33 }
 0x119   : > { %6075 = vmatmul.mubr.msk.bf16.gmra.mrb[84].mxu1 %vm7495_vm5, %v7492_v4  ;;  %5352 = vmatmul.mubr.msk.bf16.gmra.mrb[4].mxu0 %vm7461_vm10, %v5351_v2  ;;  %v1570_v2 = vsel %vm9346_vm8, %v1517_v41, %v1518_v53  ;;  %vm9347_vm10 = vmmov %vm9345_vm0 }
 0x11a   : > { %6078 = vmatprep.mubr.msk.bf16.mxu1 %vm7504_vm14, %v7499_v50  ;;  %2424 = vmatprep.mubr.bf16.mxu0 %v9331_v33  ;;  %v1571_v63 = vsel %vm9347_vm10, %v1516_v45, %v1517_v41  ;;  %vm7536_vm0 = vmpackc.low %vm5985_vm1, %vm9348_vm7  ;;  %v1520_v45 = vrot.slane %v6791_v12, 1  ;;  %v9352_v41 = vmov 0 }
 0x11b   : > { %v9350_v47 = vsel %vm7536_vm0, 4294967295, %v9349_v47  ;;  %v7540_v32 = vpack.c.bf16 %v1570_v2, %v1571_v63  ;;  %vm7545_vm8 = vmpackc.low %vm5986_vm3, %vm9348_vm7  ;;  %v722_v63 = vadd.s32 152, %v6981_v43 }
 0x11c   : > { %9351 = vst [vmem:[#allocation58_spill] sm:$0xff] %v9350_v47  ;;  %v9353_v41 = vsel %vm7545_vm8, 4294967295, %v9352_v41  ;;  %vm9355_vm1 = vmmov %vm9347_vm10  ;;  %vm5987_vm10 = vcmp.ne.s32.totalorder %v852_v61, 15 }
 0x11d   : > { %9354 = vst [vmem:[#allocation59_spill] sm:$0xff] %v9353_v41  ;;  %v1568_v2 = vsel %vm9355_vm1, %v1519_v8, %v1520_v45  ;;  %vm9356_vm3 = vmmov %vm9355_vm1  ;;  %v880_v61 = vand.u32 15, %v722_v63  ;;  %v6459_v63 = vld [vmem:[%s9093_s5 + $0x4] ss:$12 sps:$4 sm:$0xff]  }
 0x11e   : > { %v1569_v10 = vsel %vm9356_vm3, %v1518_v53, %v1519_v8  ;;  %vm9357_vm15 = vmmov %vm9355_vm1  ;;  %v9359_v8 = vmov 0  ;;  %3998 = vmatprep.subr.bf16.mxu1 %v6459_v63 }
 0x11f   : > { %v1566_v9 = vsel %vm9357_vm15, %v1521_v40, %v1522_v6  ;;  %v7573_v12 = vpack.c.bf16 %v1568_v2, %v1569_v10  ;;  %vm7585_vm15 = vmpackc.low %vm5988_vm13, %vm9348_vm7  ;;  %v1526_v2 = vrot.slane %v6809_v18, 1  ;;  %v6457_v10 = vld [vmem:[%s9093_s5] ss:$12 sps:$4 sm:$0xff]   ;;  %v728_v18 = vadd.s32 200, %v6981_v43 }
 0x120   : > { %vm9365_vm13 = vmmov %vm9356_vm3  ;;  %3999 = vmatpush1.bf16.msra.mxu1 %v6457_v10  ;;  %v9372_v10 = vmov 0 }
 0x121   : > { %6079 = vmatmul.mubr.msk.bf16.gmra.mrb[88].mxu1 %vm7536_vm0, %v7532_v54  ;;  %5356 = vmatmul.mubr.msk.bf16.gmra.mrb[8].mxu0 %vm7468_vm12, %v5355_v0  ;;  %vm9358_vm12 = vmmov %vm9355_vm1 }
 0x122   : > { %6082 = vmatprep.mubr.msk.bf16.mxu1 %vm7545_vm8, %v7540_v32  ;;  %2434 = vmatprep.mubr.bf16.mxu0 %v9331_v33  ;;  %v1567_v0 = vsel %vm9358_vm12, %v1520_v45, %v1521_v40  ;;  %vm7576_vm1 = vmpackc.low %vm5987_vm10, %vm9348_vm7  ;;  %v1524_v45 = vrot.slane %v6803_v16, 1  ;;  %v9362_v40 = vmov 0  ;;  %v1528_v16 = vrot.slane %v6815_v20, 1  ;;  %v6466_v20 = vld [vmem:[%s9093_s5 + $0x34] ss:$12 sps:$4 sm:$0xff]  }
 0x123   : > { %v9360_v8 = vsel %vm7576_vm1, 4294967295, %v9359_v8  ;;  %v7580_v53 = vpack.c.bf16 %v1566_v9, %v1567_v0  ;;  %v9363_v40 = vsel %vm7585_vm15, 4294967295, %v9362_v40  ;;  %vm9366_vm12 = vmmov %vm9356_vm3  ;;  %vm5989_vm3 = vcmp.ne.s32.totalorder %v880_v61, 15 }
 0x124   : > { %9361 = vst [vmem:[#allocation60_spill] sm:$0xff] %v9360_v8  ;;  %9364 = vst [vmem:[#allocation61_spill] sm:$0xff] %v9363_v40  ;;  %v1564_v9 = vsel %vm9365_vm13, %v1523_v11, %v1524_v45  ;;  %v1565_v0 = vsel %vm9366_vm12, %v1522_v6, %v1523_v11  ;;  %v9369_v11 = vmov 0  ;;  %v1527_v61 = vrot.slane %v6812_v19, 1 }
 0x125   : > { %vm9367_vm10 = vmmov %vm9366_vm12  ;;  %v7618_v17 = vpack.c.bf16 %v1564_v9, %v1565_v0  ;;  %v1529_v9 = vrot.slane %v6818_v21, 1  ;;  %v1530_v0 = vrot.slane %v6821_v22, 1  ;;  %v6464_v22 = vld [vmem:[%s9093_s5 + $0x30] ss:$12 sps:$4 sm:$0xff]   ;;  %v732_v21 = vadd.s32 232, %v6981_v43 }
 0x126   : > { %v1562_v14 = vsel %vm9367_vm10, %v1525_v5, %v1526_v2  ;;  %vm9368_vm11 = vmmov %vm9367_vm10 }
 0x127   : > { %v1563_v63 = vsel %vm9368_vm11, %v1524_v45, %v1525_v5  ;;  %vm7621_vm13 = vmpackc.low %vm5989_vm3, %vm9348_vm7  ;;  %v6462_v45 = vld [vmem:[%s9093_s5 + $0x1c] ss:$12 sps:$4 sm:$0xff]   ;;  %v6463_v5 = vld [vmem:[%s9093_s5 + $0x38] ss:$12 sps:$4 sm:$0xff]  }
 0x128   : > { %v9370_v11 = vsel %vm7621_vm13, 4294967295, %v9369_v11  ;;  %v7625_v6 = vpack.c.bf16 %v1562_v14, %v1563_v63  ;;  %v6460_v14 = vld [vmem:[%s9093_s5 + $0x18] ss:$12 sps:$4 sm:$0xff]   ;;  %v922_v63 = vand.u32 15, %v728_v18  ;;  %4000 = vmatprep.subr.bf16.mxu1 %v6462_v45  ;;  %4413 = vmatpush1.bf16.msra.mxu0 %v6463_v5  ;;  %v730_v45 = vadd.s32 216, %v6981_v43 }
 0x129   : > { %6083 = vmatmul.mubr.msk.bf16.gmra.mrb[92].mxu1 %vm7576_vm1, %v7573_v12  ;;  %5360 = vmatmul.mubr.msk.bf16.gmra.mrb[12].mxu0 %vm7495_vm5, %v7492_v4  ;;  %v726_v4 = vadd.s32 184, %v6981_v43  ;;  %vm5990_vm5 = vcmp.ne.s32.totalorder %v894_v13, 15  ;;  %9371 = vst [vmem:[#allocation62_spill] sm:$0xff] %v9370_v11 }
 0x12a   : > { %6086 = vmatprep.mubr.msk.bf16.mxu1 %vm7585_vm15, %v7580_v53  ;;  %2444 = vmatprep.mubr.bf16.mxu0 %v9331_v33  ;;  %vm7636_vm11 = vmpackc.low %vm5990_vm5, %vm9348_vm7  ;;  %v936_v19 = vand.u32 15, %v730_v45  ;;  %v950_v45 = vand.u32 15, %v732_v21 }
 0x12b   : > { %v9373_v10 = vsel %vm7636_vm11, 4294967295, %v9372_v10  ;;  %v908_v13 = vand.u32 15, %v726_v4  ;;  %4414 = vmatprep.subr.bf16.mxu0 %v9331_v33  ;;  %vm9375_vm5 = vmmov %vm9367_vm10  ;;  %4001 = vmatpush1.bf16.msra.mxu1 %v6460_v14  ;;  %v9382_v14 = vmov 0 }
 0x12c   : > { %9374 = vst [vmem:[#allocation63_spill] sm:$0xff] %v9373_v10  ;;  %v1560_v18 = vsel %vm9375_vm5, %v1527_v61, %v1528_v16  ;;  %vm9376_vm12 = vmmov %vm9375_vm5  ;;  %4002 = vmatprep.subr.bf16.mxu1 %v6466_v20  ;;  %v1533_v20 = vrot.slane %v6830_v25, 1  ;;  %vm5994_vm6 = vcmp.ne.s32.totalorder %v950_v45, 15  ;;  %v1536_v45 = vrot.slane %v6839_v28, 1  ;;  %v6474_v28 = vld [vmem:[%s9093_s5 + $0x78] ss:$12 sps:$4 sm:$0xff]  }
 0x12d   : > { %v1561_v4 = vsel %vm9376_vm12, %v1526_v2, %v1527_v61  ;;  %vm5991_vm3 = vcmp.ne.s32.totalorder %v908_v13, 15  ;;  %vm9377_vm10 = vmmov %vm9375_vm5  ;;  %v9379_v61 = vmov 0 }
 0x12e   : > { %v1558_v5 = vsel %vm9377_vm10, %v1529_v9, %v1530_v0  ;;  %v7672_v2 = vpack.c.bf16 %v1560_v18, %v1561_v4  ;;  %vm7675_vm12 = vmpackc.low %vm5991_vm3, %vm9348_vm7  ;;  %v6469_v18 = vld [vmem:[%s9093_s5 + $0x4c] ss:$12 sps:$4 sm:$0xff]   ;;  %v6470_v4 = vld [vmem:[%s9093_s5 + $0x50] ss:$12 sps:$4 sm:$0xff]  }
 0x12f   : > { %v9380_v61 = vsel %vm7675_vm12, 4294967295, %v9379_v61  ;;  %4003 = vmatpush1.bf16.msra.mxu1 %v6464_v22  ;;  %vm9385_vm3 = vmmov %vm9377_vm10  ;;  %4415 = vmatpush1.bf16.msra.mxu0 %v6470_v4  ;;  %v1535_v4 = vrot.slane %v6836_v27, 1  ;;  %v740_v27 = vadd.s32 296, %v6981_v43 }
 0x130   : > { %9381 = vst [vmem:[#allocation64_spill] sm:$0xff] %v9380_v61  ;;  %4004 = vmatprep.subr.bf16.mxu1 %v6469_v18  ;;  %vm9386_vm10 = vmmov %vm9385_vm3  ;;  %4416 = vmatprep.subr.bf16.mxu0 %v9331_v33 }
 0x131   : > { %6087 = vmatmul.mubr.msk.bf16.gmra.mrb[96].mxu1 %vm7621_vm13, %v7618_v17  ;;  %5364 = vmatmul.mubr.msk.bf16.gmra.mrb[16].mxu0 %vm7504_vm14, %v7499_v50  ;;  %vm9378_vm14 = vmmov %vm9375_vm5  ;;  %vm5992_vm5 = vcmp.ne.s32.totalorder %v922_v63, 15  ;;  %v1534_v63 = vrot.slane %v6833_v26, 1  ;;  %v736_v26 = vadd.s32 264, %v6981_v43 }
 0x132   : > { %6090 = vmatprep.mubr.msk.bf16.mxu1 %vm7636_vm11, %v7625_v6  ;;  %2454 = vmatprep.mubr.bf16.mxu0 %v9331_v33  ;;  %v1559_v50 = vsel %vm9378_vm14, %v1528_v16, %v1529_v9  ;;  %v1531_v16 = vrot.slane %v6824_v23, 1  ;;  %v1532_v9 = vrot.slane %v6827_v24, 1  ;;  %vm7684_vm14 = vmpackc.low %vm5992_vm5, %vm9348_vm7  ;;  %vm5993_vm5 = vcmp.ne.s32.totalorder %v936_v19, 15  ;;  %v6473_v19 = vld [vmem:[%s9093_s5 + $0x64] ss:$12 sps:$4 sm:$0xff]  }
 0x133   : > { %v7679_v13 = vpack.c.bf16 %v1558_v5, %v1559_v50  ;;  %v9383_v14 = vsel %vm7684_vm14, 4294967295, %v9382_v14  ;;  %v6467_v5 = vld [vmem:[%s9093_s5 + $0x48] ss:$12 sps:$4 sm:$0xff]   ;;  %v734_v50 = vadd.s32 248, %v6981_v43  ;;  %vm9387_vm9 = vmmov %vm9385_vm3  ;;  %v9400_v23 = vmov 0 }
 0x134   : > { %9384 = vst [vmem:[#allocation65_spill] sm:$0xff] %v9383_v14  ;;  %v1556_v21 = vsel %vm9385_vm3, %v1531_v16, %v1532_v9  ;;  %v1557_v22 = vsel %vm9386_vm10, %v1530_v0, %v1531_v16  ;;  %v1554_v18 = vsel %vm9387_vm9, %v1533_v20, %v1534_v63  ;;  %4005 = vmatpush1.bf16.msra.mxu1 %v6467_v5  ;;  %v6471_v0 = vld [vmem:[%s9093_s5 + $0x60] ss:$12 sps:$4 sm:$0xff]   ;;  %vm7729_vm9 = vmpackc.low %vm5993_vm5, %vm9348_vm7  ;;  %v9389_v16 = vmov 0 }
 0x135   : > { %v7720_v25 = vpack.c.bf16 %v1556_v21, %v1557_v22  ;;  %v9390_v16 = vsel %vm7729_vm9, 4294967295, %v9389_v16  ;;  %v9392_v5 = vmov 0  ;;  %v1537_v21 = vrot.slane %v6842_v29, 1  ;;  %4006 = vmatprep.subr.bf16.mxu1 %v6473_v19  ;;  %vm9396_vm5 = vmmov %vm9385_vm3 }
 0x136   : > { %9391 = vst [vmem:[#allocation66_spill] sm:$0xff] %v9390_v16  ;;  %v1538_v22 = vrot.slane %v6845_v30, 1  ;;  %v738_v19 = vadd.s32 280, %v6981_v43 }
 0x138   : > { %4007 = vmatpush1.bf16.msra.mxu1 %v6471_v0  ;;  %v1553_v0 = vsel %vm9385_vm3, %v1534_v63, %v1535_v4 }
 0x139   : > { %6091 = vmatmul.mubr.msk.bf16.gmra.mrb[100].mxu1 %vm7675_vm12, %v7672_v2  ;;  %5368 = vmatmul.mubr.msk.bf16.gmra.mrb[20].mxu0 %vm7536_vm0, %v7532_v54  ;;  %vm9388_vm0 = vmmov %vm9385_vm3 }
 0x13a   : > { %6094 = vmatprep.mubr.msk.bf16.mxu1 %vm7684_vm14, %v7679_v13  ;;  %2464 = vmatprep.mubr.bf16.mxu0 %v9331_v33  ;;  %v1555_v54 = vsel %vm9388_vm0, %v1532_v9, %v1533_v20  ;;  %v964_v20 = vand.u32 15, %v734_v50  ;;  %vm7738_vm0 = vmpackc.low %vm5994_vm6, %vm9348_vm7  ;;  %v6477_v50 = vld [vmem:[%s9093_s5 + $0x68] ss:$12 sps:$4 sm:$0xff]  }
 0x13b   : > { %v7733_v9 = vpack.c.bf16 %v1554_v18, %v1555_v54  ;;  %v9393_v5 = vsel %vm7738_vm0, 4294967295, %v9392_v5  ;;  %v6476_v18 = vld [vmem:[%s9093_s5 + $0x7c] ss:$12 sps:$4 sm:$0xff]   ;;  %v978_v54 = vand.u32 15, %v736_v26  ;;  %vm9395_vm6 = vmmov %vm9385_vm3  ;;  %4417 = vmatpush1.bf16.msra.mxu0 %v6477_v50  ;;  %v1539_v50 = vrot.slane %v6848_v31, 1 }
 0x13c   : > { %9394 = vst [vmem:[#allocation67_spill] sm:$0xff] %v9393_v5  ;;  %4008 = vmatprep.subr.bf16.mxu1 %v6476_v18  ;;  %v1552_v26 = vsel %vm9395_vm6, %v1535_v4, %v1536_v45  ;;  %vm5995_vm10 = vcmp.ne.s32.totalorder %v964_v20, 15  ;;  %v1550_v18 = vsel %vm9396_vm5, %v1537_v21, %v1538_v22  ;;  %4418 = vmatprep.subr.bf16.mxu0 %v9331_v33 }
 0x13d   : > { %vm7772_vm4 = vcmp.ne.s32.totalorder %v978_v54, 15  ;;  %4009 = vmatpush1.bf16.msra.mxu1 %v6474_v28  ;;  %v7778_v4 = vpack.c.bf16 %v1552_v26, %v1553_v0  ;;  %vm7781_vm6 = vmpackc.low %vm5995_vm10, %vm9348_vm7  ;;  %v9403_v26 = vmov 0  ;;  %v6480_v0 = vld [vmem:[%s9093_s5 + $0x94] ss:$12 sps:$4 sm:$0xff]  }
 0x13e   : > { %v9401_v23 = vsel %vm7781_vm6, 4294967295, %v9400_v23  ;;  %4010 = vmatprep.subr.bf16.mxu1 %v6480_v0 }
 0x13f   : > { %9402 = vst [vmem:[#allocation68_spill] sm:$0xff] %v9401_v23 }
 0x141   : > { %6095 = vmatmul.mubr.msk.bf16.gmra.mrb[104].mxu1 %vm7729_vm9, %v7720_v25  ;;  %5372 = vmatmul.mubr.msk.bf16.gmra.mrb[24].mxu0 %vm7545_vm8, %v7540_v32  ;;  %vm9397_vm8 = vmmov %vm9385_vm3 }
 0x142   : > { %6098 = vmatprep.mubr.msk.bf16.mxu1 %vm7738_vm0, %v7733_v9  ;;  %2474 = vmatprep.mubr.bf16.mxu0 %v9331_v33  ;;  %v1551_v32 = vsel %vm9397_vm8, %v1536_v45, %v1537_v21  ;;  %v992_v21 = vand.u32 15, %v738_v19  ;;  %vm7791_vm8 = vmpackc.low %vm7772_vm4, %vm9348_vm7 }
 0x143   : > { %v7785_v45 = vpack.c.bf16 %v1550_v18, %v1551_v32  ;;  %v9404_v26 = vsel %vm7791_vm8, 4294967295, %v9403_v26  ;;  %v1006_v18 = vand.u32 15, %v740_v27  ;;  %vm9406_vm4 = vmmov %vm9385_vm3  ;;  %v1549_v27 = vsel %vm9385_vm3, %v1538_v22, %v1539_v50  ;;  %v6484_v22 = vld [vmem:[%s9093_s5 + $0x80] ss:$12 sps:$4 sm:$0xff]  }
 0x144   : > { %v2633_v30 = vpop.f32.mrb[0].mxu1  ;;  %v2183_v63 = vpop.f32.mrb[0].mxu0  ;;  %9405 = vst [vmem:[#allocation69_spill] sm:$0xff] %v9404_v26  ;;  %v1548_v29 = vsel %vm9406_vm4, %v1539_v50, %v7425_v62  ;;  %vm5997_vm10 = vcmp.ne.s32.totalorder %v992_v21, 15  ;;  %v742_v32 = vadd.s32 312, %v6981_v43  ;;  %v9407_v21 = vmov 0  ;;  %4419 = vmatpush1.bf16.msra.mxu0 %v6484_v22 }
 0x145   : > { %v2634_v20 = vpop.f32.mrb[1].mxu1  ;;  %v2185_v24 = vpop.f32.mrb[1].mxu0  ;;  %vm5998_vm5 = vcmp.ne.s32.totalorder %v1006_v18, 15  ;;  %v7823_v62 = vpack.c.bf16 %v1548_v29, %v1549_v27  ;;  %vm7829_vm4 = vmpackc.low %vm5997_vm10, %vm9348_vm7  ;;  %4420 = vmatprep.subr.bf16.mxu0 %v9331_v33  ;;  %v6489_v22 = vld [vmem:[%s9093_s5 + $0xd8] ss:$12 sps:$4 sm:$0xff]  }
 0x146   : > { %v2635_v30 = vpop.f32.mrb[2].mxu1  ;;  %v2186_v54 = vpop.f32.mrb[2].mxu0  ;;  %v6478_v24 = vld [vmem:[%s9093_s5 + $0x90] ss:$12 sps:$4 sm:$0xff]   ;;  %v6483_v20 = vld [vmem:[%s9093_s5 + $0xac] ss:$12 sps:$4 sm:$0xff]   ;;  %vm7834_vm3 = vmpackc.low %vm5998_vm5, %vm9348_vm7 }
 0x147   : > { %v2636_v28 = vpop.f32.mrb[3].mxu1  ;;  %v2188_v19 = vpop.f32.mrb[3].mxu0  ;;  %4011 = vmatpush1.bf16.msra.mxu1 %v6478_v24  ;;  %v9408_v21 = vsel %vm7829_vm4, 4294967295, %v9407_v21  ;;  %v1020_v24 = vand.u32 15, %v742_v32  ;;  %v6485_v32 = vld [vmem:[%s9093_s5 + $0xc0] ss:$12 sps:$4 sm:$0xff]  }
 0x148   : > { %9409 = vst [vmem:[#allocation70_spill] sm:$0xff] %v9408_v21  ;;  %4012 = vmatprep.subr.bf16.mxu1 %v6483_v20  ;;  %v6525_v28 = vld [vmem:[%s9093_s5 + $0x1b0] ss:$12 sps:$4 sm:$0xff]  }
 0x149   : > { %6099 = vmatmul.mubr.msk.bf16.gmra.mrb[108].mxu1 %vm7781_vm6, %v7778_v4  ;;  %5376 = vmatmul.mubr.msk.bf16.gmra.mrb[28].mxu0 %vm7576_vm1, %v7573_v12  ;;  %v6481_v12 = vld [vmem:[%s9093_s5 + $0xa8] ss:$12 sps:$4 sm:$0xff]   ;;  %vm5999_vm10 = vcmp.ne.s32.totalorder %v1020_v24, 15 }
 0x14a   : > { %6102 = vmatprep.mubr.msk.bf16.mxu1 %vm7791_vm8, %v7785_v45  ;;  %2484 = vmatprep.mubr.bf16.mxu0 %v9331_v33  ;;  %vm7850_vm5 = vmpackc.low %vm5999_vm10, %vm9348_vm7  ;;  %v6493_v24 = vld [vmem:[%s9093_s5 + $0xc8] ss:$12 sps:$4 sm:$0xff]   ;;  %vm9417_vm7 = vcmp.lt.s32.totalorder %v6981_v43, 1 }
 0x14b   : > { %4013 = vmatpush1.bf16.msra.mxu1 %v6481_v12  ;;  %v6492_v12 = vld [vmem:[%s9093_s5 + $0xb0] ss:$12 sps:$4 sm:$0xff]   ;;  %vm9419_vm10 = vmmov %vm9417_vm7 }
 0x14c   : > { %v2639_v63 = vpop.f32.mrb[4].mxu1 }
 0x14d   : > { %v2640_v30 = vpop.f32.mrb[5].mxu1  ;;  %v6487_v63 = vld [vmem:[%s9093_s5 + $0xc4] ss:$12 sps:$4 sm:$0xff]  }
 0x14e   : > { %v2641_v50 = vpop.f32.mrb[6].mxu1  ;;  %4014 = vmatprep.subr.bf16.mxu1 %v6487_v63 }
 0x14f   : > { %v2642_v54 = vpop.f32.mrb[7].mxu1  ;;  %4015 = vmatpush1.bf16.msra.mxu1 %v6485_v32 }
 0x151   : > { %6103 = vmatmul.mubr.msk.bf16.gmra.mrb[112].mxu1 %vm7829_vm4, %v7823_v62  ;;  %5380 = vmatmul.mubr.msk.bf16.gmra.mrb[32].mxu0 %vm7585_vm15, %v7580_v53  ;;  %v6488_v53 = vld [vmem:[%s9093_s5 + $0x98] ss:$12 sps:$4 sm:$0xff]  }
 0x152   : > { %6106 = vmatprep.mubr.msk.bf16.mxu1 %vm7834_vm3, %v7433_v57  ;;  %2494 = vmatprep.mubr.bf16.mxu0 %v9331_v33 }
 0x153   : > { %4421 = vmatpush1.bf16.msra.mxu0 %v6488_v53 }
 0x154   : > { %v2645_v0 = vpop.f32.mrb[8].mxu1  ;;  %4422 = vmatprep.subr.bf16.mxu0 %v9331_v33 }
 0x155   : > { %v2647_v19 = vpop.f32.mrb[9].mxu1  ;;  %v6494_v0 = vld [vmem:[%s9093_s5 + $0xf0] ss:$12 sps:$4 sm:$0xff]  }
 0x156   : > { %v2648_v29 = vpop.f32.mrb[10].mxu1  ;;  %v6496_v19 = vld [vmem:[%s9093_s5 + $0xf4] ss:$12 sps:$4 sm:$0xff]  }
 0x157   : > { %v2650_v27 = vpop.f32.mrb[11].mxu1  ;;  %4423 = vmatpush1.bf16.msra.mxu0 %v6492_v12  ;;  %v6497_v29 = vld [vmem:[%s9093_s5 + $0xe0] ss:$12 sps:$4 sm:$0xff]  }
 0x158   : > { %4424 = vmatprep.subr.bf16.mxu0 %v9331_v33  ;;  %v6500_v12 = vld [vmem:[%s9093_s5 + $0x10c] ss:$12 sps:$4 sm:$0xff]  }
 0x159   : > { %6107 = vmatmul.mubr.msk.bf16.gmra.mrb[116].mxu1 %vm7850_vm5, %v7433_v57  ;;  %5384 = vmatmul.mubr.msk.bf16.gmra.mrb[36].mxu0 %vm7621_vm13, %v7618_v17  ;;  %v6491_v17 = vld [vmem:[%s9093_s5 + $0xdc] ss:$12 sps:$4 sm:$0xff]  }
 0x15a   : > { %2504 = vmatprep.mubr.bf16.mxu0 %v9331_v33  ;;  %4030 = vmatprep.mubr.bf16.mxu1 %v9331_v33 }
 0x15b   : > { %4016 = vmatprep.subr.bf16.mxu1 %v6491_v17  ;;  %4425 = vmatpush1.bf16.msra.mxu0 %v6493_v24  ;;  %v6502_v24 = vld [vmem:[%s9093_s5 + $0x120] ss:$12 sps:$4 sm:$0xff]  }
 0x15c   : > { %v7873_v20 = vpop.f32.mrb[12].mxu1  ;;  %4017 = vmatpush1.bf16.msra.mxu1 %v6489_v22  ;;  %4426 = vmatprep.subr.bf16.mxu0 %v9331_v33  ;;  %v6505_v22 = vld [vmem:[%s9093_s5 + $0x110] ss:$12 sps:$4 sm:$0xff]  }
 0x15d   : > { %v2655_v30 = vpop.f32.mrb[13].mxu1  ;;  %4018 = vmatprep.subr.bf16.mxu1 %v6496_v19 }
 0x15e   : > { %v7883_v50 = vpop.f32.mrb[14].mxu1  ;;  %v6501_v30 = vld [vmem:[%s9093_s5 + $0xf8] ss:$12 sps:$4 sm:$0xff]  }
 0x15f   : > { %v2658_v54 = vpop.f32.mrb[15].mxu1  ;;  %4427 = vmatpush1.bf16.msra.mxu0 %v6497_v29  ;;  %v6509_v29 = vld [vmem:[%s9093_s5 + $0x128] ss:$12 sps:$4 sm:$0xff]  }
 0x160   : > { %4019 = vmatpush1.bf16.msra.mxu1 %v6494_v0  ;;  %4428 = vmatprep.subr.bf16.mxu0 %v9331_v33 }
 0x161   : > { %5388 = vmatmul.mubr.msk.bf16.gmra.mrb[40].mxu0 %vm7636_vm11, %v7625_v6  ;;  %v6498_v6 = vld [vmem:[%s9093_s5 + $0x108] ss:$12 sps:$4 sm:$0xff]   ;;  %4020 = vmatprep.subr.bf16.mxu1 %v6500_v12 }
 0x162   : > { %2514 = vmatprep.mubr.bf16.mxu0 %v9331_v33 }
 0x163   : > { %4429 = vmatpush1.bf16.msra.mxu0 %v6501_v30 }
 0x164   : > { %v7903_v27 = vpop.f32.mrb[16].mxu1  ;;  %4021 = vmatpush1.bf16.msra.mxu1 %v6498_v6  ;;  %4430 = vmatprep.subr.bf16.mxu0 %v9331_v33  ;;  %v6510_v6 = vld [vmem:[%s9093_s5 + $0x140] ss:$12 sps:$4 sm:$0xff]  }
 0x165   : > { %v2663_v53 = vpop.f32.mrb[17].mxu1 }
 0x166   : > { %v7905_v32 = vpop.f32.mrb[18].mxu1  ;;  %v6506_v53 = vld [vmem:[%s9093_s5 + $0x138] ss:$12 sps:$4 sm:$0xff]  }
 0x167   : > { %v2666_v63 = vpop.f32.mrb[19].mxu1  ;;  %4431 = vmatpush1.bf16.msra.mxu0 %v6505_v22 }
 0x168   : > { %4432 = vmatprep.subr.bf16.mxu0 %v9331_v33  ;;  %v6508_v63 = vld [vmem:[%s9093_s5 + $0x13c] ss:$12 sps:$4 sm:$0xff]  }
 0x169   : > { %5392 = vmatmul.mubr.msk.bf16.gmra.mrb[44].mxu0 %vm7675_vm12, %v7672_v2  ;;  %v6504_v2 = vld [vmem:[%s9093_s5 + $0x124] ss:$12 sps:$4 sm:$0xff]  }
 0x16a   : > { %2524 = vmatprep.mubr.bf16.mxu0 %v9331_v33  ;;  %4022 = vmatprep.subr.bf16.mxu1 %v6504_v2  ;;  %v6514_v2 = vld [vmem:[%s9093_s5 + $0x158] ss:$12 sps:$4 sm:$0xff]  }
 0x16b   : > { %4023 = vmatpush1.bf16.msra.mxu1 %v6502_v24  ;;  %4433 = vmatpush1.bf16.msra.mxu0 %v6509_v29  ;;  %v6511_v24 = vld [vmem:[%s9093_s5 + $0x150] ss:$12 sps:$4 sm:$0xff]   ;;  %v7974_v29 = vunpack.c.l.bf16 %v9331_v33 }
 0x16c   : > { %v7924_v17 = vpop.f32.mrb[20].mxu1  ;;  %4024 = vmatprep.subr.bf16.mxu1 %v6508_v63  ;;  %4434 = vmatprep.subr.bf16.mxu0 %v9331_v33  ;;  %v6515_v63 = vld [vmem:[%s9093_s5 + $0x168] ss:$12 sps:$4 sm:$0xff]  }
 0x16d   : > { %v2671_v54 = vpop.f32.mrb[21].mxu1  ;;  %9414 = vst [vmem:[#allocation71_spill] sm:$0xff] %v7974_v29 }
 0x16e   : > { %v7933_v0 = vpop.f32.mrb[22].mxu1 }
 0x16f   : > { %v2674_v19 = vpop.f32.mrb[23].mxu1  ;;  %4025 = vmatpush1.bf16.msra.mxu1 %v6506_v53  ;;  %4435 = vmatpush1.bf16.msra.mxu0 %v6510_v6  ;;  %v7977_v53 = vunpack.c.h.bf16 %v9331_v33 }
 0x170   : > { %4436 = vmatprep.subr.bf16.mxu0 %v9331_v33  ;;  %v6517_v19 = vld [vmem:[%s9093_s5 + $0x16c] ss:$12 sps:$4 sm:$0xff]  }
 0x171   : > { %5396 = vmatmul.mubr.msk.bf16.gmra.mrb[48].mxu0 %vm7684_vm14, %v7679_v13  ;;  %v6513_v13 = vld [vmem:[%s9093_s5 + $0x154] ss:$12 sps:$4 sm:$0xff]   ;;  %9415 = vst [vmem:[#allocation72_spill] sm:$0xff] %v7977_v53 }
 0x172   : > { %2534 = vmatprep.mubr.bf16.mxu0 %v9331_v33  ;;  %4026 = vmatprep.subr.bf16.mxu1 %v6513_v13  ;;  %v7993_v13 = vrot.slane %v7977_v53, 7 }
 0x173   : > { %4027 = vmatpush1.bf16.msra.mxu1 %v6511_v24  ;;  %4437 = vmatpush1.bf16.msra.mxu0 %v6514_v2 }
 0x174   : > { %v7952_v12 = vpop.f32.mrb[24].mxu1  ;;  %4028 = vmatprep.subr.bf16.mxu1 %v6517_v19  ;;  %4438 = vmatprep.subr.bf16.mxu0 %v9331_v33 }
 0x175   : > { %v2679_v30 = vpop.f32.mrb[25].mxu1 }
 0x176   : > { %v7955_v22 = vpop.f32.mrb[26].mxu1  ;;  %v7990_v30 = vrot.slane %v7974_v29, 7 }
 0x177   : > { %v2682_v54 = vpop.f32.mrb[27].mxu1  ;;  %4029 = vmatpush1.bf16.msra.mxu1 %v6515_v63 }
 0x178   : > { %9416 = vst [vmem:[#allocation73_spill] sm:$0xff] %v7990_v30  ;;  %v8001_v2 = vsel %vm9417_vm7, %v7990_v30, %v7993_v13  ;;  %v3433_v19 = vsel %vm9419_vm10, %v7993_v13, %v7990_v30 }
 0x179   : > { %5400 = vmatmul.mubr.msk.bf16.gmra.mrb[52].mxu0 %vm7729_vm9, %v7720_v25  ;;  %v6518_v25 = vld [vmem:[%s9093_s5 + $0x170] ss:$12 sps:$4 sm:$0xff]   ;;  %9418 = vst [vmem:[#allocation74_spill] sm:$0xff] %v8001_v2  ;;  %v5661_v15 = vpack.c.bf16 %v8001_v2, %v3433_v19 }
 0x17a   : > { %2544 = vmatprep.mubr.bf16.mxu0 %v9331_v33  ;;  %4439 = vmatpush1.bf16.msra.mxu0 %v6518_v25  ;;  %v6521_v25 = vld [vmem:[%s9093_s5 + $0x184] ss:$12 sps:$4 sm:$0xff]  }
 0x17b   : > { %5662 = vmatmul.mubr.msk.bf16.vlgmr.msra.gmra.mrb[120].mxu1 %vm7022_vm2, %v5661_v15  ;;  %4203 = vmatprep.subr.bf16.mxu1 %v6521_v25 }
 0x17c   : > { %v7986_v6 = vpop.f32.mrb[28].mxu1 }
 0x17d   : > { %v2687_v54 = vpop.f32.mrb[29].mxu1 }
 0x17e   : > { %v7995_v24 = vpop.f32.mrb[30].mxu1 }
 0x17f   : > { %v2690_v31 = vpop.f32.mrb[31].mxu1 }
 0x181   : > { %5404 = vmatmul.mubr.msk.bf16.gmra.mrb[56].mxu0 %vm7738_vm0, %v7733_v9  ;;  %v6519_v9 = vld [vmem:[%s9093_s5 + $0x180] ss:$12 sps:$4 sm:$0xff]  }
 0x182   : > { %2554 = vmatprep.mubr.bf16.mxu0 %v9331_v33  ;;  %4204 = vmatpush1.bf16.msra.mxu1 %v6519_v9  ;;  %v6524_v9 = vld [vmem:[%s9093_s5 + $0x19c] ss:$12 sps:$4 sm:$0xff]  }
 0x183   : > { %4205 = vmatprep.subr.bf16.mxu1 %v6524_v9 }
 0x184   : > { %v8014_v63 = vpop.f32.mrb[32].mxu1 }
 0x185   : > { %v2695_v54 = vpop.f32.mrb[33].mxu1 }
 0x186   : > { %v8016_v7 = vpop.f32.mrb[34].mxu1 }
 0x187   : > { %v2698_v16 = vpop.f32.mrb[35].mxu1 }
 0x189   : > { %5408 = vmatmul.mubr.msk.bf16.gmra.mrb[60].mxu0 %vm7781_vm6, %v7778_v4 }
 0x18a   : > { %2564 = vmatprep.mubr.bf16.mxu0 %v9331_v33 }
 0x18c   : > { %v8022_v31 = vpop.f32.mrb[36].mxu1 }
 0x18d   : > { %v2703_v19 = vpop.f32.mrb[37].mxu1 }
 0x18e   : > { %v8030_v54 = vpop.f32.mrb[38].mxu1 }
 0x18f   : > { %v2706_v16 = vpop.f32.mrb[39].mxu1 }
 0x191   : > { %5412 = vmatmul.mubr.msk.bf16.gmra.mrb[64].mxu0 %vm7791_vm8, %v7785_v45  ;;  %v6522_v45 = vld [vmem:[%s9093_s5 + $0x198] ss:$12 sps:$4 sm:$0xff]  }
 0x192   : > { %2574 = vmatprep.mubr.bf16.mxu0 %v9331_v33  ;;  %4206 = vmatpush1.bf16.msra.mxu1 %v6522_v45  ;;  %v6527_v45 = vld [vmem:[%s9093_s5 + $0x1b4] ss:$12 sps:$4 sm:$0xff]  }
 0x193   : > { %4207 = vmatprep.subr.bf16.mxu1 %v6527_v45  ;;  %v6528_v45 = vld [vmem:[%s9093_s5 + $0x1c8] ss:$12 sps:$4 sm:$0xff]  }
 0x194   : > { %v8036_v4 = vpop.f32.mrb[40].mxu1 }
 0x195   : > { %v2711_v23 = vpop.f32.mrb[41].mxu1 }
 0x196   : > { %v8038_v5 = vpop.f32.mrb[42].mxu1  ;;  %4208 = vmatpush1.bf16.msra.mxu1 %v6525_v28 }
 0x197   : > { %v2714_v14 = vpop.f32.mrb[43].mxu1 }
 0x199   : > { %5416 = vmatmul.mubr.msk.bf16.gmra.mrb[68].mxu0 %vm7829_vm4, %v7823_v62 }
 0x19a   : > { %2584 = vmatprep.mubr.bf16.mxu0 %v9331_v33 }
 0x19c   : > { %v8044_v25 = vpop.f32.mrb[44].mxu1 }
 0x19d   : > { %v2719_v23 = vpop.f32.mrb[45].mxu1 }
 0x19e   : > { %v8052_v19 = vpop.f32.mrb[46].mxu1 }
 0x19f   : > { %v2722_v14 = vpop.f32.mrb[47].mxu1 }
 0x1a1   : > { %5420 = vmatmul.mubr.msk.bf16.gmra.mrb[84].mxu0 %vm7834_vm3, %v7433_v57  ;;  %vm9422_vm3 = vmmov %vm9417_vm7  ;;  %vm9424_vm7 = vnez %v9284_v35 }
 0x1a2   : > { %2592 = vmatprep.mubr.bf16.mxu0 %v9331_v33 }
 0x1a4   : > { %v8058_v62 = vpop.f32.mrb[48].mxu1 }
 0x1a5   : > { %v2727_v16 = vpop.f32.mrb[49].mxu1 }
 0x1a6   : > { %v8060_v21 = vpop.f32.mrb[50].mxu1 }
 0x1a7   : > { %v2730_v26 = vpop.f32.mrb[51].mxu1 }
 0x1a9   : > { %5424 = vmatmul.mubr.msk.bf16.gmra.mrb[88].mxu0 %vm7850_vm5, %v7433_v57  ;;  %vm9423_vm5 = vmmov %vm9422_vm3 }
 0x1aa   : > { %4440 = vmatprep.mubr.bf16.mxu0 %v9331_v33 }
 0x1ac   : > { %v8066_v9 = vpop.f32.mrb[52].mxu1 }
 0x1ad   : > { %v2735_v23 = vpop.f32.mrb[53].mxu1 }
 0x1ae   : > { %v8074_v14 = vpop.f32.mrb[54].mxu1 }
 0x1af   : > { %v2738_v26 = vpop.f32.mrb[55].mxu1 }
 0x1b1   : > { %5806 = vmatmul.mubr.msk.bf16.vlgmr.msra.gmra.mrb[92].mxu0 %vm7022_vm2, %v5661_v15  ;;  %v6530_v15 = vld [vmem:[%s9093_s5 + $0x1cc] ss:$12 sps:$4 sm:$0xff]   ;;  %vm9421_vm2 = vcmp.lt.s32.totalorder %v6981_v43, 7 }
 0x1b2   : > { %4209 = vmatprep.subr.bf16.mxu1 %v6530_v15  ;;  %v6534_v15 = vld [vmem:[%s9093_s5 + $0x1e4] ss:$12 sps:$4 sm:$0xff]   ;;  %vm9425_vm10 = vmmov %vm9421_vm2 }
 0x1b3   : > { %4210 = vmatpush1.bf16.msra.mxu1 %v6528_v45  ;;  %v6532_v45 = vld [vmem:[%s9093_s5 + $0x1e0] ss:$12 sps:$4 sm:$0xff]  }
 0x1b4   : > { %v8078_v57 = vpop.f32.mrb[56].mxu1  ;;  %4211 = vmatprep.subr.bf16.mxu1 %v6534_v15 }
 0x1b5   : > { %v2743_v18 = vpop.f32.mrb[57].mxu1 }
 0x1b6   : > { %v8080_v16 = vpop.f32.mrb[58].mxu1  ;;  %v6531_v18 = vld [vmem:[%s9093_s5 + $0x188] ss:$12 sps:$4 sm:$0xff]  }
 0x1b7   : > { %v2746_v61 = vpop.f32.mrb[59].mxu1  ;;  %6110 = vmatprep.subr.bf16.mxu0 %v6531_v18  ;;  %4212 = vmatpush1.bf16.msra.mxu1 %v6532_v45 }
 0x1b8   : > { %6111 = vmatpush3.bf16.msra.mxu0 %v6531_v18 }
 0x1b9   : > { %6112 = vmatprep.subr.bf16.mxu0 %v6535_v1 }
 0x1bc   : > { %v8082_v10 = vpop.f32.mrb[60].mxu1  ;;  %6113 = vmatpush3.bf16.msra.mxu0 %v6535_v1 }
 0x1bd   : > { %v2751_v11 = vpop.f32.mrb[61].mxu1 }
 0x1be   : > { %v8084_v40 = vpop.f32.mrb[62].mxu1 }
 0x1bf   : > { %v2754_v23 = vpop.f32.mrb[63].mxu1 }
 0x1c4   : > { %v8092_v59 = vpop.f32.mrb[64].mxu1 }
 0x1c5   : > { %v2759_v28 = vpop.f32.mrb[65].mxu1 }
 0x1c6   : > { %v8094_v61 = vpop.f32.mrb[66].mxu1 }
 0x1c7   : > { %v2762_v26 = vpop.f32.mrb[67].mxu1 }
 0x1cc   : > { %v8096_v11 = vpop.f32.mrb[68].mxu1 }
 0x1cd   : > { %v2767_v23 = vpop.f32.mrb[69].mxu1 }
 0x1ce   : > { %v8101_v8 = vpop.f32.mrb[70].mxu1 }
 0x1cf   : > { %v2770_v41 = vpop.f32.mrb[71].mxu1 }
 0x1d4   : > { %v8109_v28 = vpop.f32.mrb[72].mxu1  ;;  %v2361_v26 = vpop.f32.mrb[72].mxu0 }
 0x1d5   : > { %v2775_v47 = vpop.f32.mrb[73].mxu1  ;;  %v2362_v56 = vpop.f32.mrb[73].mxu0 }
 0x1d6   : > { %v8111_v23 = vpop.f32.mrb[74].mxu1  ;;  %v2364_v3 = vpop.f32.mrb[74].mxu0 }
 0x1d7   : > { %v2778_v41 = vpop.f32.mrb[75].mxu1  ;;  %v2365_v18 = vpop.f32.mrb[75].mxu0  ;;  %v6536_v3 = vld [vmem:[%s9093_s5 + $0x1f8] ss:$12 sps:$4 sm:$0xff]  }
 0x1dc   : > { %v2781_v36 = vpop.f32.mrb[76].mxu1  ;;  %v2369_v52 = vpop.f32.mrb[76].mxu0 }
 0x1dd   : > { %v2783_v2 = vpop.f32.mrb[77].mxu1  ;;  %v2370_v30 = vpop.f32.mrb[77].mxu0  ;;  %v6538_v36 = vld [vmem:[%s9093_s5 + $0x1fc] ss:$12 sps:$4 sm:$0xff]  }
 0x1de   : > { %v2784_v33 = vpop.f32.mrb[78].mxu1  ;;  %v2371_v26 = vpop.f32.mrb[78].mxu0  ;;  %4213 = vmatprep.subr.bf16.mxu1 %v6538_v36 }
 0x1df   : > { %v2786_v47 = vpop.f32.mrb[79].mxu1  ;;  %v2372_v56 = vpop.f32.mrb[79].mxu0  ;;  %4214 = vmatpush1.bf16.msra.mxu1 %v6536_v3  ;;  %v6539_v26 = vld [vmem:[%s9093_s5 + $0x1b8] ss:$12 sps:$4 sm:$0xff]  }
 0x1e0   : > { %6114 = vmatprep.subr.bf16.mxu0 %v6539_v26 }
 0x1e1   : > { %6115 = vmatpush3.bf16.msra.mxu0 %v6539_v26 }
 0x1e4   : > { %v6072_v45 = vpop.f32.mrb[80].mxu1  ;;  %v2408_v15 = vpop.f32.mrb[80].mxu0 }
 0x1e5   : > { %v2822_v41 = vpop.f32.mrb[81].mxu1  ;;  %v2410_v52 = vpop.f32.mrb[81].mxu0 }
 0x1e6   : > { %v6073_v30 = vpop.f32.mrb[82].mxu1  ;;  %v2411_v33 = vpop.f32.mrb[82].mxu0  ;;  %v6540_v52 = vld [vmem:[%s9093_s5 + $0x210] ss:$12 sps:$4 sm:$0xff]  }
 0x1e7   : > { %v2824_v2 = vpop.f32.mrb[83].mxu1  ;;  %v2413_v18 = vpop.f32.mrb[83].mxu0  ;;  %v6542_v30 = vld [vmem:[%s9093_s5 + $0x214] ss:$12 sps:$4 sm:$0xff]  }
 0x1e8   : > { %4215 = vmatprep.subr.bf16.mxu1 %v6542_v30 }
 0x1e9   : > { %4216 = vmatpush1.bf16.msra.mxu1 %v6540_v52 }
 0x1ec   : > { %v6076_v1 = vpop.f32.mrb[84].mxu1  ;;  %v2416_v56 = vpop.f32.mrb[4].mxu0 }
 0x1ed   : > { %v2843_v47 = vadd.f32 %v6076_v1, %v7873_v20  ;;  %v2834_v53 = vpop.f32.mrb[85].mxu1  ;;  %v2418_v29 = vpop.f32.mrb[5].mxu0 }
 0x1ee   : > { %v6077_v45 = vpop.f32.mrb[86].mxu1  ;;  %v2420_v15 = vpop.f32.mrb[6].mxu0 }
 0x1ef   : > { %v2846_v36 = vadd.f32 %v6077_v45, %v7883_v50  ;;  %v2837_v41 = vpop.f32.mrb[87].mxu1  ;;  %v2422_v3 = vpop.f32.mrb[7].mxu0 }
 0x1f0   : > { %v8143_v3 = vld [vmem:[%s9091_s3] ss:$0 sm:$0xff] }
 0x1f4   : > { %v6080_v20 = vpop.f32.mrb[88].mxu1  ;;  %v2426_v29 = vpop.f32.mrb[8].mxu0 }
 0x1f5   : > { %v8134_v53 = vadd.f32 %v6080_v20, %v7924_v17  ;;  %v2850_v33 = vpop.f32.mrb[89].mxu1  ;;  %v2428_v2 = vpop.f32.mrb[9].mxu0 }
 0x1f6   : > { %v2851_v50 = vadd.f32 %v2850_v33, %v7903_v27  ;;  %v6081_v18 = vpop.f32.mrb[90].mxu1  ;;  %v2979_v1 = vadd.f32 %v2428_v2, %v2416_v56  ;;  %v2430_v45 = vpop.f32.mrb[10].mxu0  ;;  %v8149_v27 = vld [vmem:[%s9092_s4] ss:$0 sm:$0xff]  ;;  %v6543_v33 = vld [vmem:[%s9093_s5 + $0x1d0] ss:$12 sps:$4 sm:$0xff]  }
 0x1f7   : > { %v8138_v26 = vadd.f32 %v6081_v18, %v7933_v0  ;;  %v2853_v41 = vpop.f32.mrb[91].mxu1  ;;  %v2432_v20 = vpop.f32.mrb[11].mxu0  ;;  %6116 = vmatprep.subr.bf16.mxu0 %v6543_v33 }
 0x1f8   : > { %v2854_v17 = vadd.f32 %v2853_v41, %v7905_v32  ;;  %v3015_v30 = vadd.f32 %v2979_v1, %v2843_v47  ;;  %v2980_v34 = vadd.f32 %v2432_v20, %v2420_v15  ;;  %6117 = vmatpush3.bf16.msra.mxu0 %v6543_v33 }
 0x1f9   : > { %6118 = vmatprep.subr.bf16.mxu0 %v6547_v39 }
 0x1fa   : > { %v3058_v0 = vmul.f32 %v8143_v3, %v3015_v30  ;;  %v3016_v56 = vadd.f32 %v2980_v34, %v2846_v36  ;;  %v6544_v34 = vld [vmem:[%s9093_s5 + $0x228] ss:$12 sps:$4 sm:$0xff]   ;;  %v6546_v36 = vld [vmem:[%s9093_s5 + $0x22c] ss:$12 sps:$4 sm:$0xff]  }
 0x1fb   : > { %4217 = vmatprep.subr.bf16.mxu1 %v6546_v36 }
 0x1fc   : > { %v6084_v52 = vpop.f32.mrb[92].mxu1  ;;  %v3101_v2 = vadd.f32 %v8149_v27, %v3058_v0  ;;  %v3059_v32 = vmul.f32 %v8143_v3, %v3016_v56  ;;  %v2436_v15 = vpop.f32.mrb[12].mxu0  ;;  %4218 = vmatpush1.bf16.msra.mxu1 %v6544_v34  ;;  %6119 = vmatpush3.bf16.msra.mxu0 %v6547_v39 }
 0x1fd   : > { %v8158_v47 = vadd.f32 %v6084_v52, %v7986_v6  ;;  %v2866_v18 = vpop.f32.mrb[93].mxu1  ;;  %v2438_v41 = vpop.f32.mrb[13].mxu0 }
 0x1fe   : > { %v8161_v1 = vadd.f32 %v2866_v18, %v7952_v12  ;;  %v6085_v20 = vpop.f32.mrb[94].mxu1  ;;  %v8169_v30 = vmax.f32 %v3101_v2, 0.0  ;;  %v3102_v6 = vadd.f32 %v8149_v27, %v3059_v32  ;;  %v2981_v0 = vadd.f32 %v2438_v41, %v2426_v29  ;;  %v2440_v12 = vpop.f32.mrb[14].mxu0 }
 0x1ff   : > { %v8173_v56 = vadd.f32 %v6085_v20, %v7995_v24  ;;  %v2869_v52 = vpop.f32.mrb[95].mxu1  ;;  %v2442_v51 = vpop.f32.mrb[15].mxu0 }
 0x200   : > { %9420 = vst [vmem:[#allocation75_spill] sm:$0xff] %v8169_v30  ;;  %v8176_v18 = vadd.f32 %v2869_v52, %v7955_v22  ;;  %v3138_v2 = vmax.f32 %v3102_v6, 0.0  ;;  %v3017_v46 = vadd.f32 %v2981_v0, %v2851_v50  ;;  %v3364_v29 = vrot.slane %v8169_v30, 7  ;;  %v6548_v22 = vld [vmem:[%s9093_s5 + $0x200] ss:$12 sps:$4 sm:$0xff]  }
 0x201   : > { %v9241_v24 = vrot.slane %v8169_v30, 1  ;;  %v2982_v32 = vadd.f32 %v2442_v51, %v2430_v45  ;;  %6120 = vmatprep.subr.bf16.mxu0 %v6548_v22 }
 0x202   : > { %v3365_v33 = vrot.slane %v3138_v2, 7  ;;  %v3473_v41 = vrot.slane %v3138_v2, 1  ;;  %v3060_v20 = vmul.f32 %v8143_v3, %v3017_v46  ;;  %v3172_v36 = vpack.c.bf16 %v3138_v2, %v8169_v30  ;;  %6121 = vmatpush3.bf16.msra.mxu0 %v6548_v22 }
 0x203   : > { %v3018_v6 = vadd.f32 %v2982_v32, %v2854_v17  ;;  %6122 = vmatprep.subr.bf16.mxu0 %v6549_v42 }
 0x204   : > { %v6088_v50 = vpop.f32.mrb[96].mxu1  ;;  %v3538_v51 = vsel %vm9421_vm2, %v9241_v24, %v3473_v41  ;;  %v3103_v45 = vadd.f32 %v8149_v27, %v3060_v20  ;;  %v2446_v0 = vpop.f32.mrb[16].mxu0  ;;  %4038 = vmatprep.mubr.bf16.mxu1 %v3172_v36  ;;  %4446 = vmatprep.mubr.bf16.mxu0 %v3172_v36  ;;  %v3430_v32 = vsel %vm9422_vm3, %v3364_v29, %v3365_v33  ;;  %vm9426_vm2 = vmmov %vm9422_vm3 }
 0x205   : > { %v8194_v34 = vadd.f32 %v6088_v50, %v8022_v31  ;;  %v2882_v52 = vpop.f32.mrb[97].mxu1  ;;  %v3061_v46 = vmul.f32 %v8143_v3, %v3018_v6  ;;  %v2448_v17 = vpop.f32.mrb[17].mxu0  ;;  %v3431_v20 = vsel %vm9423_vm5, %v7993_v13, %v3364_v29  ;;  %vm9427_vm3 = vmmov %vm9426_vm2 }
 0x206   : > { %v8198_v39 = vadd.f32 %v2882_v52, %v8014_v63  ;;  %v6089_v2 = vpop.f32.mrb[98].mxu1  ;;  %v3139_v31 = vmax.f32 %v3103_v45, 0.0  ;;  %v2983_v50 = vadd.f32 %v2448_v17, %v2436_v15  ;;  %v2450_v36 = vpop.f32.mrb[18].mxu0  ;;  %v5665_v6 = vpack.c.bf16 %v3430_v32, %v3431_v20  ;;  %6123 = vmatpush3.bf16.msra.mxu0 %v6549_v42  ;;  %vm9428_vm5 = vmmov %vm9425_vm10 }
 0x207   : > { %v8206_v24 = vadd.f32 %v6089_v2, %v8030_v54  ;;  %v2885_v30 = vpop.f32.mrb[99].mxu1  ;;  %v3104_v63 = vadd.f32 %v8149_v27, %v3061_v46  ;;  %v2452_v58 = vpop.f32.mrb[19].mxu0 }
 0x208   : > { %v8210_v52 = vadd.f32 %v2885_v30, %v8016_v7  ;;  %v3366_v13 = vrot.slane %v3139_v31, 7  ;;  %v3474_v29 = vrot.slane %v3139_v31, 1  ;;  %v3019_v15 = vadd.f32 %v2983_v50, %v8134_v53  ;;  %5666 = vmatmul.mubr.msk.bf16.gmra.mrb[124].mxu1 %vm9424_vm7, %v5665_v6  ;;  %5810 = vmatmul.mubr.msk.bf16.gmra.mrb[96].mxu0 %vm9424_vm7, %v5665_v6 }
 0x209   : > { %v2984_v54 = vadd.f32 %v2452_v58, %v2440_v12  ;;  %v3140_v22 = vmax.f32 %v3104_v63, 0.0  ;;  %v6550_v58 = vld [vmem:[%s9093_s5 + $0x230] ss:$12 sps:$4 sm:$0xff]   ;;  %vm9429_vm7 = vnez %v9286_v48 }
 0x20a   : > { %v3537_v7 = vsel %vm9425_vm10, %v3473_v41, %v3474_v29  ;;  %v3062_v30 = vmul.f32 %v8143_v3, %v3019_v15  ;;  %v3429_v46 = vsel %vm9426_vm2, %v3365_v33, %v3366_v13  ;;  %6124 = vmatprep.subr.bf16.mxu0 %v6550_v58  ;;  %vm9430_vm10 = vmmov %vm9426_vm2 }
 0x20b   : > { %v3020_v45 = vadd.f32 %v2984_v54, %v8138_v26  ;;  %v8229_v53 = vpack.c.bf16 %v3537_v7, %v3538_v51  ;;  %v3367_v35 = vrot.slane %v3140_v22, 7  ;;  %v3475_v12 = vrot.slane %v3140_v22, 1  ;;  %6125 = vmatpush3.bf16.msra.mxu0 %v6550_v58  ;;  %vm9431_vm2 = vmmov %vm9428_vm5 }
 0x20c   : > { %v6092_v17 = vpop.f32.mrb[100].mxu1  ;;  %v3173_v2 = vpack.c.bf16 %v3140_v22, %v3139_v31  ;;  %v3105_v41 = vadd.f32 %v8149_v27, %v3062_v30  ;;  %v2456_v20 = vpop.f32.mrb[20].mxu0 }
 0x20d   : > { %v3063_v32 = vmul.f32 %v8143_v3, %v3020_v45  ;;  %v8234_v26 = vadd.f32 %v6092_v17, %v8044_v25  ;;  %v2898_v33 = vpop.f32.mrb[101].mxu1  ;;  %v2458_v51 = vpop.f32.mrb[21].mxu0  ;;  %v3428_v31 = vsel %vm9427_vm3, %v3366_v13, %v3367_v35  ;;  %v3536_v6 = vsel %vm9428_vm5, %v3474_v29, %v3475_v12  ;;  %vm9432_vm5 = vmmov %vm9431_vm2 }
 0x20e   : > { %v8237_v42 = vadd.f32 %v2898_v33, %v8036_v4  ;;  %4048 = vmatprep.mubr.bf16.mxu1 %v3173_v2  ;;  %4452 = vmatprep.mubr.bf16.mxu0 %v3173_v2  ;;  %v6093_v50 = vpop.f32.mrb[102].mxu1  ;;  %v3141_v63 = vmax.f32 %v3105_v41, 0.0  ;;  %v2985_v15 = vadd.f32 %v2458_v51, %v2446_v0  ;;  %v2460_v22 = vpop.f32.mrb[22].mxu0  ;;  %v5669_v45 = vpack.c.bf16 %v3428_v31, %v3429_v46 }
 0x20f   : > { %v3106_v25 = vadd.f32 %v8149_v27, %v3063_v32  ;;  %v8245_v54 = vadd.f32 %v6093_v50, %v8052_v19  ;;  %v2901_v4 = vpop.f32.mrb[103].mxu1  ;;  %v2462_v30 = vpop.f32.mrb[23].mxu0 }
 0x210   : > { %v8248_v7 = vadd.f32 %v2901_v4, %v8038_v5  ;;  %v3368_v17 = vrot.slane %v3141_v63, 7  ;;  %v3476_v13 = vrot.slane %v3141_v63, 1  ;;  %v3021_v29 = vadd.f32 %v2985_v15, %v8161_v1  ;;  %5670 = vmatmul.mubr.msk.bf16.gmra.mrb[128].mxu1 %vm9429_vm7, %v5669_v45  ;;  %5814 = vmatmul.mubr.msk.bf16.gmra.mrb[100].mxu0 %vm9429_vm7, %v5669_v45 }
 0x211   : > { %v3142_v2 = vmax.f32 %v3106_v25, 0.0  ;;  %v2986_v41 = vadd.f32 %v2462_v30, %v2450_v36  ;;  %vm9433_vm7 = vnez %v9288_v37 }
 0x212   : > { %v3064_v58 = vmul.f32 %v8143_v3, %v3021_v29  ;;  %v3427_v33 = vsel %vm9430_vm10, %v3367_v35, %v3368_v17  ;;  %v3535_v1 = vsel %vm9431_vm2, %v3475_v12, %v3476_v13  ;;  %vm9434_vm10 = vmmov %vm9427_vm3 }
 0x213   : > { %v3369_v19 = vrot.slane %v3142_v2, 7  ;;  %v3477_v0 = vrot.slane %v3142_v2, 1  ;;  %v3174_v5 = vpack.c.bf16 %v3142_v2, %v3141_v63  ;;  %v3022_v32 = vadd.f32 %v2986_v41, %v8176_v18 }
 0x214   : > { %v6096_v46 = vpop.f32.mrb[104].mxu1  ;;  %v3107_v36 = vadd.f32 %v8149_v27, %v3064_v58  ;;  %v2466_v48 = vpop.f32.mrb[24].mxu0  ;;  %v8271_v15 = vpack.c.bf16 %v3535_v1, %v3536_v6 }
 0x215   : > { %v8263_v51 = vadd.f32 %v6096_v46, %v8066_v9  ;;  %v2914_v50 = vpop.f32.mrb[105].mxu1  ;;  %4058 = vmatprep.mubr.bf16.mxu1 %v3174_v5  ;;  %4460 = vmatprep.mubr.bf16.mxu0 %v3174_v5  ;;  %v3426_v31 = vsel %vm9427_vm3, %v3368_v17, %v3369_v19  ;;  %v3065_v18 = vmul.f32 %v8143_v3, %v3022_v32  ;;  %v2468_v35 = vpop.f32.mrb[25].mxu0 }
 0x216   : > { %v8269_v63 = vadd.f32 %v2914_v50, %v8058_v62  ;;  %v6097_v25 = vpop.f32.mrb[106].mxu1  ;;  %v5673_v12 = vpack.c.bf16 %v3426_v31, %v3427_v33  ;;  %v3143_v4 = vmax.f32 %v3107_v36, 0.0  ;;  %v2987_v9 = vadd.f32 %v2468_v35, %v2456_v20  ;;  %v2470_v45 = vpop.f32.mrb[26].mxu0 }
 0x217   : > { %v8274_v30 = vadd.f32 %v6097_v25, %v8074_v14  ;;  %v2917_v2 = vpop.f32.mrb[107].mxu1  ;;  %v3534_v17 = vsel %vm9432_vm5, %v3476_v13, %v3477_v0  ;;  %v3108_v29 = vadd.f32 %v8149_v27, %v3065_v18  ;;  %v2472_v41 = vpop.f32.mrb[27].mxu0  ;;  %vm9435_vm5 = vmmov %vm9431_vm2 }
 0x218   : > { %v8280_v62 = vadd.f32 %v2917_v2, %v8060_v21  ;;  %v3370_v58 = vrot.slane %v3143_v4, 7  ;;  %v3478_v5 = vrot.slane %v3143_v4, 1  ;;  %v3023_v6 = vadd.f32 %v2987_v9, %v8158_v47  ;;  %5674 = vmatmul.mubr.msk.bf16.gmra.mrb[132].mxu1 %vm9433_vm7, %v5673_v12  ;;  %5818 = vmatmul.mubr.msk.bf16.gmra.mrb[104].mxu0 %vm9433_vm7, %v5673_v12 }
 0x219   : > { %v2988_v32 = vadd.f32 %v2472_v41, %v2460_v22  ;;  %v3144_v20 = vmax.f32 %v3108_v29, 0.0  ;;  %vm9436_vm7 = vnez %v9290_v38 }
 0x21a   : > { %v3066_v14 = vmul.f32 %v8143_v3, %v3023_v6  ;;  %v3425_v21 = vsel %vm9434_vm10, %v3369_v19, %v3370_v58  ;;  %v3533_v46 = vsel %vm9431_vm2, %v3477_v0, %v3478_v5  ;;  %vm9437_vm10 = vmmov %vm9427_vm3 }
 0x21b   : > { %v3024_v13 = vadd.f32 %v2988_v32, %v8173_v56  ;;  %v3371_v33 = vrot.slane %v3144_v20, 7  ;;  %v3479_v47 = vrot.slane %v3144_v20, 1  ;;  %v3175_v1 = vpack.c.bf16 %v3144_v20, %v3143_v4 }
 0x21c   : > { %v6100_v22 = vpop.f32.mrb[108].mxu1  ;;  %v8293_v36 = vpack.c.bf16 %v3533_v46, %v3534_v17  ;;  %v3109_v50 = vadd.f32 %v8149_v27, %v3066_v14  ;;  %v2476_v56 = vpop.f32.mrb[28].mxu0 }
 0x21d   : > { %v3067_v37 = vmul.f32 %v8143_v3, %v3024_v13  ;;  %v8298_v31 = vadd.f32 %v6100_v22, %v8082_v10  ;;  %v2930_v18 = vpop.f32.mrb[109].mxu1  ;;  %4068 = vmatprep.mubr.bf16.mxu1 %v3175_v1  ;;  %4468 = vmatprep.mubr.bf16.mxu0 %v3175_v1  ;;  %v2478_v0 = vpop.f32.mrb[29].mxu0  ;;  %v3424_v25 = vsel %vm9427_vm3, %v3370_v58, %v3371_v33 }
 0x21e   : > { %v8301_v19 = vadd.f32 %v2930_v18, %v8078_v57  ;;  %v6101_v35 = vpop.f32.mrb[110].mxu1  ;;  %v3532_v12 = vsel %vm9435_vm5, %v3478_v5, %v3479_v47  ;;  %v3145_v4 = vmax.f32 %v3109_v50, 0.0  ;;  %v2989_v10 = vadd.f32 %v2478_v0, %v2466_v48  ;;  %v2480_v17 = vpop.f32.mrb[30].mxu0  ;;  %vm9438_vm5 = vmmov %vm9431_vm2 }
 0x21f   : > { %v3110_v9 = vadd.f32 %v8149_v27, %v3067_v37  ;;  %v8309_v2 = vadd.f32 %v6101_v35, %v8084_v40  ;;  %v2933_v57 = vpop.f32.mrb[111].mxu1  ;;  %v2482_v41 = vpop.f32.mrb[31].mxu0  ;;  %v5677_v6 = vpack.c.bf16 %v3424_v25, %v3425_v21 }
 0x220   : > { %v8312_v29 = vadd.f32 %v2933_v57, %v8080_v16  ;;  %v3372_v32 = vrot.slane %v3145_v4, 7  ;;  %v3480_v20 = vrot.slane %v3145_v4, 1  ;;  %v3025_v14 = vadd.f32 %v2989_v10, %v8198_v39 }
 0x221   : > { %v3146_v58 = vmax.f32 %v3110_v9, 0.0  ;;  %v2990_v5 = vadd.f32 %v2482_v41, %v2470_v45  ;;  %5678 = vmatmul.mubr.msk.bf16.gmra.mrb[136].mxu1 %vm9436_vm7, %v5677_v6  ;;  %5822 = vmatmul.mubr.msk.bf16.gmra.mrb[108].mxu0 %vm9436_vm7, %v5677_v6  ;;  %vm9439_vm7 = vnez %v9292_v49 }
 0x222   : > { %v3068_v13 = vmul.f32 %v8143_v3, %v3025_v14  ;;  %v3423_v22 = vsel %vm9437_vm10, %v3371_v33, %v3372_v32  ;;  %v3531_v39 = vsel %vm9431_vm2, %v3479_v47, %v3480_v20  ;;  %vm9440_vm10 = vmmov %vm9427_vm3 }
 0x223   : > { %v3373_v40 = vrot.slane %v3146_v58, 7  ;;  %v3481_v48 = vrot.slane %v3146_v58, 1  ;;  %v3176_v16 = vpack.c.bf16 %v3146_v58, %v3145_v4  ;;  %v3026_v46 = vadd.f32 %v2990_v5, %v8210_v52 }
 0x224   : > { %v6104_v21 = vpop.f32.mrb[112].mxu1  ;;  %v3111_v45 = vadd.f32 %v8149_v27, %v3068_v13  ;;  %v2486_v38 = vpop.f32.mrb[32].mxu0  ;;  %v8335_v35 = vpack.c.bf16 %v3531_v39, %v3532_v12 }
 0x225   : > { %v8327_v1 = vadd.f32 %v6104_v21, %v8096_v11  ;;  %v2946_v50 = vpop.f32.mrb[113].mxu1  ;;  %4078 = vmatprep.mubr.bf16.mxu1 %v3176_v16  ;;  %4476 = vmatprep.mubr.bf16.mxu0 %v3176_v16  ;;  %v3422_v37 = vsel %vm9427_vm3, %v3372_v32, %v3373_v40  ;;  %v3069_v52 = vmul.f32 %v8143_v3, %v3026_v46  ;;  %v2488_v33 = vpop.f32.mrb[33].mxu0 }
 0x226   : > { %v8333_v18 = vadd.f32 %v2946_v50, %v8092_v59  ;;  %v6105_v0 = vpop.f32.mrb[114].mxu1  ;;  %v5681_v47 = vpack.c.bf16 %v3422_v37, %v3423_v22  ;;  %v3147_v25 = vmax.f32 %v3111_v45, 0.0  ;;  %v2991_v11 = vadd.f32 %v2488_v33, %v2476_v56  ;;  %v2490_v9 = vpop.f32.mrb[34].mxu0 }
 0x227   : > { %v8338_v4 = vadd.f32 %v6105_v0, %v8101_v8  ;;  %v2949_v10 = vpop.f32.mrb[115].mxu1  ;;  %v3530_v57 = vsel %vm9438_vm5, %v3480_v20, %v3481_v48  ;;  %v3112_v41 = vadd.f32 %v8149_v27, %v3069_v52  ;;  %v2492_v6 = vpop.f32.mrb[35].mxu0  ;;  %vm9441_vm5 = vmmov %vm9431_vm2 }
 0x228   : > { %v8344_v59 = vadd.f32 %v2949_v10, %v8094_v61  ;;  %v3374_v32 = vrot.slane %v3147_v25, 7  ;;  %v3482_v58 = vrot.slane %v3147_v25, 1  ;;  %v3027_v12 = vadd.f32 %v2991_v11, %v8194_v34 }
 0x229   : > { %v2992_v14 = vadd.f32 %v2492_v6, %v2480_v17  ;;  %v3148_v56 = vmax.f32 %v3112_v41, 0.0  ;;  %5682 = vmatmul.mubr.msk.bf16.gmra.mrb[140].mxu1 %vm9439_vm7, %v5681_v47  ;;  %5826 = vmatmul.mubr.msk.bf16.gmra.mrb[112].mxu0 %vm9439_vm7, %v5681_v47  ;;  %vm9442_vm7 = vnez %v9294_v60 }
 0x22a   : > { %v3070_v8 = vmul.f32 %v8143_v3, %v3027_v12  ;;  %v3421_v61 = vsel %vm9440_vm10, %v3373_v40, %v3374_v32  ;;  %v3529_v5 = vsel %vm9431_vm2, %v3481_v48, %v3482_v58  ;;  %vm9443_vm10 = vmmov %vm9427_vm3 }
 0x22b   : > { %v3028_v20 = vadd.f32 %v2992_v14, %v8206_v24  ;;  %v3375_v13 = vrot.slane %v3148_v56, 7  ;;  %v3483_v34 = vrot.slane %v3148_v56, 1  ;;  %v3177_v16 = vpack.c.bf16 %v3148_v56, %v3147_v25 }
 0x22c   : > { %v6108_v17 = vpop.f32.mrb[116].mxu1  ;;  %v8357_v46 = vpack.c.bf16 %v3529_v5, %v3530_v57  ;;  %v3113_v21 = vadd.f32 %v8149_v27, %v3070_v8  ;;  %v2496_v22 = vpop.f32.mrb[36].mxu0 }
 0x22d   : > { %v3071_v49 = vmul.f32 %v8143_v3, %v3028_v20  ;;  %v2962_v39 = vpop.f32.mrb[117].mxu1  ;;  %4088 = vmatprep.mubr.bf16.mxu1 %v3177_v16  ;;  %4484 = vmatprep.mubr.bf16.mxu0 %v3177_v16  ;;  %v2498_v40 = vpop.f32.mrb[37].mxu0  ;;  %v3420_v48 = vsel %vm9427_vm3, %v3374_v32, %v3375_v13  ;;  %v3528_v50 = vsel %vm9441_vm5, %v3482_v58, %v3483_v34  ;;  %vm9444_vm5 = vmmov %vm9431_vm2 }
 0x22e   : > { %v8362_v24 = vadd.f32 %v2962_v39, %v8109_v28  ;;  %v6109_v45 = vpop.f32.mrb[118].mxu1  ;;  %v3149_v37 = vmax.f32 %v3113_v21, 0.0  ;;  %v2993_v33 = vadd.f32 %v2498_v40, %v2486_v38  ;;  %v2500_v0 = vpop.f32.mrb[38].mxu0  ;;  %v5685_v25 = vpack.c.bf16 %v3420_v48, %v3421_v61 }
 0x22f   : > { %v3114_v52 = vadd.f32 %v8149_v27, %v3071_v49  ;;  %v2965_v47 = vpop.f32.mrb[119].mxu1  ;;  %v2502_v11 = vpop.f32.mrb[39].mxu0 }
 0x230   : > { %v8370_v28 = vadd.f32 %v2965_v47, %v8111_v23  ;;  %v3376_v10 = vrot.slane %v3149_v37, 7  ;;  %v3484_v57 = vrot.slane %v3149_v37, 1  ;;  %v3029_v6 = vadd.f32 %v2993_v33, %v8237_v42 }
 0x231   : > { %v3150_v41 = vmax.f32 %v3114_v52, 0.0  ;;  %v2994_v32 = vadd.f32 %v2502_v11, %v2490_v9  ;;  %5686 = vmatmul.mubr.msk.bf16.gmra.mrb[144].mxu1 %vm9442_vm7, %v5685_v25  ;;  %5830 = vmatmul.mubr.msk.bf16.gmra.mrb[116].mxu0 %vm9442_vm7, %v5685_v25  ;;  %vm9445_vm7 = vnez %v9296_v44 }
 0x232   : > { %v3072_v12 = vmul.f32 %v8143_v3, %v3029_v6  ;;  %v3419_v56 = vsel %vm9443_vm10, %v3375_v13, %v3376_v10  ;;  %v3527_v42 = vsel %vm9431_vm2, %v3483_v34, %v3484_v57  ;;  %vm9446_vm10 = vmmov %vm9427_vm3 }
 0x233   : > { %v3377_v38 = vrot.slane %v3150_v41, 7  ;;  %v3485_v58 = vrot.slane %v3150_v41, 1  ;;  %v3178_v14 = vpack.c.bf16 %v3150_v41, %v3149_v37  ;;  %v3030_v23 = vadd.f32 %v2994_v32, %v8248_v7 }
 0x234   : > { %v3115_v9 = vadd.f32 %v8149_v27, %v3072_v12  ;;  %v2506_v8 = vpop.f32.mrb[40].mxu0  ;;  %v8386_v20 = vpack.c.bf16 %v3527_v42, %v3528_v50 }
 0x235   : > { %4098 = vmatprep.mubr.bf16.mxu1 %v3178_v14  ;;  %4492 = vmatprep.mubr.bf16.mxu0 %v3178_v14  ;;  %v3418_v60 = vsel %vm9427_vm3, %v3376_v10, %v3377_v38  ;;  %v3073_v61 = vmul.f32 %v8143_v3, %v3030_v23  ;;  %v2508_v5 = vpop.f32.mrb[41].mxu0  ;;  %v3526_v13 = vsel %vm9444_vm5, %v3484_v57, %v3485_v58  ;;  %vm9447_vm5 = vmmov %vm9431_vm2 }
 0x236   : > { %v5689_v7 = vpack.c.bf16 %v3418_v60, %v3419_v56  ;;  %v3151_v17 = vmax.f32 %v3115_v9, 0.0  ;;  %v2995_v16 = vadd.f32 %v2508_v5, %v2496_v22  ;;  %v2510_v34 = vpop.f32.mrb[42].mxu0 }
 0x237   : > { %v3116_v21 = vadd.f32 %v8149_v27, %v3073_v61  ;;  %v2512_v49 = vpop.f32.mrb[43].mxu0 }
 0x238   : > { %v3378_v39 = vrot.slane %v3151_v17, 7  ;;  %v3486_v40 = vrot.slane %v3151_v17, 1  ;;  %v3031_v45 = vadd.f32 %v2995_v16, %v8234_v26  ;;  %v2996_v48 = vadd.f32 %v2512_v49, %v2500_v0 }
 0x239   : > { %v3152_v50 = vmax.f32 %v3116_v21, 0.0  ;;  %5690 = vmatmul.mubr.msk.bf16.gmra.mrb[148].mxu1 %vm9445_vm7, %v5689_v7  ;;  %5834 = vmatmul.mubr.msk.bf16.gmra.mrb[120].mxu0 %vm9445_vm7, %v5689_v7  ;;  %vm9448_vm7 = vnez %v9298_v55 }
 0x23a   : > { %v3074_v37 = vmul.f32 %v8143_v3, %v3031_v45  ;;  %v3032_v22 = vadd.f32 %v2996_v48, %v8245_v54  ;;  %v3417_v52 = vsel %vm9446_vm10, %v3377_v38, %v3378_v39  ;;  %v3525_v33 = vsel %vm9431_vm2, %v3485_v58, %v3486_v40  ;;  %vm9449_vm10 = vmmov %vm9427_vm3 }
 0x23b   : > { %v3379_v47 = vrot.slane %v3152_v50, 7  ;;  %v3487_v26 = vrot.slane %v3152_v50, 1  ;;  %v3179_v0 = vpack.c.bf16 %v3152_v50, %v3151_v17  ;;  %v8403_v25 = vpack.c.bf16 %v3525_v33, %v3526_v13 }
 0x23c   : > { %v3117_v11 = vadd.f32 %v8149_v27, %v3074_v37  ;;  %v3075_v44 = vmul.f32 %v8143_v3, %v3032_v22  ;;  %v2516_v10 = vpop.f32.mrb[44].mxu0 }
 0x23d   : > { %4108 = vmatprep.mubr.bf16.mxu1 %v3179_v0  ;;  %4500 = vmatprep.mubr.bf16.mxu0 %v3179_v0  ;;  %v2518_v57 = vpop.f32.mrb[45].mxu0  ;;  %v3416_v54 = vsel %vm9427_vm3, %v3378_v39, %v3379_v47  ;;  %v3524_v41 = vsel %vm9447_vm5, %v3486_v40, %v3487_v26  ;;  %vm9450_vm5 = vmmov %vm9431_vm2 }
 0x23e   : > { %v3153_v6 = vmax.f32 %v3117_v11, 0.0  ;;  %v3118_v32 = vadd.f32 %v8149_v27, %v3075_v44  ;;  %v2997_v38 = vadd.f32 %v2518_v57, %v2506_v8  ;;  %v2520_v58 = vpop.f32.mrb[46].mxu0  ;;  %v5693_v12 = vpack.c.bf16 %v3416_v54, %v3417_v52  ;;  %v9451_v11 = vld [vmem:[#allocation44_spill] sm:$0xff] }
 0x23f   : > { %v2522_v14 = vpop.f32.mrb[47].mxu0 }
 0x240   : > { %v3380_v23 = vrot.slane %v3153_v6, 7  ;;  %v3488_v56 = vrot.slane %v3153_v6, 1  ;;  %v3154_v42 = vmax.f32 %v3118_v32, 0.0  ;;  %v3033_v9 = vadd.f32 %v2997_v38, %v8269_v63 }
 0x241   : > { %v2998_v60 = vadd.f32 %v2522_v14, %v2510_v34  ;;  %5694 = vmatmul.mubr.msk.bf16.gmra.mrb[152].mxu1 %vm9448_vm7, %v5693_v12  ;;  %5838 = vmatmul.mubr.msk.bf16.gmra.mrb[124].mxu0 %vm9448_vm7, %v5693_v12  ;;  %vm9452_vm7 = vnez %v9451_v11 }
 0x242   : > { %v3381_v61 = vrot.slane %v3154_v42, 7  ;;  %v3489_v5 = vrot.slane %v3154_v42, 1  ;;  %v3076_v7 = vmul.f32 %v8143_v3, %v3033_v9  ;;  %v3180_v8 = vpack.c.bf16 %v3154_v42, %v3153_v6 }
 0x243   : > { %v3034_v13 = vadd.f32 %v2998_v60, %v8280_v62  ;;  %v3415_v17 = vsel %vm9449_vm10, %v3379_v47, %v3380_v23  ;;  %v3523_v63 = vsel %vm9431_vm2, %v3487_v26, %v3488_v56  ;;  %vm9453_vm10 = vmmov %vm9427_vm3 }
 0x244   : > { %v3119_v16 = vadd.f32 %v8149_v27, %v3076_v7  ;;  %v2526_v34 = vpop.f32.mrb[48].mxu0  ;;  %4118 = vmatprep.mubr.bf16.mxu1 %v3180_v8  ;;  %4508 = vmatprep.mubr.bf16.mxu0 %v3180_v8  ;;  %v3414_v55 = vsel %vm9427_vm3, %v3380_v23, %v3381_v61  ;;  %v8426_v21 = vpack.c.bf16 %v3523_v63, %v3524_v41 }
 0x245   : > { %v3077_v49 = vmul.f32 %v8143_v3, %v3034_v13  ;;  %v2528_v39 = vpop.f32.mrb[49].mxu0  ;;  %v5697_v62 = vpack.c.bf16 %v3414_v55, %v3415_v17  ;;  %v3522_v40 = vsel %vm9450_vm5, %v3488_v56, %v3489_v5  ;;  %vm9454_vm5 = vmmov %vm9431_vm2 }
 0x246   : > { %v3155_v45 = vmax.f32 %v3119_v16, 0.0  ;;  %v2999_v48 = vadd.f32 %v2528_v39, %v2516_v10  ;;  %v2530_v50 = vpop.f32.mrb[50].mxu0  ;;  %v9455_v16 = vld [vmem:[#allocation45_spill] sm:$0xff] }
 0x247   : > { %v3120_v37 = vadd.f32 %v8149_v27, %v3077_v49  ;;  %v2532_v22 = vpop.f32.mrb[51].mxu0 }
 0x248   : > { %v3382_v52 = vrot.slane %v3155_v45, 7  ;;  %v3490_v33 = vrot.slane %v3155_v45, 1  ;;  %v3035_v47 = vadd.f32 %v2999_v48, %v8263_v51  ;;  %v3000_v26 = vadd.f32 %v2532_v22, %v2520_v58 }
 0x249   : > { %v3156_v0 = vmax.f32 %v3120_v37, 0.0  ;;  %5698 = vmatmul.mubr.msk.bf16.gmra.mrb[156].mxu1 %vm9452_vm7, %v5697_v62  ;;  %5842 = vmatmul.mubr.msk.bf16.gmra.mrb[128].mxu0 %vm9452_vm7, %v5697_v62  ;;  %vm9456_vm7 = vnez %v9455_v16 }
 0x24a   : > { %v3078_v44 = vmul.f32 %v8143_v3, %v3035_v47  ;;  %v3036_v10 = vadd.f32 %v3000_v26, %v8274_v30  ;;  %v3413_v57 = vsel %vm9453_vm10, %v3381_v61, %v3382_v52  ;;  %v3521_v54 = vsel %vm9431_vm2, %v3489_v5, %v3490_v33  ;;  %vm9457_vm10 = vmmov %vm9427_vm3 }
 0x24b   : > { %v3383_v41 = vrot.slane %v3156_v0, 7  ;;  %v3491_v51 = vrot.slane %v3156_v0, 1  ;;  %v3181_v6 = vpack.c.bf16 %v3156_v0, %v3155_v45  ;;  %v8443_v32 = vpack.c.bf16 %v3521_v54, %v3522_v40 }
 0x24c   : > { %v3121_v38 = vadd.f32 %v8149_v27, %v3078_v44  ;;  %v3079_v58 = vmul.f32 %v8143_v3, %v3036_v10  ;;  %v2536_v12 = vpop.f32.mrb[52].mxu0 }
 0x24d   : > { %4128 = vmatprep.mubr.bf16.mxu1 %v3181_v6  ;;  %4516 = vmatprep.mubr.bf16.mxu0 %v3181_v6  ;;  %v2538_v14 = vpop.f32.mrb[53].mxu0  ;;  %v3412_v30 = vsel %vm9427_vm3, %v3382_v52, %v3383_v41  ;;  %v3520_v23 = vsel %vm9454_vm5, %v3490_v33, %v3491_v51  ;;  %vm9458_vm5 = vmmov %vm9431_vm2  ;;  %v9459_v6 = vld [vmem:[#allocation46_spill] sm:$0xff] }
 0x24e   : > { %v3157_v56 = vmax.f32 %v3121_v38, 0.0  ;;  %v3122_v42 = vadd.f32 %v8149_v27, %v3079_v58  ;;  %v3001_v9 = vadd.f32 %v2538_v14, %v2526_v34  ;;  %v2540_v60 = vpop.f32.mrb[54].mxu0  ;;  %v5701_v61 = vpack.c.bf16 %v3412_v30, %v3413_v57 }
 0x24f   : > { %v2542_v5 = vpop.f32.mrb[55].mxu0 }
 0x250   : > { %v3384_v7 = vrot.slane %v3157_v56, 7  ;;  %v3492_v8 = vrot.slane %v3157_v56, 1  ;;  %v3158_v13 = vmax.f32 %v3122_v42, 0.0  ;;  %v3037_v17 = vadd.f32 %v3001_v9, %v8301_v19 }
 0x251   : > { %v3002_v63 = vadd.f32 %v2542_v5, %v2530_v50  ;;  %5702 = vmatmul.mubr.msk.bf16.gmra.mrb[160].mxu1 %vm9456_vm7, %v5701_v61  ;;  %5846 = vmatmul.mubr.msk.bf16.gmra.mrb[132].mxu0 %vm9456_vm7, %v5701_v61  ;;  %vm9460_vm7 = vnez %v9459_v6 }
 0x252   : > { %v3385_v55 = vrot.slane %v3158_v13, 7  ;;  %v3493_v49 = vrot.slane %v3158_v13, 1  ;;  %v3080_v39 = vmul.f32 %v8143_v3, %v3037_v17  ;;  %v3182_v34 = vpack.c.bf16 %v3158_v13, %v3157_v56 }
 0x253   : > { %v3038_v62 = vadd.f32 %v3002_v63, %v8312_v29  ;;  %v3411_v40 = vsel %vm9457_vm10, %v3383_v41, %v3384_v7  ;;  %v3519_v19 = vsel %vm9431_vm2, %v3491_v51, %v3492_v8  ;;  %vm9461_vm10 = vmmov %vm9427_vm3 }
 0x254   : > { %v3123_v45 = vadd.f32 %v8149_v27, %v3080_v39  ;;  %v2546_v48 = vpop.f32.mrb[56].mxu0  ;;  %4138 = vmatprep.mubr.bf16.mxu1 %v3182_v34  ;;  %4524 = vmatprep.mubr.bf16.mxu0 %v3182_v34  ;;  %v3410_v50 = vsel %vm9427_vm3, %v3384_v7, %v3385_v55  ;;  %v8466_v37 = vpack.c.bf16 %v3519_v19, %v3520_v23 }
 0x255   : > { %v3081_v22 = vmul.f32 %v8143_v3, %v3038_v62  ;;  %v2548_v52 = vpop.f32.mrb[57].mxu0  ;;  %v5705_v29 = vpack.c.bf16 %v3410_v50, %v3411_v40  ;;  %v3518_v33 = vsel %vm9458_vm5, %v3492_v8, %v3493_v49  ;;  %vm9462_vm5 = vmmov %vm9431_vm2  ;;  %v9463_v40 = vld [vmem:[#allocation47_spill] sm:$0xff] }
 0x256   : > { %v3159_v47 = vmax.f32 %v3123_v45, 0.0  ;;  %v3003_v26 = vadd.f32 %v2548_v52, %v2536_v12  ;;  %v2550_v0 = vpop.f32.mrb[58].mxu0 }
 0x257   : > { %v3124_v11 = vadd.f32 %v8149_v27, %v3081_v22  ;;  %v2552_v44 = vpop.f32.mrb[59].mxu0 }
 0x258   : > { %v3386_v10 = vrot.slane %v3159_v47, 7  ;;  %v3494_v57 = vrot.slane %v3159_v47, 1  ;;  %v3039_v54 = vadd.f32 %v3003_v26, %v8298_v31  ;;  %v3004_v41 = vadd.f32 %v2552_v44, %v2540_v60 }
 0x259   : > { %v3160_v51 = vmax.f32 %v3124_v11, 0.0  ;;  %5706 = vmatmul.mubr.msk.bf16.gmra.mrb[164].mxu1 %vm9460_vm7, %v5705_v29  ;;  %5850 = vmatmul.mubr.msk.bf16.gmra.mrb[136].mxu0 %vm9460_vm7, %v5705_v29  ;;  %vm9464_vm7 = vnez %v9463_v40 }
 0x25a   : > { %v3082_v38 = vmul.f32 %v8143_v3, %v3039_v54  ;;  %v3040_v58 = vadd.f32 %v3004_v41, %v8309_v2  ;;  %v3409_v12 = vsel %vm9461_vm10, %v3385_v55, %v3386_v10  ;;  %v3517_v14 = vsel %vm9431_vm2, %v3493_v49, %v3494_v57  ;;  %vm9465_vm10 = vmmov %vm9427_vm3 }
 0x25b   : > { %v3387_v30 = vrot.slane %v3160_v51, 7  ;;  %v3495_v31 = vrot.slane %v3160_v51, 1  ;;  %v3183_v23 = vpack.c.bf16 %v3160_v51, %v3159_v47  ;;  %v8483_v56 = vpack.c.bf16 %v3517_v14, %v3518_v33 }
 0x25c   : > { %v3125_v42 = vadd.f32 %v8149_v27, %v3082_v38  ;;  %v3083_v9 = vmul.f32 %v8143_v3, %v3040_v58  ;;  %v2556_v60 = vpop.f32.mrb[60].mxu0 }
 0x25d   : > { %4148 = vmatprep.mubr.bf16.mxu1 %v3183_v23  ;;  %4532 = vmatprep.mubr.bf16.mxu0 %v3183_v23  ;;  %v2558_v61 = vpop.f32.mrb[61].mxu0  ;;  %v3408_v2 = vsel %vm9427_vm3, %v3386_v10, %v3387_v30  ;;  %v3516_v5 = vsel %vm9462_vm5, %v3494_v57, %v3495_v31  ;;  %vm9466_vm5 = vmmov %vm9431_vm2 }
 0x25e   : > { %v3161_v7 = vmax.f32 %v3125_v42, 0.0  ;;  %v3126_v8 = vadd.f32 %v8149_v27, %v3083_v9  ;;  %v3005_v13 = vadd.f32 %v2558_v61, %v2546_v48  ;;  %v2560_v17 = vpop.f32.mrb[62].mxu0  ;;  %v5709_v63 = vpack.c.bf16 %v3408_v2, %v3409_v12 }
 0x25f   : > { %v2562_v16 = vpop.f32.mrb[63].mxu0 }
 0x260   : > { %v3388_v55 = vrot.slane %v3161_v7, 7  ;;  %v3496_v49 = vrot.slane %v3161_v7, 1  ;;  %v3162_v39 = vmax.f32 %v3126_v8, 0.0  ;;  %v3041_v34 = vadd.f32 %v3005_v13, %v8333_v18 }
 0x261   : > { %v3006_v62 = vadd.f32 %v2562_v16, %v2550_v0  ;;  %5710 = vmatmul.mubr.msk.bf16.gmra.mrb[168].mxu1 %vm9464_vm7, %v5709_v63  ;;  %5854 = vmatmul.mubr.msk.bf16.gmra.mrb[140].mxu0 %vm9464_vm7, %v5709_v63 }
 0x262   : > { %v3389_v19 = vrot.slane %v3162_v39, 7  ;;  %v3497_v45 = vrot.slane %v3162_v39, 1  ;;  %v3084_v50 = vmul.f32 %v8143_v3, %v3041_v34  ;;  %v3184_v48 = vpack.c.bf16 %v3162_v39, %v3161_v7 }
 0x263   : > { %v3042_v22 = vadd.f32 %v3006_v62, %v8344_v59  ;;  %v3407_v52 = vsel %vm9465_vm10, %v3387_v30, %v3388_v55  ;;  %v3515_v18 = vsel %vm9431_vm2, %v3495_v31, %v3496_v49  ;;  %v9467_v30 = vld [vmem:[#allocation48_spill] sm:$0xff]  ;;  %vm9469_vm10 = vmmov %vm9427_vm3 }
 0x264   : > { %v3127_v29 = vadd.f32 %v8149_v27, %v3084_v50  ;;  %v2566_v33 = vpop.f32.mrb[64].mxu0  ;;  %4158 = vmatprep.mubr.bf16.mxu1 %v3184_v48  ;;  %4540 = vmatprep.mubr.bf16.mxu0 %v3184_v48  ;;  %v3406_v47 = vsel %vm9427_vm3, %v3388_v55, %v3389_v19  ;;  %v8506_v26 = vpack.c.bf16 %v3515_v18, %v3516_v5  ;;  %v9471_v48 = vld [vmem:[#allocation49_spill] sm:$0xff] }
 0x265   : > { %v3085_v0 = vmul.f32 %v8143_v3, %v3042_v22  ;;  %v2568_v11 = vpop.f32.mrb[65].mxu0  ;;  %v5713_v59 = vpack.c.bf16 %v3406_v47, %v3407_v52  ;;  %v3514_v44 = vsel %vm9466_vm5, %v3496_v49, %v3497_v45  ;;  %vm9468_vm7 = vnez %v9467_v30  ;;  %vm9470_vm5 = vmmov %vm9431_vm2  ;;  %v9475_v30 = vld [vmem:[#allocation50_spill] sm:$0xff] }
 0x266   : > { %v3163_v10 = vmax.f32 %v3127_v29, 0.0  ;;  %v3007_v57 = vadd.f32 %v2568_v11, %v2556_v60  ;;  %v2570_v54 = vpop.f32.mrb[66].mxu0 }
 0x267   : > { %v3128_v41 = vadd.f32 %v8149_v27, %v3085_v0  ;;  %v2572_v51 = vpop.f32.mrb[67].mxu0 }
 0x268   : > { %v3390_v6 = vrot.slane %v3163_v10, 7  ;;  %v3498_v38 = vrot.slane %v3163_v10, 1  ;;  %v3043_v58 = vadd.f32 %v3007_v57, %v8327_v1  ;;  %v3008_v12 = vadd.f32 %v2572_v51, %v2560_v17  ;;  %v6552_v51 = vld [vmem:[%s9092_s4] ss:$0 sm:$0xff] }
 0x269   : > { %v3164_v14 = vmax.f32 %v3128_v41, 0.0  ;;  %5714 = vmatmul.mubr.msk.bf16.gmra.mrb[172].mxu1 %vm9468_vm7, %v5713_v59  ;;  %5858 = vmatmul.mubr.msk.bf16.gmra.mrb[144].mxu0 %vm9468_vm7, %v5713_v59  ;;  %vm9472_vm7 = vnez %v9471_v48 }
 0x26a   : > { %v3086_v31 = vmul.f32 %v8143_v3, %v3043_v58  ;;  %v3044_v23 = vadd.f32 %v3008_v12, %v8338_v4  ;;  %v3405_v42 = vsel %vm9469_vm10, %v3389_v19, %v3390_v6  ;;  %v3513_v9 = vsel %vm9431_vm2, %v3497_v45, %v3498_v38  ;;  %vm9473_vm10 = vmmov %vm9427_vm3 }
 0x26b   : > { %v3391_v60 = vrot.slane %v3164_v14, 7  ;;  %v3499_v1 = vrot.slane %v3164_v14, 1  ;;  %v3185_v61 = vpack.c.bf16 %v3164_v14, %v3163_v10  ;;  %v8523_v2 = vpack.c.bf16 %v3513_v9, %v3514_v44 }
 0x26c   : > { %v3129_v5 = vadd.f32 %v8149_v27, %v3086_v31  ;;  %v3087_v7 = vmul.f32 %v8143_v3, %v3044_v23  ;;  %v2576_v8 = vpop.f32.mrb[68].mxu0  ;;  %v9478_v23 = vld [vmem:[#allocation71_spill] sm:$0xff] }
 0x26d   : > { %4168 = vmatprep.mubr.bf16.mxu1 %v3185_v61  ;;  %4548 = vmatprep.mubr.bf16.mxu0 %v3185_v61  ;;  %v2578_v13 = vpop.f32.mrb[69].mxu0  ;;  %v3404_v4 = vsel %vm9427_vm3, %v3390_v6, %v3391_v60  ;;  %v3512_v17 = vsel %vm9470_vm5, %v3498_v38, %v3499_v1  ;;  %vm9474_vm5 = vmmov %vm9431_vm2 }
 0x26e   : > { %v3165_v63 = vmax.f32 %v3129_v5, 0.0  ;;  %v3130_v16 = vadd.f32 %v8149_v27, %v3087_v7  ;;  %v3009_v55 = vadd.f32 %v2578_v13, %v2566_v33  ;;  %v2580_v49 = vpop.f32.mrb[70].mxu0  ;;  %v5717_v39 = vpack.c.bf16 %v3404_v4, %v3405_v42 }
 0x26f   : > { %v2582_v34 = vpop.f32.mrb[71].mxu0  ;;  %v8563_v42 = vrot.slane %v9478_v23, 1 }
 0x270   : > { %v3392_v62 = vrot.slane %v3165_v63, 7  ;;  %v3500_v40 = vrot.slane %v3165_v63, 1  ;;  %v3166_v19 = vmax.f32 %v3130_v16, 0.0  ;;  %v3045_v45 = vadd.f32 %v3009_v55, %v8362_v24 }
 0x271   : > { %v3010_v50 = vadd.f32 %v2582_v34, %v2570_v54  ;;  %5718 = vmatmul.mubr.msk.bf16.gmra.mrb[176].mxu1 %vm9472_vm7, %v5717_v39  ;;  %5862 = vmatmul.mubr.msk.bf16.gmra.mrb[148].mxu0 %vm9472_vm7, %v5717_v39  ;;  %vm9476_vm7 = vnez %v9475_v30  ;;  %v9481_v39 = vld [vmem:[#allocation51_spill] sm:$0xff]  ;;  %v9483_v34 = vld [vmem:[#allocation72_spill] sm:$0xff] }
 0x272   : > { %v3393_v22 = vrot.slane %v3166_v19, 7  ;;  %v3501_v52 = vrot.slane %v3166_v19, 1  ;;  %v3088_v18 = vmul.f32 %v8143_v3, %v3045_v45  ;;  %v3186_v29 = vpack.c.bf16 %v3166_v19, %v3165_v63  ;;  %v6551_v3 = vld [vmem:[%s9091_s3] ss:$0 sm:$0xff]  ;;  %v9485_v19 = vld [vmem:[#allocation73_spill] sm:$0xff] }
 0x273   : > { %v3046_v33 = vadd.f32 %v3010_v50, %v8370_v28  ;;  %v3403_v47 = vsel %vm9473_vm10, %v3391_v60, %v3392_v62  ;;  %v3511_v24 = vsel %vm9431_vm2, %v3499_v1, %v3500_v40  ;;  %vm9477_vm10 = vmmov %vm9427_vm3 }
 0x274   : > { %v3131_v0 = vadd.f32 %v8149_v27, %v3088_v18  ;;  %4178 = vmatprep.mubr.bf16.mxu1 %v3186_v29  ;;  %4556 = vmatprep.mubr.bf16.mxu0 %v3186_v29  ;;  %v3402_v11 = vsel %vm9427_vm3, %v3392_v62, %v3393_v22  ;;  %v8546_v59 = vpack.c.bf16 %v3511_v24, %v3512_v17  ;;  %v2586_v44 = vpop.f32.mrb[84].mxu0  ;;  %v3471_v62 = vrot.slane %v9483_v34, 1 }
 0x275   : > { %v3089_v28 = vmul.f32 %v6551_v3, %v3046_v33  ;;  %v5721_v10 = vpack.c.bf16 %v3402_v11, %v3403_v47  ;;  %v3510_v57 = vsel %vm9474_vm5, %v3500_v40, %v3501_v52  ;;  %v2587_v54 = vpop.f32.mrb[85].mxu0  ;;  %vm9479_vm5 = vmmov %vm9431_vm2  ;;  %v9484_v40 = vmov 0   ;;  %v9491_v47 = vld [vmem:[#allocation74_spill] sm:$0xff]  ;;  %v9492_v44 = vld [vmem:[#allocation52_spill] sm:$0xff] }
 0x276   : > { %v3167_v41 = vmax.f32 %v3131_v0, 0.0  ;;  %v2589_v27 = vpop.f32.mrb[86].mxu0  ;;  %v9494_v3 = vld [vmem:[#allocation53_spill] sm:$0xff] }
 0x277   : > { %v3132_v6 = vadd.f32 %v6552_v51, %v3089_v28  ;;  %v2590_v38 = vpop.f32.mrb[87].mxu0  ;;  %v9496_v28 = vld [vmem:[#allocation54_spill] sm:$0xff]  ;;  %v9502_v54 = vld [vmem:[#allocation57_spill] sm:$0xff] }
 0x278   : > { %v3394_v58 = vrot.slane %v3167_v41, 7  ;;  %v3502_v12 = vrot.slane %v3167_v41, 1 }
 0x279   : > { %v3168_v14 = vmax.f32 %v3132_v6, 0.0  ;;  %5722 = vmatmul.mubr.msk.bf16.gmra.mrb[180].mxu1 %vm9476_vm7, %v5721_v10  ;;  %5866 = vmatmul.mubr.msk.bf16.gmra.mrb[152].mxu0 %vm9476_vm7, %v5721_v10  ;;  %vm9480_vm7 = vmmov %vm9431_vm2  ;;  %v9498_v10 = vld [vmem:[#allocation55_spill] sm:$0xff] }
 0x27a   : > { %v3401_v31 = vsel %vm9477_vm10, %v3393_v22, %v3394_v58  ;;  %v3509_v9 = vsel %vm9431_vm2, %v3501_v52, %v3502_v12  ;;  %vm9482_vm10 = vnez %v9481_v39  ;;  %vm9486_vm2 = vmmov %vm9427_vm3  ;;  %v9488_v22 = vld [vmem:[#allocation75_spill] sm:$0xff] }
 0x27b   : > { %v3395_v60 = vrot.slane %v3168_v14, 7  ;;  %v3503_v1 = vrot.slane %v3168_v14, 1  ;;  %v3187_v61 = vpack.c.bf16 %v3168_v14, %v3167_v41  ;;  %v8567_v5 = vpack.c.bf16 %v3509_v9, %v3510_v57  ;;  %v9500_v57 = vld [vmem:[#allocation56_spill] sm:$0xff]  ;;  %v9504_v41 = vld [vmem:[#allocation58_spill] sm:$0xff] }
 0x27c   : > { %v2594_v7 = vpop.f32.mrb[88].mxu0  ;;  %v9489_v52 = vrot.slane %v9488_v22, 1 }
 0x27d   : > { %4188 = vmatprep.mubr.bf16.mxu1 %v3187_v61  ;;  %4564 = vmatprep.mubr.bf16.mxu0 %v3187_v61  ;;  %v3400_v8 = vsel %vm9427_vm3, %v3394_v58, %v3395_v60  ;;  %v3507_v13 = vsel %vm9479_vm5, %v3503_v1, %v8563_v42  ;;  %v2595_v4 = vpop.f32.mrb[89].mxu0  ;;  %v3508_v63 = vsel %vm9480_vm7, %v3502_v12, %v3503_v1  ;;  %vm9487_vm3 = vmmov %vm9479_vm5 }
 0x27e   : > { %v5725_v17 = vpack.c.bf16 %v3400_v8, %v3401_v31  ;;  %v2596_v16 = vpop.f32.mrb[90].mxu0  ;;  %v8576_v55 = vpack.c.bf16 %v3507_v13, %v3508_v63  ;;  %v3399_v45 = vsel %vm9486_vm2, %v3395_v60, %v9485_v19  ;;  %v3506_v48 = vsel %vm9487_vm3, %v8563_v42, %v3471_v62  ;;  %vm9490_vm5 = vmmov %vm9487_vm3 }
 0x27f   : > { %v2597_v49 = vpop.f32.mrb[91].mxu0  ;;  %v3539_v18 = vsel %vm9490_vm5, %v3471_v62, %v9489_v52  ;;  %v5729_v24 = vpack.c.bf16 %v9491_v47, %v3399_v45  ;;  %vm9493_vm7 = vnez %v9492_v44  ;;  %vm9497_vm2 = vnez %v9496_v28 }
 0x280   : > { %v5733_v11 = vpack.c.bf16 %v3539_v18, %v3506_v48  ;;  %vm9499_vm3 = vnez %v9498_v10  ;;  %vm9501_vm5 = vnez %v9500_v57 }
 0x281   : > { %5726 = vmatmul.mubr.msk.bf16.gmra.mrb[184].mxu1 %vm9482_vm10, %v5725_v17  ;;  %5870 = vmatmul.mubr.msk.bf16.gmra.mrb[156].mxu0 %vm9482_vm10, %v5725_v17  ;;  %vm9495_vm10 = vnez %v9494_v3 }
 0x282   : > { %4196 = vmatprep.mubr.bf16.mxu1 %v9484_v40  ;;  %4572 = vmatprep.mubr.bf16.mxu0 %v9484_v40 }
 0x284   : > { %v4442_v50 = vpop.f32.mrb[92].mxu0 }
 0x285   : > { %v4443_v29 = vpop.f32.mrb[93].mxu0 }
 0x286   : > { %v4444_v33 = vpop.f32.mrb[94].mxu0 }
 0x287   : > { %v4445_v0 = vpop.f32.mrb[95].mxu0 }
 0x289   : > { %5730 = vmatmul.mubr.msk.bf16.gmra.mrb[188].mxu1 %vm9493_vm7, %v5729_v24  ;;  %5874 = vmatmul.mubr.msk.bf16.gmra.mrb[160].mxu0 %vm9493_vm7, %v5729_v24  ;;  %vm9503_vm7 = vnez %v9502_v54 }
 0x28a   : > { %6126 = vmatprep.mubr.msk.bf16.mxu0 %vm9495_vm10, %v5733_v11  ;;  %4235 = vmatprep.mubr.bf16.mxu1 %v9484_v40 }
 0x291   : > { %5734 = vmatmul.mubr.msk.bf16.vlgmr.msra.gmra.mrb[120].mxu1 %vm9495_vm10, %v5733_v11  ;;  %6127 = vmatmul.mubr.msk.bf16.vlgmr.msra.gmra.mrb[164].mxu0 %vm9497_vm2, %v8229_v53  ;;  %vm9505_vm10 = vnez %v9504_v41 }
 0x292   : > { %6130 = vmatprep.mubr.msk.bf16.mxu0 %vm9499_vm3, %v8271_v15  ;;  %4243 = vmatprep.mubr.bf16.mxu1 %v9484_v40 }
 0x299   : > { %5738 = vmatmul.mubr.msk.bf16.gmra.mrb[124].mxu1 %vm9497_vm2, %v8229_v53  ;;  %6131 = vmatmul.mubr.msk.bf16.gmra.mrb[168].mxu0 %vm9501_vm5, %v8293_v36  ;;  %v9506_v53 = vld [vmem:[#allocation59_spill] sm:$0xff] }
 0x29a   : > { %6134 = vmatprep.mubr.msk.bf16.mxu0 %vm9503_vm7, %v8335_v35  ;;  %4253 = vmatprep.mubr.bf16.mxu1 %v9484_v40  ;;  %vm9507_vm2 = vnez %v9506_v53 }
 0x2a1   : > { %5742 = vmatmul.mubr.msk.bf16.gmra.mrb[128].mxu1 %vm9499_vm3, %v8271_v15  ;;  %6135 = vmatmul.mubr.msk.bf16.gmra.mrb[172].mxu0 %vm9505_vm10, %v8357_v46  ;;  %vm9518_vm3 = vcmp.lt.s32.totalorder %v6981_v43, 7 }
 0x2a2   : > { %6138 = vmatprep.mubr.msk.bf16.mxu0 %vm9507_vm2, %v8386_v20  ;;  %4263 = vmatprep.mubr.bf16.mxu1 %v9484_v40  ;;  %v3541_v12 = vsel %vm9518_vm3, %v3471_v62, %v8563_v42 }
 0x2a3   : > { %v5801_v14 = vpack.c.bf16 %v3541_v12, %v3506_v48 }
 0x2a9   : > { %5746 = vmatmul.mubr.msk.bf16.gmra.mrb[132].mxu1 %vm9501_vm5, %v8293_v36  ;;  %6139 = vmatmul.mubr.msk.bf16.gmra.mrb[176].mxu0 %vm7576_vm1, %v8403_v25 }
 0x2aa   : > { %6142 = vmatprep.mubr.msk.bf16.mxu0 %vm7585_vm15, %v8426_v21  ;;  %4273 = vmatprep.mubr.bf16.mxu1 %v9484_v40 }
 0x2b1   : > { %5750 = vmatmul.mubr.msk.bf16.gmra.mrb[136].mxu1 %vm9503_vm7, %v8335_v35  ;;  %6143 = vmatmul.mubr.msk.bf16.gmra.mrb[180].mxu0 %vm7621_vm13, %v8443_v32 }
 0x2b2   : > { %6146 = vmatprep.mubr.msk.bf16.mxu0 %vm7636_vm11, %v8466_v37  ;;  %4283 = vmatprep.mubr.bf16.mxu1 %v9484_v40 }
 0x2b9   : > { %5754 = vmatmul.mubr.msk.bf16.gmra.mrb[140].mxu1 %vm9505_vm10, %v8357_v46  ;;  %6147 = vmatmul.mubr.msk.bf16.gmra.mrb[184].mxu0 %vm7675_vm12, %v8483_v56 }
 0x2ba   : > { %6150 = vmatprep.mubr.msk.bf16.mxu0 %vm7684_vm14, %v8506_v26  ;;  %4293 = vmatprep.mubr.bf16.mxu1 %v9484_v40 }
 0x2c1   : > { %5758 = vmatmul.mubr.msk.bf16.gmra.mrb[144].mxu1 %vm9507_vm2, %v8386_v20  ;;  %6151 = vmatmul.mubr.msk.bf16.gmra.mrb[188].mxu0 %vm7729_vm9, %v8523_v2 }
 0x2c2   : > { %6154 = vmatprep.mubr.msk.bf16.mxu0 %vm7738_vm0, %v8546_v59  ;;  %4303 = vmatprep.mubr.bf16.mxu1 %v9484_v40 }
 0x2c9   : > { %5762 = vmatmul.mubr.msk.bf16.gmra.mrb[148].mxu1 %vm7576_vm1, %v8403_v25  ;;  %6155 = vmatmul.mubr.msk.bf16.gmra.mrb[192].mxu0 %vm7781_vm6, %v8567_v5 }
 0x2ca   : > { %6158 = vmatprep.mubr.msk.bf16.mxu0 %vm7791_vm8, %v8576_v55  ;;  %4313 = vmatprep.mubr.bf16.mxu1 %v9484_v40 }
 0x2d1   : > { %5766 = vmatmul.mubr.msk.bf16.gmra.mrb[152].mxu1 %vm7585_vm15, %v8426_v21  ;;  %6159 = vmatmul.mubr.msk.bf16.gmra.mrb[196].mxu0 %vm7829_vm4, %v5801_v14 }
 0x2d2   : > { %4323 = vmatprep.mubr.bf16.mxu1 %v9484_v40 }
 0x2d9   : > { %5770 = vmatmul.mubr.msk.bf16.gmra.mrb[156].mxu1 %vm7621_vm13, %v8443_v32 }
 0x2da   : > { %4333 = vmatprep.mubr.bf16.mxu1 %v9484_v40 }
 0x2db   : > { %v4448_v30 = vpop.f32.mrb[96].mxu0 }
 0x2dc   : > { %v4449_v31 = vpop.f32.mrb[97].mxu0 }
 0x2dd   : > { %v4450_v43 = vpop.f32.mrb[98].mxu0 }
 0x2de   : > { %v4451_v23 = vpop.f32.mrb[99].mxu0 }
 0x2e1   : > { %5774 = vmatmul.mubr.msk.bf16.gmra.mrb[160].mxu1 %vm7636_vm11, %v8466_v37 }
 0x2e2   : > { %4343 = vmatprep.mubr.bf16.mxu1 %v9484_v40 }
 0x2e3   : > { %v8699_v21 = vpop.f32.mrb[100].mxu0 }
 0x2e4   : > { %v4456_v42 = vpop.f32.mrb[101].mxu0 }
 0x2e5   : > { %v8701_v9 = vpop.f32.mrb[102].mxu0 }
 0x2e6   : > { %v4459_v60 = vpop.f32.mrb[103].mxu0 }
 0x2e9   : > { %5778 = vmatmul.mubr.msk.bf16.gmra.mrb[164].mxu1 %vm7675_vm12, %v8483_v56 }
 0x2ea   : > { %4353 = vmatprep.mubr.bf16.mxu1 %v9484_v40 }
 0x2eb   : > { %v8707_v32 = vpop.f32.mrb[104].mxu0 }
 0x2ec   : > { %v4464_v1 = vpop.f32.mrb[105].mxu0 }
 0x2ed   : > { %v8709_v61 = vpop.f32.mrb[106].mxu0 }
 0x2ee   : > { %v4467_v37 = vpop.f32.mrb[107].mxu0 }
 0x2f1   : > { %5782 = vmatmul.mubr.msk.bf16.gmra.mrb[168].mxu1 %vm7684_vm14, %v8506_v26 }
 0x2f2   : > { %4363 = vmatprep.mubr.bf16.mxu1 %v9484_v40 }
 0x2f4   : > { %v8715_v7 = vpop.f32.mrb[108].mxu0 }
 0x2f5   : > { %v4472_v8 = vpop.f32.mrb[109].mxu0 }
 0x2f6   : > { %v8717_v13 = vpop.f32.mrb[110].mxu0 }
 0x2f7   : > { %v4475_v56 = vpop.f32.mrb[111].mxu0 }
 0x2f9   : > { %5786 = vmatmul.mubr.msk.bf16.gmra.mrb[172].mxu1 %vm7729_vm9, %v8523_v2 }
 0x2fa   : > { %4373 = vmatprep.mubr.bf16.mxu1 %v9484_v40 }
 0x2fc   : > { %v8723_v4 = vpop.f32.mrb[112].mxu0 }
 0x2fd   : > { %v4480_v17 = vpop.f32.mrb[113].mxu0 }
 0x2fe   : > { %v8725_v63 = vpop.f32.mrb[114].mxu0 }
 0x2ff   : > { %v4483_v26 = vpop.f32.mrb[115].mxu0 }
 0x301   : > { %5790 = vmatmul.mubr.msk.bf16.gmra.mrb[176].mxu1 %vm7738_vm0, %v8546_v59 }
 0x302   : > { %4383 = vmatprep.mubr.bf16.mxu1 %v9484_v40 }
 0x304   : > { %v8731_v16 = vpop.f32.mrb[116].mxu0 }
 0x305   : > { %v4488_v49 = vpop.f32.mrb[117].mxu0 }
 0x306   : > { %v8733_v39 = vpop.f32.mrb[118].mxu0 }
 0x307   : > { %v4491_v2 = vpop.f32.mrb[119].mxu0 }
 0x309   : > { %5794 = vmatmul.mubr.msk.bf16.gmra.mrb[180].mxu1 %vm7781_vm6, %v8567_v5 }
 0x30a   : > { %4393 = vmatprep.mubr.bf16.mxu1 %v9484_v40 }
 0x30c   : > { %v8739_v34 = vpop.f32.mrb[120].mxu0 }
 0x30d   : > { %v4496_v62 = vpop.f32.mrb[121].mxu0 }
 0x30e   : > { %v8741_v19 = vpop.f32.mrb[122].mxu0 }
 0x30f   : > { %v4499_v59 = vpop.f32.mrb[123].mxu0 }
 0x311   : > { %5798 = vmatmul.mubr.msk.bf16.gmra.mrb[184].mxu1 %vm7791_vm8, %v8576_v55 }
 0x312   : > { %4401 = vmatprep.mubr.bf16.mxu1 %v9484_v40 }
 0x314   : > { %v8747_v45 = vpop.f32.mrb[124].mxu0 }
 0x315   : > { %v4504_v50 = vpop.f32.mrb[125].mxu0 }
 0x316   : > { %v8749_v48 = vpop.f32.mrb[126].mxu0 }
 0x317   : > { %v4507_v5 = vpop.f32.mrb[127].mxu0 }
 0x319   : > { %5802 = vmatmul.mubr.msk.bf16.gmra.mrb[192].mxu1 %vm7829_vm4, %v5801_v14 }
 0x31c   : > { %v8753_v22 = vpop.f32.mrb[128].mxu0 }
 0x31d   : > { %v4512_v52 = vpop.f32.mrb[129].mxu0 }
 0x31e   : > { %v8755_v18 = vpop.f32.mrb[130].mxu0 }
 0x31f   : > { %v4515_v29 = vpop.f32.mrb[131].mxu0 }
 0x324   : > { %v8757_v33 = vpop.f32.mrb[132].mxu0 }
 0x325   : > { %v4520_v55 = vpop.f32.mrb[133].mxu0 }
 0x326   : > { %v8759_v47 = vpop.f32.mrb[134].mxu0 }
 0x327   : > { %v4523_v40 = vpop.f32.mrb[135].mxu0 }
 0x32c   : > { %v8761_v24 = vpop.f32.mrb[136].mxu0 }
 0x32d   : > { %v4528_v0 = vpop.f32.mrb[137].mxu0 }
 0x32e   : > { %v8763_v11 = vpop.f32.mrb[138].mxu0 }
 0x32f   : > { %v4531_v44 = vpop.f32.mrb[139].mxu0 }
 0x334   : > { %v8765_v3 = vpop.f32.mrb[140].mxu0 }
 0x335   : > { %v4536_v28 = vpop.f32.mrb[141].mxu0 }
 0x336   : > { %v8767_v10 = vpop.f32.mrb[142].mxu0 }
 0x337   : > { %v4539_v57 = vpop.f32.mrb[143].mxu0 }
 0x338   : > { %v8794_v57 = vld [vmem:[%s9094_s6] ss:$0 sm:$0xff] }
 0x33c   : > { %v8769_v54 = vpop.f32.mrb[144].mxu0 }
 0x33d   : > { %v4544_v41 = vpop.f32.mrb[145].mxu0 }
 0x33e   : > { %v8771_v53 = vpop.f32.mrb[146].mxu0 }
 0x33f   : > { %v4547_v27 = vpop.f32.mrb[147].mxu0 }
 0x344   : > { %v8773_v15 = vpop.f32.mrb[148].mxu0 }
 0x345   : > { %v4552_v51 = vpop.f32.mrb[149].mxu0 }
 0x346   : > { %v8775_v36 = vpop.f32.mrb[150].mxu0 }
 0x347   : > { %v4555_v6 = vpop.f32.mrb[151].mxu0 }
 0x34c   : > { %v8777_v35 = vpop.f32.mrb[152].mxu0 }
 0x34d   : > { %v4560_v38 = vpop.f32.mrb[153].mxu0 }
 0x34e   : > { %v8779_v46 = vpop.f32.mrb[154].mxu0 }
 0x34f   : > { %v4563_v58 = vpop.f32.mrb[155].mxu0 }
 0x350   : > { %v8801_v58 = vld [vmem:[%s9095_s7] ss:$0 sm:$0xff] }
 0x354   : > { %v8781_v20 = vpop.f32.mrb[156].mxu0 }
 0x355   : > { %v4568_v12 = vpop.f32.mrb[157].mxu0 }
 0x356   : > { %v8783_v14 = vpop.f32.mrb[158].mxu0 }
 0x357   : > { %v4571_v25 = vpop.f32.mrb[159].mxu0 }
 0x35c   : > { %v4198_v30 = vpop.f32.mrb[188].mxu1  ;;  %v8785_v31 = vpop.f32.mrb[160].mxu0 }
 0x35d   : > { %v4199_v43 = vpop.f32.mrb[189].mxu1  ;;  %v4576_v23 = vpop.f32.mrb[161].mxu0 }
 0x35e   : > { %v4200_v42 = vpop.f32.mrb[190].mxu1  ;;  %v8787_v60 = vpop.f32.mrb[162].mxu0 }
 0x35f   : > { %v4201_v1 = vpop.f32.mrb[191].mxu1  ;;  %v4579_v37 = vpop.f32.mrb[163].mxu0 }
 0x360   : > { %v9520_v1 = vld [vmem:[#allocation12_spill] sm:$0xff] }
 0x364   : > { %v4237_v8 = vpop.f32.mrb[120].mxu1  ;;  %v6128_v56 = vpop.f32.mrb[164].mxu0 }
 0x365   : > { %v4239_v17 = vpop.f32.mrb[121].mxu1  ;;  %v4615_v26 = vpop.f32.mrb[165].mxu0 }
 0x366   : > { %v4240_v49 = vpop.f32.mrb[122].mxu1  ;;  %v6129_v2 = vpop.f32.mrb[166].mxu0 }
 0x367   : > { %v4242_v62 = vpop.f32.mrb[123].mxu1  ;;  %v4617_v59 = vpop.f32.mrb[167].mxu0 }
 0x36c   : > { %v4245_v50 = vpop.f32.mrb[124].mxu1  ;;  %v6132_v5 = vpop.f32.mrb[168].mxu0 }
 0x36d   : > { %v4636_v52 = vadd.f32 %v6132_v5, %v8707_v32  ;;  %v4247_v29 = vpop.f32.mrb[125].mxu1  ;;  %v4627_v55 = vpop.f32.mrb[169].mxu0  ;;  %v9521_v5 = vld [vmem:[#allocation13_spill] sm:$0xff] }
 0x36e   : > { %v4754_v40 = vadd.f32 %v4247_v29, %v4237_v8  ;;  %v4628_v0 = vadd.f32 %v4627_v55, %v8699_v21  ;;  %v4249_v44 = vpop.f32.mrb[126].mxu1  ;;  %v6133_v28 = vpop.f32.mrb[170].mxu0 }
 0x36f   : > { %v4639_v41 = vadd.f32 %v6133_v28, %v8709_v61  ;;  %v4251_v27 = vpop.f32.mrb[127].mxu1  ;;  %v4630_v51 = vpop.f32.mrb[171].mxu0 }
 0x370   : > { %v4786_v6 = vadd.f32 %v4754_v40, %v4628_v0  ;;  %v4755_v38 = vadd.f32 %v4251_v27, %v4240_v49  ;;  %v4631_v32 = vadd.f32 %v4630_v51, %v8701_v9 }
 0x372   : > { %v4825_v21 = vmul.f32 %v8794_v57, %v4786_v6  ;;  %v4787_v12 = vadd.f32 %v4755_v38, %v4631_v32 }
 0x374   : > { %v4864_v25 = vadd.f32 %v8801_v58, %v4825_v21  ;;  %v4826_v30 = vmul.f32 %v8794_v57, %v4787_v12  ;;  %v4255_v43 = vpop.f32.mrb[128].mxu1  ;;  %v6136_v61 = vpop.f32.mrb[172].mxu0 }
 0x375   : > { %v8807_v23 = vadd.f32 %v6136_v61, %v8723_v4  ;;  %v4257_v42 = vpop.f32.mrb[129].mxu1  ;;  %v4643_v9 = vpop.f32.mrb[173].mxu0 }
 0x376   : > { %v4928_v37 = vadd.f32 %v4864_v25, %v9520_v1  ;;  %v4865_v8 = vadd.f32 %v8801_v58, %v4826_v30  ;;  %v4756_v56 = vadd.f32 %v4257_v42, %v4245_v50  ;;  %v4644_v17 = vadd.f32 %v4643_v9, %v8715_v7  ;;  %v4259_v26 = vpop.f32.mrb[130].mxu1  ;;  %v6137_v49 = vpop.f32.mrb[174].mxu0  ;;  %v9523_v1 = vld [vmem:[#allocation15_spill] sm:$0xff] }
 0x377   : > { %v8813_v2 = vadd.f32 %v6137_v49, %v8725_v63  ;;  %v4261_v62 = vpop.f32.mrb[131].mxu1  ;;  %v4646_v59 = vpop.f32.mrb[175].mxu0 }
 0x378   : > { %v4960_v4 = vmax.f32 %v4928_v37, 0.0  ;;  %v4929_v29 = vadd.f32 %v4865_v8, %v9521_v5  ;;  %v4788_v55 = vadd.f32 %v4756_v56, %v4636_v52  ;;  %v4757_v40 = vadd.f32 %v4261_v62, %v4249_v44  ;;  %v9522_v44 = vld [vmem:[#allocation14_spill] sm:$0xff] }
 0x379   : > { %v4647_v0 = vadd.f32 %v4646_v59, %v8717_v13 }
 0x37a   : > { %4992 = vst [vmem:[%s6851_s25] sm:$0xff] %v4960_v4  ;;  %v4961_v28 = vmax.f32 %v4929_v29, 0.0  ;;  %v4827_v50 = vmul.f32 %v8794_v57, %v4788_v55  ;;  %v4789_v27 = vadd.f32 %v4757_v40, %v4639_v41 }
 0x37c   : > { %4993 = vst [vmem:[%s6851_s25 + $0x8] sm:$0xff] %v4961_v28  ;;  %v4866_v7 = vadd.f32 %v8801_v58, %v4827_v50  ;;  %v4828_v63 = vmul.f32 %v8794_v57, %v4789_v27  ;;  %v4265_v51 = vpop.f32.mrb[132].mxu1  ;;  %v6140_v6 = vpop.f32.mrb[176].mxu0 }
 0x37d   : > { %v8823_v38 = vadd.f32 %v6140_v6, %v8739_v34  ;;  %v4267_v32 = vpop.f32.mrb[133].mxu1  ;;  %v4659_v52 = vpop.f32.mrb[177].mxu0 }
 0x37e   : > { %v4930_v13 = vadd.f32 %v4866_v7, %v9522_v44  ;;  %v4867_v21 = vadd.f32 %v8801_v58, %v4828_v63  ;;  %v4758_v12 = vadd.f32 %v4267_v32, %v4255_v43  ;;  %v4660_v41 = vadd.f32 %v4659_v52, %v8731_v16  ;;  %v4269_v25 = vpop.f32.mrb[134].mxu1  ;;  %v6141_v30 = vpop.f32.mrb[178].mxu0  ;;  %v9525_v32 = vld [vmem:[#allocation17_spill] sm:$0xff] }
 0x37f   : > { %v8829_v61 = vadd.f32 %v6141_v30, %v8741_v19  ;;  %v4271_v42 = vpop.f32.mrb[135].mxu1  ;;  %v4662_v9 = vpop.f32.mrb[179].mxu0 }
 0x380   : > { %v4962_v34 = vmax.f32 %v4930_v13, 0.0  ;;  %v4931_v37 = vadd.f32 %v4867_v21, %v9523_v1  ;;  %v4790_v8 = vadd.f32 %v4758_v12, %v4644_v17  ;;  %v4759_v56 = vadd.f32 %v4271_v42, %v4259_v26  ;;  %v9524_v26 = vld [vmem:[#allocation16_spill] sm:$0xff] }
 0x381   : > { %v4663_v49 = vadd.f32 %v4662_v9, %v8733_v39 }
 0x382   : > { %4994 = vst [vmem:[%s6851_s25 + $0x10] sm:$0xff] %v4962_v34  ;;  %v4963_v62 = vmax.f32 %v4931_v37, 0.0  ;;  %v4829_v43 = vmul.f32 %v8794_v57, %v4790_v8  ;;  %v4791_v59 = vadd.f32 %v4759_v56, %v4647_v0 }
 0x384   : > { %4995 = vst [vmem:[%s6851_s25 + $0x18] sm:$0xff] %v4963_v62  ;;  %v4868_v16 = vadd.f32 %v8801_v58, %v4829_v43  ;;  %v4830_v19 = vmul.f32 %v8794_v57, %v4791_v59  ;;  %v4275_v4 = vpop.f32.mrb[136].mxu1  ;;  %v6144_v5 = vpop.f32.mrb[180].mxu0 }
 0x385   : > { %v8839_v29 = vadd.f32 %v6144_v5, %v8753_v22  ;;  %v4277_v55 = vpop.f32.mrb[137].mxu1  ;;  %v4675_v17 = vpop.f32.mrb[181].mxu0 }
 0x386   : > { %v4932_v39 = vadd.f32 %v4868_v16, %v9524_v26  ;;  %v4869_v40 = vadd.f32 %v8801_v58, %v4830_v19  ;;  %v4760_v28 = vadd.f32 %v4277_v55, %v4265_v51  ;;  %v8844_v0 = vadd.f32 %v4675_v17, %v8747_v45  ;;  %v4279_v50 = vpop.f32.mrb[138].mxu1  ;;  %v6145_v27 = vpop.f32.mrb[182].mxu0  ;;  %v9527_v19 = vld [vmem:[#allocation19_spill] sm:$0xff] }
 0x387   : > { %v8847_v7 = vadd.f32 %v6145_v27, %v8755_v18  ;;  %v4281_v63 = vpop.f32.mrb[139].mxu1  ;;  %v4678_v22 = vpop.f32.mrb[183].mxu0 }
 0x388   : > { %v4964_v6 = vmax.f32 %v4932_v39, 0.0  ;;  %v4933_v52 = vadd.f32 %v4869_v40, %v9525_v32  ;;  %v4792_v44 = vadd.f32 %v4760_v28, %v8807_v23  ;;  %v4761_v13 = vadd.f32 %v4281_v63, %v4269_v25  ;;  %v9526_v25 = vld [vmem:[#allocation18_spill] sm:$0xff] }
 0x389   : > { %v8852_v21 = vadd.f32 %v4678_v22, %v8749_v48 }
 0x38a   : > { %4996 = vst [vmem:[%s6851_s25 + $0x20] sm:$0xff] %v4964_v6  ;;  %v4965_v51 = vmax.f32 %v4933_v52, 0.0  ;;  %v4831_v45 = vmul.f32 %v8794_v57, %v4792_v44  ;;  %v4793_v12 = vadd.f32 %v4761_v13, %v8813_v2 }
 0x38c   : > { %4997 = vst [vmem:[%s6851_s25 + $0x28] sm:$0xff] %v4965_v51  ;;  %v4870_v18 = vadd.f32 %v8801_v58, %v4831_v45  ;;  %v4832_v30 = vmul.f32 %v8794_v57, %v4793_v12  ;;  %v4285_v42 = vpop.f32.mrb[140].mxu1  ;;  %v6148_v9 = vpop.f32.mrb[184].mxu0  ;;  %v9529_v12 = vld [vmem:[#allocation21_spill] sm:$0xff] }
 0x38d   : > { %v8861_v34 = vadd.f32 %v6148_v9, %v8761_v24  ;;  %v4287_v23 = vpop.f32.mrb[141].mxu1  ;;  %v4691_v48 = vpop.f32.mrb[185].mxu0 }
 0x38e   : > { %v4934_v1 = vadd.f32 %v4870_v18, %v9526_v25  ;;  %v4871_v37 = vadd.f32 %v8801_v58, %v4832_v30  ;;  %v4762_v8 = vadd.f32 %v4287_v23, %v4275_v4  ;;  %v8866_v2 = vadd.f32 %v4691_v48, %v8757_v33  ;;  %v4289_v56 = vpop.f32.mrb[142].mxu1  ;;  %v6149_v62 = vpop.f32.mrb[186].mxu0 }
 0x38f   : > { %v8869_v43 = vadd.f32 %v6149_v62, %v8763_v11  ;;  %v4291_v59 = vpop.f32.mrb[143].mxu1  ;;  %v4694_v24 = vpop.f32.mrb[187].mxu0 }
 0x390   : > { %v4966_v16 = vmax.f32 %v4934_v1, 0.0  ;;  %v4935_v5 = vadd.f32 %v4871_v37, %v9527_v19  ;;  %v4794_v55 = vadd.f32 %v4762_v8, %v4660_v41  ;;  %v4763_v17 = vadd.f32 %v4291_v59, %v4279_v50 }
 0x391   : > { %v8873_v26 = vadd.f32 %v4694_v24, %v8759_v47  ;;  %v9528_v47 = vld [vmem:[#allocation20_spill] sm:$0xff] }
 0x392   : > { %4998 = vst [vmem:[%s6851_s25 + $0x30] sm:$0xff] %v4966_v16  ;;  %v4967_v4 = vmax.f32 %v4935_v5, 0.0  ;;  %v4833_v33 = vmul.f32 %v8794_v57, %v4794_v55  ;;  %v4795_v39 = vadd.f32 %v4763_v17, %v4663_v49 }
 0x394   : > { %4999 = vst [vmem:[%s6851_s25 + $0x38] sm:$0xff] %v4967_v4  ;;  %v4872_v40 = vadd.f32 %v8801_v58, %v4833_v33  ;;  %v4834_v11 = vmul.f32 %v8794_v57, %v4795_v39  ;;  %v4295_v28 = vpop.f32.mrb[144].mxu1  ;;  %v6152_v27 = vpop.f32.mrb[188].mxu0  ;;  %v9531_v4 = vld [vmem:[#allocation23_spill] sm:$0xff] }
 0x395   : > { %v8881_v63 = vadd.f32 %v6152_v27, %v8769_v54  ;;  %v4297_v41 = vpop.f32.mrb[145].mxu1  ;;  %v4707_v50 = vpop.f32.mrb[189].mxu0 }
 0x396   : > { %v4936_v22 = vadd.f32 %v4872_v40, %v9528_v47  ;;  %v4873_v6 = vadd.f32 %v8801_v58, %v4834_v11  ;;  %v4764_v32 = vadd.f32 %v4297_v41, %v4285_v42  ;;  %v8886_v49 = vadd.f32 %v4707_v50, %v8765_v3  ;;  %v4299_v52 = vpop.f32.mrb[146].mxu1  ;;  %v6153_v44 = vpop.f32.mrb[190].mxu0 }
 0x397   : > { %v8889_v13 = vadd.f32 %v6153_v44, %v8771_v53  ;;  %v4301_v51 = vpop.f32.mrb[147].mxu1  ;;  %v4710_v54 = vpop.f32.mrb[191].mxu0 }
 0x398   : > { %v4968_v45 = vmax.f32 %v4936_v22, 0.0  ;;  %v4937_v18 = vadd.f32 %v4873_v6, %v9529_v12  ;;  %v4796_v30 = vadd.f32 %v4764_v32, %v8823_v38  ;;  %v4765_v9 = vadd.f32 %v4301_v51, %v4289_v56  ;;  %v9530_v56 = vld [vmem:[#allocation22_spill] sm:$0xff]  ;;  %v9532_v6 = vld [vmem:[#allocation24_spill] sm:$0xff] }
 0x399   : > { %v8894_v23 = vadd.f32 %v4710_v54, %v8767_v10 }
 0x39a   : > { %5000 = vst [vmem:[%s6851_s25 + $0x40] sm:$0xff] %v4968_v45  ;;  %v4969_v42 = vmax.f32 %v4937_v18, 0.0  ;;  %v4835_v3 = vmul.f32 %v8794_v57, %v4796_v30  ;;  %v4797_v48 = vadd.f32 %v4765_v9, %v8829_v61  ;;  %v9533_v30 = vld [vmem:[#allocation25_spill] sm:$0xff] }
 0x39c   : > { %5001 = vst [vmem:[%s6851_s25 + $0x48] sm:$0xff] %v4969_v42  ;;  %v4874_v53 = vadd.f32 %v8801_v58, %v4835_v3  ;;  %v4836_v25 = vmul.f32 %v8794_v57, %v4797_v48  ;;  %v4305_v1 = vpop.f32.mrb[148].mxu1  ;;  %v6156_v37 = vpop.f32.mrb[192].mxu0 }
 0x39d   : > { %v8903_v8 = vadd.f32 %v6156_v37, %v8777_v35  ;;  %v4307_v38 = vpop.f32.mrb[149].mxu1  ;;  %v4723_v10 = vpop.f32.mrb[193].mxu0 }
 0x39e   : > { %v4938_v62 = vadd.f32 %v4874_v53, %v9530_v56  ;;  %v4875_v59 = vadd.f32 %v8801_v58, %v4836_v25  ;;  %v4766_v24 = vadd.f32 %v4307_v38, %v4295_v28  ;;  %v8908_v61 = vadd.f32 %v4723_v10, %v8773_v15  ;;  %v4309_v16 = vpop.f32.mrb[150].mxu1  ;;  %v6157_v19 = vpop.f32.mrb[194].mxu0 }
 0x39f   : > { %v8911_v5 = vadd.f32 %v6157_v19, %v8779_v46  ;;  %v4311_v55 = vpop.f32.mrb[151].mxu1  ;;  %v4726_v35 = vpop.f32.mrb[195].mxu0 }
 0x3a0   : > { %v4970_v17 = vmax.f32 %v4938_v62, 0.0  ;;  %v4939_v33 = vadd.f32 %v4875_v59, %v9531_v4  ;;  %v4798_v39 = vadd.f32 %v4766_v24, %v8844_v0  ;;  %v4767_v40 = vadd.f32 %v4311_v55, %v4299_v52 }
 0x3a1   : > { %v8916_v11 = vadd.f32 %v4726_v35, %v8775_v36 }
 0x3a2   : > { %5002 = vst [vmem:[%s6851_s25 + $0x50] sm:$0xff] %v4970_v17  ;;  %v4971_v28 = vmax.f32 %v4939_v33, 0.0  ;;  %v4837_v15 = vmul.f32 %v8794_v57, %v4798_v39  ;;  %v4799_v27 = vadd.f32 %v4767_v40, %v8852_v21 }
 0x3a4   : > { %5003 = vst [vmem:[%s6851_s25 + $0x58] sm:$0xff] %v4971_v28  ;;  %v4876_v46 = vadd.f32 %v8801_v58, %v4837_v15  ;;  %v4838_v41 = vmul.f32 %v8794_v57, %v4799_v27  ;;  %v4315_v50 = vpop.f32.mrb[152].mxu1  ;;  %v6160_v47 = vpop.f32.mrb[196].mxu0  ;;  %v9536_v15 = vld [vmem:[#allocation28_spill] sm:$0xff] }
 0x3a5   : > { %v8925_v22 = vadd.f32 %v6160_v47, %v8785_v31  ;;  %v4317_v0 = vpop.f32.mrb[153].mxu1  ;;  %v4739_v36 = vpop.f32.mrb[197].mxu0 }
 0x3a6   : > { %v4940_v32 = vadd.f32 %v4876_v46, %v9532_v6  ;;  %v4877_v52 = vadd.f32 %v8801_v58, %v4838_v41  ;;  %v4768_v44 = vadd.f32 %v4317_v0, %v4305_v1  ;;  %v8930_v21 = vadd.f32 %v4739_v36, %v8781_v20  ;;  %v4319_v51 = vpop.f32.mrb[154].mxu1  ;;  %v6161_v54 = vpop.f32.mrb[198].mxu0  ;;  %v9537_v0 = vld [vmem:[#allocation29_spill] sm:$0xff] }
 0x3a7   : > { %v8933_v45 = vadd.f32 %v6161_v54, %v8787_v60  ;;  %v4321_v12 = vpop.f32.mrb[155].mxu1  ;;  %v4742_v31 = vpop.f32.mrb[199].mxu0 }
 0x3a8   : > { %v4972_v18 = vmax.f32 %v4940_v32, 0.0  ;;  %v4941_v9 = vadd.f32 %v4877_v52, %v9533_v30  ;;  %v4800_v42 = vadd.f32 %v4768_v44, %v8839_v29  ;;  %v4769_v3 = vadd.f32 %v4321_v12, %v4309_v16  ;;  %v9534_v29 = vld [vmem:[#allocation26_spill] sm:$0xff]  ;;  %v9535_v16 = vld [vmem:[#allocation27_spill] sm:$0xff] }
 0x3a9   : > { %v8938_v48 = vadd.f32 %v4742_v31, %v8783_v14 }
 0x3aa   : > { %5004 = vst [vmem:[%s6851_s25 + $0x60] sm:$0xff] %v4972_v18  ;;  %v4973_v53 = vmax.f32 %v4941_v9, 0.0  ;;  %v4839_v20 = vmul.f32 %v8794_v57, %v4800_v42  ;;  %v4801_v25 = vadd.f32 %v4769_v3, %v8847_v7  ;;  %v9538_v18 = vld [vmem:[#allocation30_spill] sm:$0xff] }
 0x3ac   : > { %5005 = vst [vmem:[%s6851_s25 + $0x68] sm:$0xff] %v4973_v53  ;;  %v4878_v60 = vadd.f32 %v8801_v58, %v4839_v20  ;;  %v4840_v1 = vmul.f32 %v8794_v57, %v4801_v25  ;;  %v4325_v37 = vpop.f32.mrb[156].mxu1  ;;  %v9539_v20 = vld [vmem:[#allocation31_spill] sm:$0xff] }
 0x3ad   : > { %v4327_v38 = vpop.f32.mrb[157].mxu1 }
 0x3ae   : > { %v4942_v10 = vadd.f32 %v4878_v60, %v9534_v29  ;;  %v4879_v14 = vadd.f32 %v8801_v58, %v4840_v1  ;;  %v4770_v56 = vadd.f32 %v4327_v38, %v4315_v50  ;;  %v4329_v62 = vpop.f32.mrb[158].mxu1 }
 0x3af   : > { %v4331_v59 = vpop.f32.mrb[159].mxu1 }
 0x3b0   : > { %v4974_v24 = vmax.f32 %v4942_v10, 0.0  ;;  %v4943_v19 = vadd.f32 %v4879_v14, %v9535_v16  ;;  %v4802_v7 = vadd.f32 %v4770_v56, %v8866_v2  ;;  %v4771_v55 = vadd.f32 %v4331_v59, %v4319_v51 }
 0x3b2   : > { %5006 = vst [vmem:[%s6851_s25 + $0x70] sm:$0xff] %v4974_v24  ;;  %v4975_v35 = vmax.f32 %v4943_v19, 0.0  ;;  %v4841_v17 = vmul.f32 %v8794_v57, %v4802_v7  ;;  %v4803_v4 = vadd.f32 %v4771_v55, %v8873_v26  ;;  %v9541_v55 = vld [vmem:[#allocation33_spill] sm:$0xff] }
 0x3b4   : > { %5007 = vst [vmem:[%s6851_s25 + $0x78] sm:$0xff] %v4975_v35  ;;  %v4880_v33 = vadd.f32 %v8801_v58, %v4841_v17  ;;  %v4842_v39 = vmul.f32 %v8794_v57, %v4803_v4  ;;  %v4335_v40 = vpop.f32.mrb[160].mxu1 }
 0x3b5   : > { %v4337_v28 = vpop.f32.mrb[161].mxu1 }
 0x3b6   : > { %v4944_v27 = vadd.f32 %v4880_v33, %v9536_v15  ;;  %v4881_v2 = vadd.f32 %v8801_v58, %v4842_v39  ;;  %v4772_v46 = vadd.f32 %v4337_v28, %v4325_v37  ;;  %v4339_v41 = vpop.f32.mrb[162].mxu1 }
 0x3b7   : > { %v4341_v50 = vpop.f32.mrb[163].mxu1 }
 0x3b8   : > { %v4976_v47 = vmax.f32 %v4944_v27, 0.0  ;;  %v4945_v36 = vadd.f32 %v4881_v2, %v9537_v0  ;;  %v4804_v26 = vadd.f32 %v4772_v46, %v8861_v34  ;;  %v4773_v6 = vadd.f32 %v4341_v50, %v4329_v62  ;;  %v9540_v62 = vld [vmem:[#allocation32_spill] sm:$0xff]  ;;  %v9542_v2 = vld [vmem:[#allocation34_spill] sm:$0xff] }
 0x3ba   : > { %5008 = vst [vmem:[%s6851_s25 + $0x80] sm:$0xff] %v4976_v47  ;;  %v4977_v32 = vmax.f32 %v4945_v36, 0.0  ;;  %v4843_v52 = vmul.f32 %v8794_v57, %v4804_v26  ;;  %v4805_v44 = vadd.f32 %v4773_v6, %v8869_v43  ;;  %v9543_v36 = vld [vmem:[#allocation35_spill] sm:$0xff] }
 0x3bc   : > { %5009 = vst [vmem:[%s6851_s25 + $0x88] sm:$0xff] %v4977_v32  ;;  %v4882_v51 = vadd.f32 %v8801_v58, %v4843_v52  ;;  %v4844_v54 = vmul.f32 %v8794_v57, %v4805_v44  ;;  %v4345_v12 = vpop.f32.mrb[164].mxu1 }
 0x3bd   : > { %v4347_v31 = vpop.f32.mrb[165].mxu1 }
 0x3be   : > { %v4946_v30 = vadd.f32 %v4882_v51, %v9538_v18  ;;  %v4883_v34 = vadd.f32 %v8801_v58, %v4844_v54  ;;  %v4774_v9 = vadd.f32 %v4347_v31, %v4335_v40  ;;  %v4349_v42 = vpop.f32.mrb[166].mxu1  ;;  %v9544_v18 = vld [vmem:[#allocation36_spill] sm:$0xff] }
 0x3bf   : > { %v4351_v3 = vpop.f32.mrb[167].mxu1 }
 0x3c0   : > { %v4978_v53 = vmax.f32 %v4946_v30, 0.0  ;;  %v4947_v25 = vadd.f32 %v4883_v34, %v9539_v20  ;;  %v4806_v43 = vadd.f32 %v4774_v9, %v8886_v49  ;;  %v4775_v60 = vadd.f32 %v4351_v3, %v4339_v41 }
 0x3c2   : > { %5010 = vst [vmem:[%s6851_s25 + $0x90] sm:$0xff] %v4978_v53  ;;  %v4979_v1 = vmax.f32 %v4947_v25, 0.0  ;;  %v4845_v37 = vmul.f32 %v8794_v57, %v4806_v43  ;;  %v4807_v38 = vadd.f32 %v4775_v60, %v8894_v23  ;;  %v9545_v53 = vld [vmem:[#allocation37_spill] sm:$0xff] }
 0x3c4   : > { %5011 = vst [vmem:[%s6851_s25 + $0x98] sm:$0xff] %v4979_v1  ;;  %v4884_v29 = vadd.f32 %v8801_v58, %v4845_v37  ;;  %v4846_v10 = vmul.f32 %v8794_v57, %v4807_v38  ;;  %v4355_v14 = vpop.f32.mrb[168].mxu1 }
 0x3c5   : > { %v4357_v56 = vpop.f32.mrb[169].mxu1 }
 0x3c6   : > { %v4948_v59 = vadd.f32 %v4884_v29, %v9540_v62  ;;  %v4885_v49 = vadd.f32 %v8801_v58, %v4846_v10  ;;  %v4776_v24 = vadd.f32 %v4357_v56, %v4345_v12  ;;  %v4359_v16 = vpop.f32.mrb[170].mxu1 }
 0x3c7   : > { %v4361_v19 = vpop.f32.mrb[171].mxu1 }
 0x3c8   : > { %v4980_v7 = vmax.f32 %v4948_v59, 0.0  ;;  %v4949_v35 = vadd.f32 %v4885_v49, %v9541_v55  ;;  %v4808_v23 = vadd.f32 %v4776_v24, %v8881_v63  ;;  %v4777_v17 = vadd.f32 %v4361_v19, %v4349_v42 }
 0x3ca   : > { %5012 = vst [vmem:[%s6851_s25 + $0xa0] sm:$0xff] %v4980_v7  ;;  %v4981_v4 = vmax.f32 %v4949_v35, 0.0  ;;  %v4847_v33 = vmul.f32 %v8794_v57, %v4808_v23  ;;  %v4809_v39 = vadd.f32 %v4777_v17, %v8889_v13 }
 0x3cc   : > { %5013 = vst [vmem:[%s6851_s25 + $0xa8] sm:$0xff] %v4981_v4  ;;  %v4886_v40 = vadd.f32 %v8801_v58, %v4847_v33  ;;  %v4848_v28 = vmul.f32 %v8794_v57, %v4809_v39  ;;  %v4365_v15 = vpop.f32.mrb[172].mxu1 }
 0x3cd   : > { %v4367_v27 = vpop.f32.mrb[173].mxu1 }
 0x3ce   : > { %v4950_v46 = vadd.f32 %v4886_v40, %v9542_v2  ;;  %v4887_v63 = vadd.f32 %v8801_v58, %v4848_v28  ;;  %v4778_v41 = vadd.f32 %v4367_v27, %v4355_v14  ;;  %v4369_v50 = vpop.f32.mrb[174].mxu1  ;;  %v9546_v14 = vld [vmem:[#allocation38_spill] sm:$0xff]  ;;  %v9548_v40 = vld [vmem:[#allocation40_spill] sm:$0xff] }
 0x3cf   : > { %v4371_v47 = vpop.f32.mrb[175].mxu1 }
 0x3d0   : > { %v4982_v0 = vmax.f32 %v4950_v46, 0.0  ;;  %v4951_v26 = vadd.f32 %v4887_v63, %v9543_v36  ;;  %v4810_v13 = vadd.f32 %v4778_v41, %v8908_v61  ;;  %v4779_v6 = vadd.f32 %v4371_v47, %v4359_v16  ;;  %v9547_v16 = vld [vmem:[#allocation39_spill] sm:$0xff]  ;;  %v9549_v63 = vld [vmem:[#allocation41_spill] sm:$0xff] }
 0x3d2   : > { %5014 = vst [vmem:[%s6851_s25 + $0xb0] sm:$0xff] %v4982_v0  ;;  %v4983_v32 = vmax.f32 %v4951_v26, 0.0  ;;  %v4849_v52 = vmul.f32 %v8794_v57, %v4810_v13  ;;  %v4811_v44 = vadd.f32 %v4779_v6, %v8916_v11 }
 0x3d4   : > { %5015 = vst [vmem:[%s6851_s25 + $0xb8] sm:$0xff] %v4983_v32  ;;  %v4888_v51 = vadd.f32 %v8801_v58, %v4849_v52  ;;  %v4850_v54 = vmul.f32 %v8794_v57, %v4811_v44  ;;  %v4375_v12 = vpop.f32.mrb[176].mxu1  ;;  %v9550_v52 = vld [vmem:[#allocation42_spill] sm:$0xff] }
 0x3d5   : > { %v4377_v31 = vpop.f32.mrb[177].mxu1 }
 0x3d6   : > { %v4952_v30 = vadd.f32 %v4888_v51, %v9544_v18  ;;  %v4889_v61 = vadd.f32 %v8801_v58, %v4850_v54  ;;  %v4780_v34 = vadd.f32 %v4377_v31, %v4365_v15  ;;  %v4379_v9 = vpop.f32.mrb[178].mxu1 }
 0x3d7   : > { %v4381_v42 = vpop.f32.mrb[179].mxu1 }
 0x3d8   : > { %v4984_v3 = vmax.f32 %v4952_v30, 0.0  ;;  %v4953_v20 = vadd.f32 %v4889_v61, %v9545_v53  ;;  %v4812_v11 = vadd.f32 %v4780_v34, %v8903_v8  ;;  %v4781_v25 = vadd.f32 %v4381_v42, %v4369_v50 }
 0x3da   : > { %5016 = vst [vmem:[%s6851_s25 + $0xc0] sm:$0xff] %v4984_v3  ;;  %v4985_v43 = vmax.f32 %v4953_v20, 0.0  ;;  %v4851_v60 = vmul.f32 %v8794_v57, %v4812_v11  ;;  %v4813_v1 = vadd.f32 %v4781_v25, %v8911_v5 }
 0x3dc   : > { %5017 = vst [vmem:[%s6851_s25 + $0xc8] sm:$0xff] %v4985_v43  ;;  %v4890_v37 = vadd.f32 %v8801_v58, %v4851_v60  ;;  %v4852_v38 = vmul.f32 %v8794_v57, %v4813_v1  ;;  %v4385_v29 = vpop.f32.mrb[180].mxu1 }
 0x3dd   : > { %v4387_v10 = vpop.f32.mrb[181].mxu1 }
 0x3de   : > { %v4954_v56 = vadd.f32 %v4890_v37, %v9546_v14  ;;  %v4891_v8 = vadd.f32 %v8801_v58, %v4852_v38  ;;  %v4782_v62 = vadd.f32 %v4387_v10, %v4375_v12  ;;  %v4389_v59 = vpop.f32.mrb[182].mxu1  ;;  %v9551_v12 = vld [vmem:[#allocation43_spill] sm:$0xff] }
 0x3df   : > { %v4391_v49 = vpop.f32.mrb[183].mxu1 }
 0x3e0   : > { %v4986_v24 = vmax.f32 %v4954_v56, 0.0  ;;  %v4955_v19 = vadd.f32 %v4891_v8, %v9547_v16  ;;  %v4814_v5 = vadd.f32 %v4782_v62, %v8930_v21  ;;  %v4783_v7 = vadd.f32 %v4391_v49, %v4379_v9 }
 0x3e2   : > { %5018 = vst [vmem:[%s6851_s25 + $0xd0] sm:$0xff] %v4986_v24  ;;  %v4987_v55 = vmax.f32 %v4955_v19, 0.0  ;;  %v4853_v35 = vmul.f32 %v8794_v57, %v4814_v5  ;;  %v4815_v23 = vadd.f32 %v4783_v7, %v8938_v48 }
 0x3e4   : > { %5019 = vst [vmem:[%s6851_s25 + $0xd8] sm:$0xff] %v4987_v55  ;;  %v4892_v17 = vadd.f32 %v8801_v58, %v4853_v35  ;;  %v4854_v4 = vmul.f32 %v8794_v57, %v4815_v23  ;;  %v4395_v33 = vpop.f32.mrb[184].mxu1 }
 0x3e5   : > { %v4396_v39 = vpop.f32.mrb[185].mxu1 }
 0x3e6   : > { %v4956_v28 = vadd.f32 %v4892_v17, %v9548_v40  ;;  %v4893_v21 = vadd.f32 %v8801_v58, %v4854_v4  ;;  %v4784_v15 = vadd.f32 %v4396_v39, %v4385_v29  ;;  %v4398_v27 = vpop.f32.mrb[186].mxu1 }
 0x3e7   : > { %v4399_v2 = vpop.f32.mrb[187].mxu1 }
 0x3e8   : > { %v4988_v46 = vmax.f32 %v4956_v28, 0.0  ;;  %v4957_v41 = vadd.f32 %v4893_v21, %v9549_v63  ;;  %v4816_v48 = vadd.f32 %v4784_v15, %v8925_v22  ;;  %v4785_v50 = vadd.f32 %v4399_v2, %v4389_v59 }
 0x3ea   : > { %5020 = vst [vmem:[%s6851_s25 + $0xe0] sm:$0xff] %v4988_v46  ;;  %v4989_v47 = vmax.f32 %v4957_v41, 0.0  ;;  %v4855_v0 = vmul.f32 %v8794_v57, %v4816_v48  ;;  %v4817_v36 = vadd.f32 %v4785_v50, %v8933_v45 }
 0x3ec   : > { %5021 = vst [vmem:[%s6851_s25 + $0xe8] sm:$0xff] %v4989_v47  ;;  %v4894_v26 = vadd.f32 %v8801_v58, %v4855_v0  ;;  %v4856_v13 = vmul.f32 %v8794_v57, %v4817_v36  ;;  %v4403_v6 = vpop.f32.mrb[192].mxu1 }
 0x3ed   : > { %v4404_v32 = vpop.f32.mrb[193].mxu1 }
 0x3ee   : > { %v4958_v44 = vadd.f32 %v4894_v26, %v9550_v52  ;;  %v4895_v22 = vadd.f32 %v8801_v58, %v4856_v13  ;;  %v4405_v51 = vpop.f32.mrb[194].mxu1 }
 0x3ef   : > { %v4406_v54 = vpop.f32.mrb[195].mxu1 }
 0x3f0   : > { %v4990_v45 = vmax.f32 %v4958_v44, 0.0  ;;  %v4959_v31 = vadd.f32 %v4895_v22, %v9551_v12 }
 0x3f2   : > { %5022 = vst [vmem:[%s6851_s25 + $0xf0] sm:$0xff] %v4990_v45  ;;  %v4991_v57 = vmax.f32 %v4959_v31, 0.0 }
 0x3f4   : > { %5023 = vst [vmem:[%s6851_s25 + $0xf8] sm:$0xff] %v4991_v57 }
 0x3f5   : > { %6566 = shalt.err (!%p6563_p5)
}
 0x3f6   : > { %s6567_s18 = scalar_lea.hbm %s9034_s21, 4096  ;;  %s6571_s11 = scalar_lea.hbm %s9096_s8, 8192 }
 0x3f7   : > { %p6568_p6 = scmp.ne.s32.totalorder %s9034_s21, %s6567_s18  ;;  %p6572_p10 = scmp.lt.u32.totalorder %s9034_s21, %s9096_s8 }
 0x3f8   : > { %p6573_p11 = scmp.lt.u32.totalorder %s6571_s11, %s6567_s18  ;;  %p6575_p13 = scmp.lt.u32.totalorder %s6567_s18, %s9034_s21 }
 0x3f9   : > { %p6569_p7 = pnand %p6568_p6, %p6727_p4 }
 0x3fa   : > { %p6574_p12 = por %p6573_p11, %p6572_p10 }
 0x3fb   : > { %p6570_p9 = pneg %p6569_p7 }
 0x3fc   : > { %p6576_p0 = por %p6575_p13, %p6574_p12 }
 0x3fe   : > { %p6577_p1 = pnand %p6576_p0, %p6570_p9 }
 0x400   : > { %6580 = shalt.err (!%p6577_p1)
}
 0x401   : > { %s6640_s20 = smov 128   ;;  %s6641_s22 = smov 8  }
 0x402   : > { %6298 = dma.vmem_to_hbm [thread:$0]  (%p6727_p4), %s9036_s15, 4096, %s9034_s21, %s9042_s29, %s6640_s20, %s6640_s20, %s6641_s22  }
 0x403 PF: > { %p6304_p2 = scmp.ge.s32.totalorder %s6633_s9, 2  ;;  %s5056_s23 = sand.u32 1, %s6613_s26  }
 0x404   : > { %s5057_s24 = scalar_lea.sflag [#allocation6], %s5056_s23 }
 0x405   : > { %p6301_p3 = pnand %p6304_p2, %p6734_p8 }
 0x407   : > { %6608 = dma.done.wait (!%p6301_p3), %s5057_s24, 4096  }
 0x408   : > { %6610 = vsyncadd (!%p6301_p3), %s5057_s24, 4294963200  ;;  %s21_s9 = sadd.s32 1, %s6633_s9   ;;  %s9552_s26 = smov %s6617_s27 }
 0x409   : > { %p18_p5 = scmp.ge.s32.totalorder %s21_s9, 4   ;;  %s9553_s27 = smov %s6621_s28 }
 0x40a   : > { %s9554_s28 = smov %s6740_s17  ;;  %s9555_s29 = smov %s6629_s30 }
 0x40b   : > { %s9556_s30 = smov %s9558_s12  ;;  %20 = sbr.rel (!%p18_p5) target bundleno = 4 (0x4), region = 243 }
 0x412   :  { %5062 = vsyncpa [#allocation6], 1 }
 0x413   :  { %5064 = vsyncpa [#allocation6 + $0x1], 1 }
 0x414   :  { %5065 = vsyncmov [#allocation4] }
 0x417   :  { %s5066_s14 = vpop.sfrf %5065 }
 0x418   :  { %p5954_p4 = scmp.ne.s32.totalorder %s5066_s14, 0 }
 0x41a   :  { %5070 = shalt.err (%p5954_p4)  }
 0x41b   :  { %5072 = vsyncmov [#allocation4 + $0x1] }
 0x41e   :  { %s5073_s16 = vpop.sfrf %5072 }
 0x41f   :  { %p5955_p8 = scmp.ne.s32.totalorder %s5073_s16, 0 }
 0x421   :  { %5077 = shalt.err (%p5955_p8)  }
 0x422   :  { %5079 = vsyncmov [#allocation4 + $0x2] }
 0x425   :  { %s5080_s15 = vpop.sfrf %5079 }
 0x426   :  { %p5956_p6 = scmp.ne.s32.totalorder %s5080_s15, 0 }
 0x428   :  { %5084 = shalt.err (%p5956_p6)  }

</bundles_post_ra>
